<compile_context>
chip_gen: v7x
topology: tpu7x:2x2x1
jax: 0.10.0
libtpu: 0.0.40
codegen_flags: <defaults>
</compile_context>

<pallas_src>
import functools

import jax
import jax.numpy as jnp
from jax import lax
from jax.experimental import pallas as pl
from jax.experimental.pallas import tpu as pltpu

EPS = 1e-5
LANE = 128
VMEM_LIMIT_BYTES = 32 * 1024 * 1024   # all blocks here are far below this; safe on v5e/v6e/v7x
TILE_M_CAP = 1024                     # rows per (M, C) tile for the 1x1 / elementwise passes
CONV2_ROW_CAP = 2048                  # tile_h * W output rows per conv2 grid step
PAD_L = 8                             # left spatial pad inside the conv2 scratch (aligned stores)

_CP_1D = pltpu.CompilerParams(
    dimension_semantics=("parallel",), vmem_limit_bytes=VMEM_LIMIT_BYTES)
_CP_2D = pltpu.CompilerParams(
    dimension_semantics=("parallel", "arbitrary"), vmem_limit_bytes=VMEM_LIMIT_BYTES)


# ---------------------------------------------------------------------------
# helpers
# ---------------------------------------------------------------------------
def _round_up(n, m=LANE):
    return ((n + m - 1) // m) * m


def _pad_last(a, target):
    pad = target - a.shape[-1]
    if pad == 0:
        return a
    return jnp.pad(a, [(0, 0)] * (a.ndim - 1) + [(0, pad)])


def _pick_tile_m(m, cap=TILE_M_CAP):
    """Rows per tile for the (M, C) passes; M gets zero-padded up to a multiple of it."""
    n_tiles = max(2, -(-m // cap))            # prefer >= 2 grid steps (megacore / pipelining)
    tile = _round_up(-(-m // n_tiles), 8)     # sublane-dense tiles
    return max(8, min(tile, _round_up(m, 8)))


def _pick_tile_h(h, w, cap_rows=CONV2_ROW_CAP):
    """H-tile for the 3x3 conv: divides H, tile_h*W sublane-dense and under the row cap."""
    cands = [t for t in range(1, h + 1)
             if h % t == 0 and (t * w) % 8 == 0 and t * w <= cap_rows]
    if not cands:
        return h          # TODO(synk): odd W (e.g. 7) falls back to whole-image blocks
    sub = [t for t in cands if t < h] or cands   # prefer >= 2 H-steps
    return max(sub)


def _bn_fold(stats, count, gamma, beta, cpad):
    """Finalize fused-conv partial stats (T, 8, 2*C; sublane-replicated) into scale/shift."""
    g = _pad_last(gamma.reshape(1, -1).astype(jnp.float32), cpad)
    b = _pad_last(beta.reshape(1, -1).astype(jnp.float32), cpad)
    st = stats[:, 0, :]                                     # (T, 2*C)
    s = jnp.sum(st[:, :cpad], axis=0, keepdims=True)        # (1, C)
    ss = jnp.sum(st[:, cpad:], axis=0, keepdims=True)       # (1, C)
    mean = s / count
    var = jnp.maximum(ss / count - mean * mean, 0.0)         # biased var (PyTorch BN fwd)
    inv = jax.lax.rsqrt(var + EPS)
    scale = g * inv
    shift = b - mean * scale
    return scale, shift


def _write_stats(st_ref, acc):
    """Per-tile BN partials as a lane-dense, full-sublane (1, 8, 2*C) block."""
    s = jnp.sum(acc, axis=0, keepdims=True)
    ss = jnp.sum(acc * acc, axis=0, keepdims=True)
    row = jnp.concatenate([s, ss], axis=1)                  # (1, 2*C)
    st_ref[...] = jnp.broadcast_to(row[:, None, :], st_ref.shape)


# ---------------------------------------------------------------------------
# Pallas kernels
# ---------------------------------------------------------------------------
def conv1x1_stats_kernel(x_ref, w_ref, o_ref, st_ref):
    """conv1 (1x1) tile: (tm, K) @ (K, C) with fused BN1 partial stats. bf16 output."""
    acc = jnp.dot(x_ref[...].astype(jnp.bfloat16), w_ref[...],
                  preferred_element_type=jnp.float32)
    o_ref[...] = acc.astype(o_ref.dtype)
    _write_stats(st_ref, acc)                # padded M-rows are zero -> stats stay exact


def conv2_3x3_kernel(x_ref, sc_ref, sh_ref, w_ref, o_ref, st_ref, xpad_ref,
                     *, h, w, tile_h):
    """Fused: bn1-normalize + ReLU + 3x3 conv (stride 1, pad 1) + BN2 partial stats.

    x_ref   : (H*W, Cp) bf16   raw conv1 output for image `n` (resident across H-tiles)
    w_ref   : (9, Cp, C2) bf16 taps (dy, dx) major
    o_ref   : (tile_h*W, C2)   bf16 output rows for this H-tile
    xpad_ref: (H+2, W+2*PAD_L, Cp) f32 scratch holding relu(bn1(x)) with a zero border
    """
    cp = x_ref.shape[1]
    c2 = o_ref.shape[1]
    hi = pl.program_id(1)

    # Build the spatially padded, bn1-normalized, relu'd image once per image (hi == 0).
    @pl.when(hi == 0)
    def _():
        xpad_ref[...] = jnp.zeros_like(xpad_ref)
        xf = x_ref[...].astype(jnp.float32)
        y = jnp.maximum(xf * sc_ref[...] + sh_ref[...], 0.0).reshape(h, w, cp)
        xpad_ref[1:h + 1, PAD_L:PAD_L + w, :] = y           # aligned interior store

    # 9 per-tap MXU matmuls accumulated in f32 (no im2col materialization).
    row0 = hi * tile_h
    acc = jnp.zeros((tile_h * w, c2), jnp.float32)
    for dy in range(3):
        rows = xpad_ref[pl.ds(row0 + dy, tile_h), :, :]      # (tile_h, W+2*PAD_L, Cp)
        for dx in range(3):
            c0 = PAD_L - 1 + dx
            tap = rows[:, c0:c0 + w, :].reshape(tile_h * w, cp).astype(jnp.bfloat16)
            acc = acc + jnp.dot(tap, w_ref[3 * dy + dx],
                                preferred_element_type=jnp.float32)

    o_ref[...] = acc.astype(o_ref.dtype)
    _write_stats(st_ref, acc)


def bn_relu_conv1x1_stats_kernel(x_ref, sc_ref, sh_ref, w_ref, o_ref, st_ref,
                                 *, m_real, tile_m, need_mask):
    """Fused: bn2-normalize + ReLU + conv3 (1x1) + BN3 partial stats."""
    t = jnp.maximum(x_ref[...].astype(jnp.float32) * sc_ref[...] + sh_ref[...], 0.0)
    if need_mask:
        # Rows beyond the real M would contribute relu(shift2) != 0; mask them out so
        # the conv3 output and the fused BN3 stats on padded rows are exactly zero.
        row = (pl.program_id(0) * tile_m
               + lax.broadcasted_iota(jnp.int32, (tile_m, 1), 0))
        t = jnp.where(row < m_real, t, 0.0)
    acc = jnp.dot(t.astype(jnp.bfloat16), w_ref[...],
                  preferred_element_type=jnp.float32)
    o_ref[...] = acc
    _write_stats(st_ref, acc)


def bn_add_relu_kernel(x_ref, r_ref, sc_ref, sh_ref, o_ref):
    """bn3-normalize + residual add + ReLU."""
    o_ref[...] = jnp.maximum(x_ref[...] * sc_ref[...] + sh_ref[...] + r_ref[...], 0.0)


# ---------------------------------------------------------------------------
# pallas_call wrappers
# ---------------------------------------------------------------------------
def conv1x1_stats_pallas(x, w_bf16, tile_m):
    m, k = x.shape
    c = w_bf16.shape[1]
    t = m // tile_m
    return pl.pallas_call(
        conv1x1_stats_kernel,
        out_shape=(jax.ShapeDtypeStruct((m, c), jnp.bfloat16),
                   jax.ShapeDtypeStruct((t, 8, 2 * c), jnp.float32)),
        grid=(t,),
        in_specs=[pl.BlockSpec((tile_m, k), lambda i: (i, 0)),
                  pl.BlockSpec((k, c), lambda i: (0, 0))],
        out_specs=(pl.BlockSpec((tile_m, c), lambda i: (i, 0)),
                   pl.BlockSpec((1, 8, 2 * c), lambda i: (i, 0, 0))),
        compiler_params=_CP_1D,
    )(x, w_bf16)


def conv2_3x3_pallas(out1_slab, scale1, shift1, w2_taps, n, h, w, tile_h, m_pad):
    cp = out1_slab.shape[1]
    c2 = w2_taps.shape[2]
    n_h = h // tile_h
    kern = functools.partial(conv2_3x3_kernel, h=h, w=w, tile_h=tile_h)
    return pl.pallas_call(
        kern,
        out_shape=(jax.ShapeDtypeStruct((m_pad, c2), jnp.bfloat16),
                   jax.ShapeDtypeStruct((n * n_h, 8, 2 * c2), jnp.float32)),
        grid=(n, n_h),
        in_specs=[
            # whole image per batch; block index independent of hi -> fetched once per image
            pl.BlockSpec((h * w, cp), lambda ni, hi: (ni, 0)),
            pl.BlockSpec((1, cp), lambda ni, hi: (0, 0)),
            pl.BlockSpec((1, cp), lambda ni, hi: (0, 0)),
            pl.BlockSpec((9, cp, c2), lambda ni, hi: (0, 0, 0)),
        ],
        out_specs=(
            pl.BlockSpec((tile_h * w, c2), lambda ni, hi: (ni * n_h + hi, 0)),
            pl.BlockSpec((1, 8, 2 * c2), lambda ni, hi: (ni * n_h + hi, 0, 0)),
        ),
        scratch_shapes=[pltpu.VMEM((h + 2, w + 2 * PAD_L, cp), jnp.float32)],
        compiler_params=_CP_2D,
    )(out1_slab, scale1, shift1, w2_taps)


def bn_relu_conv1x1_stats_pallas(x, scale, shift, w_bf16, tile_m, m_real):
    m, c = x.shape
    c2 = w_bf16.shape[1]
    t = m // tile_m
    kern = functools.partial(bn_relu_conv1x1_stats_kernel,
                             m_real=m_real, tile_m=tile_m, need_mask=(m != m_real))
    return pl.pallas_call(
        kern,
        out_shape=(jax.ShapeDtypeStruct((m, c2), jnp.float32),
                   jax.ShapeDtypeStruct((t, 8, 2 * c2), jnp.float32)),
        grid=(t,),
        in_specs=[pl.BlockSpec((tile_m, c), lambda i: (i, 0)),
                  pl.BlockSpec((1, c), lambda i: (0, 0)),
                  pl.BlockSpec((1, c), lambda i: (0, 0)),
                  pl.BlockSpec((c, c2), lambda i: (0, 0))],
        out_specs=(pl.BlockSpec((tile_m, c2), lambda i: (i, 0)),
                   pl.BlockSpec((1, 8, 2 * c2), lambda i: (i, 0, 0))),
        compiler_params=_CP_1D,
    )(x, scale, shift, w_bf16)


def bn_add_relu_pallas(x, res, scale, shift, tile_m):
    m, c = x.shape
    t = m // tile_m
    return pl.pallas_call(
        bn_add_relu_kernel,
        out_shape=jax.ShapeDtypeStruct((m, c), jnp.float32),
        grid=(t,),
        in_specs=[pl.BlockSpec((tile_m, c), lambda i: (i, 0)),
                  pl.BlockSpec((tile_m, c), lambda i: (i, 0)),
                  pl.BlockSpec((1, c), lambda i: (0, 0)),
                  pl.BlockSpec((1, c), lambda i: (0, 0))],
        out_specs=pl.BlockSpec((tile_m, c), lambda i: (i, 0)),
        compiler_params=_CP_1D,
    )(x, res, scale, shift)


# ---------------------------------------------------------------------------
# parameters & forward
# ---------------------------------------------------------------------------
def init_bottleneck_params(key, inplanes, planes):
    """Deterministic synthetic parameters (shapes match the PyTorch module)."""
    k1, k2, k3 = jax.random.split(key, 3)
    exp = 4
    return {
        "w1": (2.0 / inplanes) ** 0.5 *
              jax.random.normal(k1, (inplanes, planes), jnp.float32),          # 1x1
        "w2": (2.0 / (9 * planes)) ** 0.5 *
              jax.random.normal(k2, (3, 3, planes, planes), jnp.float32),      # 3x3 HWIO
        "w3": (2.0 / planes) ** 0.5 *
              jax.random.normal(k3, (planes, planes * exp), jnp.float32),      # 1x1
        "g1": jnp.ones((planes,), jnp.float32), "b1": jnp.zeros((planes,), jnp.float32),
        "g2": jnp.ones((planes,), jnp.float32), "b2": jnp.zeros((planes,), jnp.float32),
        "g3": jnp.ones((planes * exp,), jnp.float32),
        "b3": jnp.zeros((planes * exp,), jnp.float32),
    }


def bottleneck_forward(x_nchw, params):
    """Bottleneck.forward (stride=1, downsample=None, BatchNorm2d). NCHW f32 I/O."""
    n, cin, h, w = x_nchw.shape
    planes = params["w1"].shape[1]
    c4 = params["w3"].shape[1]
    assert cin == c4, "downsample=None requires inplanes == planes * expansion"

    cin_p, cp, c4p = _round_up(cin), _round_up(planes), _round_up(c4)
    m = n * h * w
    tile_m = _pick_tile_m(m)
    m_pad = _round_up(m, tile_m)
    tile_h = _pick_tile_h(h, w)

    # layout glue (XLA): NCHW -> NHWC -> lane-dense (M_pad, Cin_p) slab, zero-padded.
    x_nhwc = jnp.transpose(x_nchw, (0, 2, 3, 1)).astype(jnp.float32)
    x_slab = jnp.pad(x_nhwc.reshape(m, cin),
                     ((0, m_pad - m), (0, cin_p - cin)))                       # (M_pad, Cin_p)

    # channel-padded bf16 weights (zero pad keeps real-channel math exact)
    w1 = jnp.pad(params["w1"], ((0, cin_p - cin), (0, cp - planes))).astype(jnp.bfloat16)
    w2 = jnp.pad(params["w2"], ((0, 0), (0, 0),
                                (0, cp - planes), (0, cp - planes)))
    w2 = w2.reshape(9, cp, cp).astype(jnp.bfloat16)                            # (9, Cp, Cp)
    w3 = jnp.pad(params["w3"], ((0, cp - planes), (0, c4p - c4))).astype(jnp.bfloat16)

    # pass 1: conv1 (1x1) + fused BN1 partial stats  (bf16 activation out)
    out1, st1 = conv1x1_stats_pallas(x_slab, w1, tile_m)                       # (M_pad, Cp)
    sc1, sh1 = _bn_fold(st1, m, params["g1"], params["b1"], cp)

    # pass 2: fused bn1-normalize + relu + 3x3 conv (stride 1, pad 1) + BN2 stats
    out2, st2 = conv2_3x3_pallas(out1, sc1, sh1, w2, n, h, w, tile_h, m_pad)   # (M_pad, Cp)
    sc2, sh2 = _bn_fold(st2, m, params["g2"], params["b2"], cp)

    # pass 3: fused bn2-normalize + relu + conv3 (1x1) + BN3 stats
    out3, st3 = bn_relu_conv1x1_stats_pallas(out2, sc2, sh2, w3, tile_m, m)    # (M_pad, C4p)
    sc3, sh3 = _bn_fold(st3, m, params["g3"], params["b3"], c4p)

    # pass 4: bn3-normalize + residual add + relu
    out = bn_add_relu_pallas(out3, x_slab, sc3, sh3, tile_m)                   # (M_pad, C4p)

    out = out[:m, :c4].reshape(n, h, w, c4)
    return jnp.transpose(out, (0, 3, 1, 2))                                    # NHWC -> NCHW


def bottleneck_reference(x_nchw, params):
    """Pure-JAX f32 reference of the same forward math (sanity check)."""
    x = jnp.transpose(x_nchw, (0, 2, 3, 1))

    def bn(z, g, b):
        mu = jnp.mean(z, axis=(0, 1, 2))
        var = jnp.mean((z - mu) ** 2, axis=(0, 1, 2))
        return (z - mu) * jax.lax.rsqrt(var + EPS) * g + b

    out = jnp.einsum("nhwc,cd->nhwd", x, params["w1"])
    out = jax.nn.relu(bn(out, params["g1"], params["b1"]))
    out = jax.lax.conv_general_dilated(
        out, params["w2"], window_strides=(1, 1), padding=((1, 1), (1, 1)),
        dimension_numbers=("NHWC", "HWIO", "NHWC"))
    out = jax.nn.relu(bn(out, params["g2"], params["b2"]))
    out = jnp.einsum("nhwc,cd->nhwd", out, params["w3"])
    out = bn(out, params["g3"], params["b3"])
    out = jax.nn.relu(out + x)
    return jnp.transpose(out, (0, 3, 1, 2))


if __name__ == "__main__":
    key = jax.random.PRNGKey(0)
    kx, kp = jax.random.split(key)

    N, planes, H, W = 2, 4, 16, 16
    inplanes = planes * 4            # downsample=None path => inplanes == planes*expansion
    x = jax.random.normal(kx, (N, inplanes, H, W), dtype=jnp.float32)
    params = init_bottleneck_params(kp, inplanes=inplanes, planes=planes)

    fwd = jax.jit(bottleneck_forward)
    y = jax.block_until_ready(fwd(x, params))

    assert y.shape == (N, inplanes, H, W)
    assert bool(jnp.all(jnp.isfinite(y)))
    assert bool(jnp.all(y >= 0.0))                       # final ReLU

    y_ref = jax.block_until_ready(jax.jit(bottleneck_reference)(x, params))
    assert bool(jnp.allclose(y, y_ref, atol=2e-1, rtol=2e-2))   # bf16 matmul/storage tolerance

    print("KERNEL_OK")
</pallas_src>

<mosaic_0001>
module attributes {stable_mosaic.version = 11 : i64} {
  func.func @conv1x1_stats_kernel(%arg0: i32, %arg1: memref<256x128xf32, #tpu.memory_space<vmem>>, %arg2: memref<128x128xbf16, #tpu.memory_space<vmem>>, %arg3: memref<256x128xbf16, #tpu.memory_space<vmem>>, %arg4: memref<1x8x256xf32, #tpu.memory_space<vmem>>) attributes {dimension_semantics = [#tpu.dimension_semantics<parallel>], iteration_bounds = array<i64: 2>, scalar_prefetch = 0 : i64, scratch_operands = 0 : i64, tpu.core_type = #tpu.core_type<tc>, window_params = [{transform_indices = @transform_0, window_bounds = array<i64: 256, 128>}, {pipeline_mode = #tpu.pipeline_mode<synchronous>, transform_indices = @transform_1, window_bounds = array<i64: 128, 128>}, {transform_indices = @transform_2, window_bounds = array<i64: 256, 128>}, {transform_indices = @transform_3, window_bounds = array<i64: 1, 8, 256>}]} {
    %c0 = arith.constant 0 : index
    %c0_0 = arith.constant 0 : index
    %0 = vector.load %arg1[%c0, %c0_0] : memref<256x128xf32, #tpu.memory_space<vmem>>, vector<256x128xf32>
    %1 = arith.truncf %0 : vector<256x128xf32> to vector<256x128xbf16>
    %c0_1 = arith.constant 0 : index
    %c0_2 = arith.constant 0 : index
    %2 = vector.load %arg2[%c0_1, %c0_2] : memref<128x128xbf16, #tpu.memory_space<vmem>>, vector<128x128xbf16>
    %cst = arith.constant dense<0.000000e+00> : vector<256x128xf32>
    %3 = tpu.matmul %1, %2, %cst {dimension_numbers = #tpu.dot_dimension_numbers<[1], [0], [0], [1], [0, 0, 1, 1], [], []>} : vector<256x128xbf16>, vector<128x128xbf16>, vector<256x128xf32> -> vector<256x128xf32>
    %4 = arith.truncf %3 : vector<256x128xf32> to vector<256x128xbf16>
    %c0_3 = arith.constant 0 : index
    %c0_4 = arith.constant 0 : index
    %5 = vector.load %arg3[%c0_3, %c0_4] : memref<256x128xbf16, #tpu.memory_space<vmem>>, vector<256x128xbf16>
    tpu.vector_store %arg3[%c0_3, %c0_4], %4 {strides = array<i32>} : memref<256x128xbf16, #tpu.memory_space<vmem>>, vector<256x128xbf16>,
    %cst_5 = arith.constant dense<0.000000e+00> : vector<128xf32>
    %6 = vector.multi_reduction <add>, %3, %cst_5 [0] : vector<256x128xf32> to vector<128xf32>
    %7 = vector.shape_cast %6 : vector<128xf32> to vector<1x128xf32>
    %8 = arith.mulf %3, %3 : vector<256x128xf32>
    %cst_6 = arith.constant dense<0.000000e+00> : vector<128xf32>
    %9 = vector.multi_reduction <add>, %8, %cst_6 [0] : vector<256x128xf32> to vector<128xf32>
    %10 = vector.shape_cast %9 : vector<128xf32> to vector<1x128xf32>
    %11 = tpu.concatenate %7, %10 in 1 : vector<1x128xf32>, vector<1x128xf32> -> vector<1x256xf32>
    %12 = vector.shape_cast %11 : vector<1x256xf32> to vector<1x1x256xf32>
    %13 = vector.shape_cast %12 : vector<1x1x256xf32> to vector<1x1x256xf32>
    %14 = vector.broadcast %13 : vector<1x1x256xf32> to vector<1x8x256xf32>
    %c0_7 = arith.constant 0 : index
    %c0_8 = arith.constant 0 : index
    %c0_9 = arith.constant 0 : index
    %15 = vector.load %arg4[%c0_7, %c0_8, %c0_9] : memref<1x8x256xf32, #tpu.memory_space<vmem>>, vector<1x8x256xf32>
    tpu.vector_store %arg4[%c0_7, %c0_8, %c0_9], %14 {strides = array<i32>} : memref<1x8x256xf32, #tpu.memory_space<vmem>>, vector<1x8x256xf32>,
    return
  }
  func.func @transform_0(%arg0: i32) -> (i32, i32) {
    %c0_i32 = arith.constant 0 : i32
    %c0_i32_0 = arith.constant 0 : i32
    return %arg0, %c0_i32 : i32, i32
  }
  func.func @transform_1(%arg0: i32) -> (i32, i32) {
    %c0_i32 = arith.constant 0 : i32
    %c0_i32_0 = arith.constant 0 : i32
    %c0_i32_1 = arith.constant 0 : i32
    return %c0_i32, %c0_i32_0 : i32, i32
  }
  func.func @transform_2(%arg0: i32) -> (i32, i32) {
    %c0_i32 = arith.constant 0 : i32
    %c0_i32_0 = arith.constant 0 : i32
    return %arg0, %c0_i32 : i32, i32
  }
  func.func @transform_3(%arg0: i32) -> (i32, i32, i32) {
    %c0_i32 = arith.constant 0 : i32
    %c0_i32_0 = arith.constant 0 : i32
    %c0_i32_1 = arith.constant 0 : i32
    return %arg0, %c0_i32, %c0_i32_0 : i32, i32, i32
  }
}

module attributes {stable_mosaic.version = 11 : i64} {
  func.func @conv2_3x3_kernel(%arg0: i32, %arg1: i32, %arg2: memref<256x128xbf16, #tpu.memory_space<vmem>>, %arg3: memref<1x128xf32, #tpu.memory_space<vmem>>, %arg4: memref<1x128xf32, #tpu.memory_space<vmem>>, %arg5: memref<9x128x128xbf16, #tpu.memory_space<vmem>>, %arg6: memref<128x128xbf16, #tpu.memory_space<vmem>>, %arg7: memref<1x8x256xf32, #tpu.memory_space<vmem>>, %arg8: memref<18x32x128xf32, #tpu.memory_space<vmem>>) attributes {dimension_semantics = [#tpu.dimension_semantics<parallel>, #tpu.dimension_semantics<arbitrary>], iteration_bounds = array<i64: 2, 2>, scalar_prefetch = 0 : i64, scratch_operands = 1 : i64, tpu.core_type = #tpu.core_type<tc>, window_params = [{transform_indices = @transform_0, window_bounds = array<i64: 256, 128>}, {pipeline_mode = #tpu.pipeline_mode<synchronous>, transform_indices = @transform_1, window_bounds = array<i64: 1, 128>}, {pipeline_mode = #tpu.pipeline_mode<synchronous>, transform_indices = @transform_2, window_bounds = array<i64: 1, 128>}, {pipeline_mode = #tpu.pipeline_mode<synchronous>, transform_indices = @transform_3, window_bounds = array<i64: 9, 128, 128>}, {transform_indices = @transform_4, window_bounds = array<i64: 128, 128>}, {transform_indices = @transform_5, window_bounds = array<i64: 1, 8, 256>}]} {
    %c0_i32 = arith.constant 0 : i32
    %0 = arith.cmpi eq, %arg1, %c0_i32 : i32
    %1 = arith.extui %0 : i1 to i32
    %c0_i32_0 = arith.constant 0 : i32
    %2 = arith.cmpi ne, %1, %c0_i32_0 : i32
    scf.if %2 {
      %cst_42 = arith.constant 0.000000e+00 : f32
      %89 = vector.broadcast %cst_42 : f32 to vector<18x32x128xf32>
      %c0_43 = arith.constant 0 : index
      %c0_44 = arith.constant 0 : index
      %c0_45 = arith.constant 0 : index
      %90 = vector.load %arg8[%c0_43, %c0_44, %c0_45] : memref<18x32x128xf32, #tpu.memory_space<vmem>>, vector<18x32x128xf32>
      tpu.vector_store %arg8[%c0_43, %c0_44, %c0_45], %89 {strides = array<i32>} : memref<18x32x128xf32, #tpu.memory_space<vmem>>, vector<18x32x128xf32>,
      %c0_46 = arith.constant 0 : index
      %c0_47 = arith.constant 0 : index
      %91 = vector.load %arg2[%c0_46, %c0_47] : memref<256x128xbf16, #tpu.memory_space<vmem>>, vector<256x128xbf16>
      %92 = arith.extf %91 : vector<256x128xbf16> to vector<256x128xf32>
      %c0_48 = arith.constant 0 : index
      %c0_49 = arith.constant 0 : index
      %93 = vector.load %arg3[%c0_48, %c0_49] : memref<1x128xf32, #tpu.memory_space<vmem>>, vector<1x128xf32>
      %94 = vector.broadcast %93 : vector<1x128xf32> to vector<256x128xf32>
      %95 = arith.mulf %92, %94 : vector<256x128xf32>
      %c0_50 = arith.constant 0 : index
      %c0_51 = arith.constant 0 : index
      %96 = vector.load %arg4[%c0_50, %c0_51] : memref<1x128xf32, #tpu.memory_space<vmem>>, vector<1x128xf32>
      %97 = vector.broadcast %96 : vector<1x128xf32> to vector<256x128xf32>
      %98 = arith.addf %95, %97 : vector<256x128xf32>
      %cst_52 = arith.constant 0.000000e+00 : f32
      %99 = vector.broadcast %cst_52 : f32 to vector<256x128xf32>
      %100 = arith.maximumf %98, %99 : vector<256x128xf32>
      %101 = vector.shape_cast %100 : vector<256x128xf32> to vector<16x16x128xf32>
      %c1_53 = arith.constant 1 : index
      %c8_54 = arith.constant 8 : index
      %c0_55 = arith.constant 0 : index
      %102 = vector.load %arg8[%c1_53, %c8_54, %c0_55] : memref<18x32x128xf32, #tpu.memory_space<vmem>>, vector<16x16x128xf32>
      tpu.vector_store %arg8[%c1_53, %c8_54, %c0_55], %101 {strides = array<i32>} : memref<18x32x128xf32, #tpu.memory_space<vmem>>, vector<16x16x128xf32>,
    } else {
    }
    %c8_i32 = arith.constant 8 : i32
    %3 = arith.muli %arg1, %c8_i32 : i32
    %cst = arith.constant 0.000000e+00 : f32
    %4 = vector.broadcast %cst : f32 to vector<128x128xf32>
    %c0_i32_1 = arith.constant 0 : i32
    %5 = arith.addi %3, %c0_i32_1 : i32
    %6 = arith.index_cast %5 : i32 to index
    %c0 = arith.constant 0 : index
    %c0_2 = arith.constant 0 : index
    %7 = vector.load %arg8[%6, %c0, %c0_2] : memref<18x32x128xf32, #tpu.memory_space<vmem>>, vector<8x32x128xf32>
    %8 = vector.extract_strided_slice %7 {offsets = [0, 7, 0], sizes = [8, 16, 128], strides = [1, 1, 1]} : vector<8x32x128xf32> to vector<8x16x128xf32>
    %9 = vector.shape_cast %8 : vector<8x16x128xf32> to vector<128x128xf32>
    %10 = arith.truncf %9 : vector<128x128xf32> to vector<128x128xbf16>
    %c0_3 = arith.constant 0 : index
    %c0_4 = arith.constant 0 : index
    %c0_5 = arith.constant 0 : index
    %11 = vector.load %arg5[%c0_3, %c0_4, %c0_5] : memref<9x128x128xbf16, #tpu.memory_space<vmem>>, vector<1x128x128xbf16>
    %12 = vector.shape_cast %11 : vector<1x128x128xbf16> to vector<128x128xbf16>
    %cst_6 = arith.constant dense<0.000000e+00> : vector<128x128xf32>
    %13 = tpu.matmul %10, %12, %cst_6 {dimension_numbers = #tpu.dot_dimension_numbers<[1], [0], [0], [1], [0, 0, 1, 1], [], []>} : vector<128x128xbf16>, vector<128x128xbf16>, vector<128x128xf32> -> vector<128x128xf32>
    %14 = arith.addf %4, %13 : vector<128x128xf32>
    %15 = vector.extract_strided_slice %7 {offsets = [0, 8, 0], sizes = [8, 16, 128], strides = [1, 1, 1]} : vector<8x32x128xf32> to vector<8x16x128xf32>
    %16 = vector.shape_cast %15 : vector<8x16x128xf32> to vector<128x128xf32>
    %17 = arith.truncf %16 : vector<128x128xf32> to vector<128x128xbf16>
    %c1 = arith.constant 1 : index
    %c0_7 = arith.constant 0 : index
    %c0_8 = arith.constant 0 : index
    %18 = vector.load %arg5[%c1, %c0_7, %c0_8] : memref<9x128x128xbf16, #tpu.memory_space<vmem>>, vector<1x128x128xbf16>
    %19 = vector.shape_cast %18 : vector<1x128x128xbf16> to vector<128x128xbf16>
    %cst_9 = arith.constant dense<0.000000e+00> : vector<128x128xf32>
    %20 = tpu.matmul %17, %19, %cst_9 {dimension_numbers = #tpu.dot_dimension_numbers<[1], [0], [0], [1], [0, 0, 1, 1], [], []>} : vector<128x128xbf16>, vector<128x128xbf16>, vector<128x128xf32> -> vector<128x128xf32>
    %21 = arith.addf %14, %20 : vector<128x128xf32>
    %22 = vector.extract_strided_slice %7 {offsets = [0, 9, 0], sizes = [8, 16, 128], strides = [1, 1, 1]} : vector<8x32x128xf32> to vector<8x16x128xf32>
    %23 = vector.shape_cast %22 : vector<8x16x128xf32> to vector<128x128xf32>
    %24 = arith.truncf %23 : vector<128x128xf32> to vector<128x128xbf16>
    %c2 = arith.constant 2 : index
    %c0_10 = arith.constant 0 : index
    %c0_11 = arith.constant 0 : index
    %25 = vector.load %arg5[%c2, %c0_10, %c0_11] : memref<9x128x128xbf16, #tpu.memory_space<vmem>>, vector<1x128x128xbf16>
    %26 = vector.shape_cast %25 : vector<1x128x128xbf16> to vector<128x128xbf16>
    %cst_12 = arith.constant dense<0.000000e+00> : vector<128x128xf32>
    %27 = tpu.matmul %24, %26, %cst_12 {dimension_numbers = #tpu.dot_dimension_numbers<[1], [0], [0], [1], [0, 0, 1, 1], [], []>} : vector<128x128xbf16>, vector<128x128xbf16>, vector<128x128xf32> -> vector<128x128xf32>
    %28 = arith.addf %21, %27 : vector<128x128xf32>
    %c1_i32 = arith.constant 1 : i32
    %29 = arith.addi %3, %c1_i32 : i32
    %30 = arith.index_cast %29 : i32 to index
    %c0_13 = arith.constant 0 : index
    %c0_14 = arith.constant 0 : index
    %31 = vector.load %arg8[%30, %c0_13, %c0_14] : memref<18x32x128xf32, #tpu.memory_space<vmem>>, vector<8x32x128xf32>
    %32 = vector.extract_strided_slice %31 {offsets = [0, 7, 0], sizes = [8, 16, 128], strides = [1, 1, 1]} : vector<8x32x128xf32> to vector<8x16x128xf32>
    %33 = vector.shape_cast %32 : vector<8x16x128xf32> to vector<128x128xf32>
    %34 = arith.truncf %33 : vector<128x128xf32> to vector<128x128xbf16>
    %c3 = arith.constant 3 : index
    %c0_15 = arith.constant 0 : index
    %c0_16 = arith.constant 0 : index
    %35 = vector.load %arg5[%c3, %c0_15, %c0_16] : memref<9x128x128xbf16, #tpu.memory_space<vmem>>, vector<1x128x128xbf16>
    %36 = vector.shape_cast %35 : vector<1x128x128xbf16> to vector<128x128xbf16>
    %cst_17 = arith.constant dense<0.000000e+00> : vector<128x128xf32>
    %37 = tpu.matmul %34, %36, %cst_17 {dimension_numbers = #tpu.dot_dimension_numbers<[1], [0], [0], [1], [0, 0, 1, 1], [], []>} : vector<128x128xbf16>, vector<128x128xbf16>, vector<128x128xf32> -> vector<128x128xf32>
    %38 = arith.addf %28, %37 : vector<128x128xf32>
    %39 = vector.extract_strided_slice %31 {offsets = [0, 8, 0], sizes = [8, 16, 128], strides = [1, 1, 1]} : vector<8x32x128xf32> to vector<8x16x128xf32>
    %40 = vector.shape_cast %39 : vector<8x16x128xf32> to vector<128x128xf32>
    %41 = arith.truncf %40 : vector<128x128xf32> to vector<128x128xbf16>
    %c4 = arith.constant 4 : index
    %c0_18 = arith.constant 0 : index
    %c0_19 = arith.constant 0 : index
    %42 = vector.load %arg5[%c4, %c0_18, %c0_19] : memref<9x128x128xbf16, #tpu.memory_space<vmem>>, vector<1x128x128xbf16>
    %43 = vector.shape_cast %42 : vector<1x128x128xbf16> to vector<128x128xbf16>
    %cst_20 = arith.constant dense<0.000000e+00> : vector<128x128xf32>
    %44 = tpu.matmul %41, %43, %cst_20 {dimension_numbers = #tpu.dot_dimension_numbers<[1], [0], [0], [1], [0, 0, 1, 1], [], []>} : vector<128x128xbf16>, vector<128x128xbf16>, vector<128x128xf32> -> vector<128x128xf32>
    %45 = arith.addf %38, %44 : vector<128x128xf32>
    %46 = vector.extract_strided_slice %31 {offsets = [0, 9, 0], sizes = [8, 16, 128], strides = [1, 1, 1]} : vector<8x32x128xf32> to vector<8x16x128xf32>
    %47 = vector.shape_cast %46 : vector<8x16x128xf32> to vector<128x128xf32>
    %48 = arith.truncf %47 : vector<128x128xf32> to vector<128x128xbf16>
    %c5 = arith.constant 5 : index
    %c0_21 = arith.constant 0 : index
    %c0_22 = arith.constant 0 : index
    %49 = vector.load %arg5[%c5, %c0_21, %c0_22] : memref<9x128x128xbf16, #tpu.memory_space<vmem>>, vector<1x128x128xbf16>
    %50 = vector.shape_cast %49 : vector<1x128x128xbf16> to vector<128x128xbf16>
    %cst_23 = arith.constant dense<0.000000e+00> : vector<128x128xf32>
    %51 = tpu.matmul %48, %50, %cst_23 {dimension_numbers = #tpu.dot_dimension_numbers<[1], [0], [0], [1], [0, 0, 1, 1], [], []>} : vector<128x128xbf16>, vector<128x128xbf16>, vector<128x128xf32> -> vector<128x128xf32>
    %52 = arith.addf %45, %51 : vector<128x128xf32>
    %c2_i32 = arith.constant 2 : i32
    %53 = arith.addi %3, %c2_i32 : i32
    %54 = arith.index_cast %53 : i32 to index
    %c0_24 = arith.constant 0 : index
    %c0_25 = arith.constant 0 : index
    %55 = vector.load %arg8[%54, %c0_24, %c0_25] : memref<18x32x128xf32, #tpu.memory_space<vmem>>, vector<8x32x128xf32>
    %56 = vector.extract_strided_slice %55 {offsets = [0, 7, 0], sizes = [8, 16, 128], strides = [1, 1, 1]} : vector<8x32x128xf32> to vector<8x16x128xf32>
    %57 = vector.shape_cast %56 : vector<8x16x128xf32> to vector<128x128xf32>
    %58 = arith.truncf %57 : vector<128x128xf32> to vector<128x128xbf16>
    %c6 = arith.constant 6 : index
    %c0_26 = arith.constant 0 : index
    %c0_27 = arith.constant 0 : index
    %59 = vector.load %arg5[%c6, %c0_26, %c0_27] : memref<9x128x128xbf16, #tpu.memory_space<vmem>>, vector<1x128x128xbf16>
    %60 = vector.shape_cast %59 : vector<1x128x128xbf16> to vector<128x128xbf16>
    %cst_28 = arith.constant dense<0.000000e+00> : vector<128x128xf32>
    %61 = tpu.matmul %58, %60, %cst_28 {dimension_numbers = #tpu.dot_dimension_numbers<[1], [0], [0], [1], [0, 0, 1, 1], [], []>} : vector<128x128xbf16>, vector<128x128xbf16>, vector<128x128xf32> -> vector<128x128xf32>
    %62 = arith.addf %52, %61 : vector<128x128xf32>
    %63 = vector.extract_strided_slice %55 {offsets = [0, 8, 0], sizes = [8, 16, 128], strides = [1, 1, 1]} : vector<8x32x128xf32> to vector<8x16x128xf32>
    %64 = vector.shape_cast %63 : vector<8x16x128xf32> to vector<128x128xf32>
    %65 = arith.truncf %64 : vector<128x128xf32> to vector<128x128xbf16>
    %c7 = arith.constant 7 : index
    %c0_29 = arith.constant 0 : index
    %c0_30 = arith.constant 0 : index
    %66 = vector.load %arg5[%c7, %c0_29, %c0_30] : memref<9x128x128xbf16, #tpu.memory_space<vmem>>, vector<1x128x128xbf16>
    %67 = vector.shape_cast %66 : vector<1x128x128xbf16> to vector<128x128xbf16>
    %cst_31 = arith.constant dense<0.000000e+00> : vector<128x128xf32>
    %68 = tpu.matmul %65, %67, %cst_31 {dimension_numbers = #tpu.dot_dimension_numbers<[1], [0], [0], [1], [0, 0, 1, 1], [], []>} : vector<128x128xbf16>, vector<128x128xbf16>, vector<128x128xf32> -> vector<128x128xf32>
    %69 = arith.addf %62, %68 : vector<128x128xf32>
    %70 = vector.extract_strided_slice %55 {offsets = [0, 9, 0], sizes = [8, 16, 128], strides = [1, 1, 1]} : vector<8x32x128xf32> to vector<8x16x128xf32>
    %71 = vector.shape_cast %70 : vector<8x16x128xf32> to vector<128x128xf32>
    %72 = arith.truncf %71 : vector<128x128xf32> to vector<128x128xbf16>
    %c8 = arith.constant 8 : index
    %c0_32 = arith.constant 0 : index
    %c0_33 = arith.constant 0 : index
    %73 = vector.load %arg5[%c8, %c0_32, %c0_33] : memref<9x128x128xbf16, #tpu.memory_space<vmem>>, vector<1x128x128xbf16>
    %74 = vector.shape_cast %73 : vector<1x128x128xbf16> to vector<128x128xbf16>
    %cst_34 = arith.constant dense<0.000000e+00> : vector<128x128xf32>
    %75 = tpu.matmul %72, %74, %cst_34 {dimension_numbers = #tpu.dot_dimension_numbers<[1], [0], [0], [1], [0, 0, 1, 1], [], []>} : vector<128x128xbf16>, vector<128x128xbf16>, vector<128x128xf32> -> vector<128x128xf32>
    %76 = arith.addf %69, %75 : vector<128x128xf32>
    %77 = arith.truncf %76 : vector<128x128xf32> to vector<128x128xbf16>
    %c0_35 = arith.constant 0 : index
    %c0_36 = arith.constant 0 : index
    %78 = vector.load %arg6[%c0_35, %c0_36] : memref<128x128xbf16, #tpu.memory_space<vmem>>, vector<128x128xbf16>
    tpu.vector_store %arg6[%c0_35, %c0_36], %77 {strides = array<i32>} : memref<128x128xbf16, #tpu.memory_space<vmem>>, vector<128x128xbf16>,
    %cst_37 = arith.constant dense<0.000000e+00> : vector<128xf32>
    %79 = vector.multi_reduction <add>, %76, %cst_37 [0] : vector<128x128xf32> to vector<128xf32>
    %80 = vector.shape_cast %79 : vector<128xf32> to vector<1x128xf32>
    %81 = arith.mulf %76, %76 : vector<128x128xf32>
    %cst_38 = arith.constant dense<0.000000e+00> : vector<128xf32>
    %82 = vector.multi_reduction <add>, %81, %cst_38 [0] : vector<128x128xf32> to vector<128xf32>
    %83 = vector.shape_cast %82 : vector<128xf32> to vector<1x128xf32>
    %84 = tpu.concatenate %80, %83 in 1 : vector<1x128xf32>, vector<1x128xf32> -> vector<1x256xf32>
    %85 = vector.shape_cast %84 : vector<1x256xf32> to vector<1x1x256xf32>
    %86 = vector.shape_cast %85 : vector<1x1x256xf32> to vector<1x1x256xf32>
    %87 = vector.broadcast %86 : vector<1x1x256xf32> to vector<1x8x256xf32>
    %c0_39 = arith.constant 0 : index
    %c0_40 = arith.constant 0 : index
    %c0_41 = arith.constant 0 : index
    %88 = vector.load %arg7[%c0_39, %c0_40, %c0_41] : memref<1x8x256xf32, #tpu.memory_space<vmem>>, vector<1x8x256xf32>
    tpu.vector_store %arg7[%c0_39, %c0_40, %c0_41], %87 {strides = array<i32>} : memref<1x8x256xf32, #tpu.memory_space<vmem>>, vector<1x8x256xf32>,
    return
  }
  func.func @transform_0(%arg0: i32, %arg1: i32) -> (i32, i32) {
    %c0_i32 = arith.constant 0 : i32
    %c0_i32_0 = arith.constant 0 : i32
    return %arg0, %c0_i32 : i32, i32
  }
  func.func @transform_1(%arg0: i32, %arg1: i32) -> (i32, i32) {
    %c0_i32 = arith.constant 0 : i32
    %c0_i32_0 = arith.constant 0 : i32
    %c0_i32_1 = arith.constant 0 : i32
    return %c0_i32, %c0_i32_0 : i32, i32
  }
  func.func @transform_2(%arg0: i32, %arg1: i32) -> (i32, i32) {
    %c0_i32 = arith.constant 0 : i32
    %c0_i32_0 = arith.constant 0 : i32
    %c0_i32_1 = arith.constant 0 : i32
    return %c0_i32, %c0_i32_0 : i32, i32
  }
  func.func @transform_3(%arg0: i32, %arg1: i32) -> (i32, i32, i32) {
    %c0_i32 = arith.constant 0 : i32
    %c0_i32_0 = arith.constant 0 : i32
    %c0_i32_1 = arith.constant 0 : i32
    %c0_i32_2 = arith.constant 0 : i32
    return %c0_i32, %c0_i32_0, %c0_i32_1 : i32, i32, i32
  }
  func.func @transform_4(%arg0: i32, %arg1: i32) -> (i32, i32) {
    %c2_i32 = arith.constant 2 : i32
    %0 = arith.muli %arg0, %c2_i32 : i32
    %1 = arith.addi %0, %arg1 : i32
    %c0_i32 = arith.constant 0 : i32
    %c0_i32_0 = arith.constant 0 : i32
    return %1, %c0_i32 : i32, i32
  }
  func.func @transform_5(%arg0: i32, %arg1: i32) -> (i32, i32, i32) {
    %c2_i32 = arith.constant 2 : i32
    %0 = arith.muli %arg0, %c2_i32 : i32
    %1 = arith.addi %0, %arg1 : i32
    %c0_i32 = arith.constant 0 : i32
    %c0_i32_0 = arith.constant 0 : i32
    %c0_i32_1 = arith.constant 0 : i32
    return %1, %c0_i32, %c0_i32_0 : i32, i32, i32
  }
}

module attributes {stable_mosaic.version = 11 : i64} {
  func.func @bn_relu_conv1x1_stats_kernel(%arg0: i32, %arg1: memref<256x128xbf16, #tpu.memory_space<vmem>>, %arg2: memref<1x128xf32, #tpu.memory_space<vmem>>, %arg3: memref<1x128xf32, #tpu.memory_space<vmem>>, %arg4: memref<128x128xbf16, #tpu.memory_space<vmem>>, %arg5: memref<256x128xf32, #tpu.memory_space<vmem>>, %arg6: memref<1x8x256xf32, #tpu.memory_space<vmem>>) attributes {dimension_semantics = [#tpu.dimension_semantics<parallel>], iteration_bounds = array<i64: 2>, scalar_prefetch = 0 : i64, scratch_operands = 0 : i64, tpu.core_type = #tpu.core_type<tc>, window_params = [{transform_indices = @transform_0, window_bounds = array<i64: 256, 128>}, {pipeline_mode = #tpu.pipeline_mode<synchronous>, transform_indices = @transform_1, window_bounds = array<i64: 1, 128>}, {pipeline_mode = #tpu.pipeline_mode<synchronous>, transform_indices = @transform_2, window_bounds = array<i64: 1, 128>}, {pipeline_mode = #tpu.pipeline_mode<synchronous>, transform_indices = @transform_3, window_bounds = array<i64: 128, 128>}, {transform_indices = @transform_4, window_bounds = array<i64: 256, 128>}, {transform_indices = @transform_5, window_bounds = array<i64: 1, 8, 256>}]} {
    %c0 = arith.constant 0 : index
    %c0_0 = arith.constant 0 : index
    %0 = vector.load %arg1[%c0, %c0_0] : memref<256x128xbf16, #tpu.memory_space<vmem>>, vector<256x128xbf16>
    %1 = arith.extf %0 : vector<256x128xbf16> to vector<256x128xf32>
    %c0_1 = arith.constant 0 : index
    %c0_2 = arith.constant 0 : index
    %2 = vector.load %arg2[%c0_1, %c0_2] : memref<1x128xf32, #tpu.memory_space<vmem>>, vector<1x128xf32>
    %3 = vector.broadcast %2 : vector<1x128xf32> to vector<256x128xf32>
    %4 = arith.mulf %1, %3 : vector<256x128xf32>
    %c0_3 = arith.constant 0 : index
    %c0_4 = arith.constant 0 : index
    %5 = vector.load %arg3[%c0_3, %c0_4] : memref<1x128xf32, #tpu.memory_space<vmem>>, vector<1x128xf32>
    %6 = vector.broadcast %5 : vector<1x128xf32> to vector<256x128xf32>
    %7 = arith.addf %4, %6 : vector<256x128xf32>
    %cst = arith.constant 0.000000e+00 : f32
    %8 = vector.broadcast %cst : f32 to vector<256x128xf32>
    %9 = arith.maximumf %7, %8 : vector<256x128xf32>
    %10 = arith.truncf %9 : vector<256x128xf32> to vector<256x128xbf16>
    %c0_5 = arith.constant 0 : index
    %c0_6 = arith.constant 0 : index
    %11 = vector.load %arg4[%c0_5, %c0_6] : memref<128x128xbf16, #tpu.memory_space<vmem>>, vector<128x128xbf16>
    %cst_7 = arith.constant dense<0.000000e+00> : vector<256x128xf32>
    %12 = tpu.matmul %10, %11, %cst_7 {dimension_numbers = #tpu.dot_dimension_numbers<[1], [0], [0], [1], [0, 0, 1, 1], [], []>} : vector<256x128xbf16>, vector<128x128xbf16>, vector<256x128xf32> -> vector<256x128xf32>
    %c0_8 = arith.constant 0 : index
    %c0_9 = arith.constant 0 : index
    %13 = vector.load %arg5[%c0_8, %c0_9] : memref<256x128xf32, #tpu.memory_space<vmem>>, vector<256x128xf32>
    tpu.vector_store %arg5[%c0_8, %c0_9], %12 {strides = array<i32>} : memref<256x128xf32, #tpu.memory_space<vmem>>, vector<256x128xf32>,
    %cst_10 = arith.constant dense<0.000000e+00> : vector<128xf32>
    %14 = vector.multi_reduction <add>, %12, %cst_10 [0] : vector<256x128xf32> to vector<128xf32>
    %15 = vector.shape_cast %14 : vector<128xf32> to vector<1x128xf32>
    %16 = arith.mulf %12, %12 : vector<256x128xf32>
    %cst_11 = arith.constant dense<0.000000e+00> : vector<128xf32>
    %17 = vector.multi_reduction <add>, %16, %cst_11 [0] : vector<256x128xf32> to vector<128xf32>
    %18 = vector.shape_cast %17 : vector<128xf32> to vector<1x128xf32>
    %19 = tpu.concatenate %15, %18 in 1 : vector<1x128xf32>, vector<1x128xf32> -> vector<1x256xf32>
    %20 = vector.shape_cast %19 : vector<1x256xf32> to vector<1x1x256xf32>
    %21 = vector.shape_cast %20 : vector<1x1x256xf32> to vector<1x1x256xf32>
    %22 = vector.broadcast %21 : vector<1x1x256xf32> to vector<1x8x256xf32>
    %c0_12 = arith.constant 0 : index
    %c0_13 = arith.constant 0 : index
    %c0_14 = arith.constant 0 : index
    %23 = vector.load %arg6[%c0_12, %c0_13, %c0_14] : memref<1x8x256xf32, #tpu.memory_space<vmem>>, vector<1x8x256xf32>
    tpu.vector_store %arg6[%c0_12, %c0_13, %c0_14], %22 {strides = array<i32>} : memref<1x8x256xf32, #tpu.memory_space<vmem>>, vector<1x8x256xf32>,
    return
  }
  func.func @transform_0(%arg0: i32) -> (i32, i32) {
    %c0_i32 = arith.constant 0 : i32
    %c0_i32_0 = arith.constant 0 : i32
    return %arg0, %c0_i32 : i32, i32
  }
  func.func @transform_1(%arg0: i32) -> (i32, i32) {
    %c0_i32 = arith.constant 0 : i32
    %c0_i32_0 = arith.constant 0 : i32
    %c0_i32_1 = arith.constant 0 : i32
    return %c0_i32, %c0_i32_0 : i32, i32
  }
  func.func @transform_2(%arg0: i32) -> (i32, i32) {
    %c0_i32 = arith.constant 0 : i32
    %c0_i32_0 = arith.constant 0 : i32
    %c0_i32_1 = arith.constant 0 : i32
    return %c0_i32, %c0_i32_0 : i32, i32
  }
  func.func @transform_3(%arg0: i32) -> (i32, i32) {
    %c0_i32 = arith.constant 0 : i32
    %c0_i32_0 = arith.constant 0 : i32
    %c0_i32_1 = arith.constant 0 : i32
    return %c0_i32, %c0_i32_0 : i32, i32
  }
  func.func @transform_4(%arg0: i32) -> (i32, i32) {
    %c0_i32 = arith.constant 0 : i32
    %c0_i32_0 = arith.constant 0 : i32
    return %arg0, %c0_i32 : i32, i32
  }
  func.func @transform_5(%arg0: i32) -> (i32, i32, i32) {
    %c0_i32 = arith.constant 0 : i32
    %c0_i32_0 = arith.constant 0 : i32
    %c0_i32_1 = arith.constant 0 : i32
    return %arg0, %c0_i32, %c0_i32_0 : i32, i32, i32
  }
}

module attributes {stable_mosaic.version = 11 : i64} {
  func.func @bn_add_relu_kernel(%arg0: i32, %arg1: memref<256x128xf32, #tpu.memory_space<vmem>>, %arg2: memref<256x128xf32, #tpu.memory_space<vmem>>, %arg3: memref<1x128xf32, #tpu.memory_space<vmem>>, %arg4: memref<1x128xf32, #tpu.memory_space<vmem>>, %arg5: memref<256x128xf32, #tpu.memory_space<vmem>>) attributes {dimension_semantics = [#tpu.dimension_semantics<parallel>], iteration_bounds = array<i64: 2>, scalar_prefetch = 0 : i64, scratch_operands = 0 : i64, tpu.core_type = #tpu.core_type<tc>, window_params = [{transform_indices = @transform_0, window_bounds = array<i64: 256, 128>}, {transform_indices = @transform_1, window_bounds = array<i64: 256, 128>}, {pipeline_mode = #tpu.pipeline_mode<synchronous>, transform_indices = @transform_2, window_bounds = array<i64: 1, 128>}, {pipeline_mode = #tpu.pipeline_mode<synchronous>, transform_indices = @transform_3, window_bounds = array<i64: 1, 128>}, {transform_indices = @transform_4, window_bounds = array<i64: 256, 128>}]} {
    %c0 = arith.constant 0 : index
    %c0_0 = arith.constant 0 : index
    %0 = vector.load %arg1[%c0, %c0_0] : memref<256x128xf32, #tpu.memory_space<vmem>>, vector<256x128xf32>
    %c0_1 = arith.constant 0 : index
    %c0_2 = arith.constant 0 : index
    %1 = vector.load %arg3[%c0_1, %c0_2] : memref<1x128xf32, #tpu.memory_space<vmem>>, vector<1x128xf32>
    %2 = vector.broadcast %1 : vector<1x128xf32> to vector<256x128xf32>
    %3 = arith.mulf %0, %2 : vector<256x128xf32>
    %c0_3 = arith.constant 0 : index
    %c0_4 = arith.constant 0 : index
    %4 = vector.load %arg4[%c0_3, %c0_4] : memref<1x128xf32, #tpu.memory_space<vmem>>, vector<1x128xf32>
    %5 = vector.broadcast %4 : vector<1x128xf32> to vector<256x128xf32>
    %6 = arith.addf %3, %5 : vector<256x128xf32>
    %c0_5 = arith.constant 0 : index
    %c0_6 = arith.constant 0 : index
    %7 = vector.load %arg2[%c0_5, %c0_6] : memref<256x128xf32, #tpu.memory_space<vmem>>, vector<256x128xf32>
    %8 = arith.addf %6, %7 : vector<256x128xf32>
    %cst = arith.constant 0.000000e+00 : f32
    %9 = vector.broadcast %cst : f32 to vector<256x128xf32>
    %10 = arith.maximumf %8, %9 : vector<256x128xf32>
    %c0_7 = arith.constant 0 : index
    %c0_8 = arith.constant 0 : index
    %11 = vector.load %arg5[%c0_7, %c0_8] : memref<256x128xf32, #tpu.memory_space<vmem>>, vector<256x128xf32>
    tpu.vector_store %arg5[%c0_7, %c0_8], %10 {strides = array<i32>} : memref<256x128xf32, #tpu.memory_space<vmem>>, vector<256x128xf32>,
    return
  }
  func.func @transform_0(%arg0: i32) -> (i32, i32) {
    %c0_i32 = arith.constant 0 : i32
    %c0_i32_0 = arith.constant 0 : i32
    return %arg0, %c0_i32 : i32, i32
  }
  func.func @transform_1(%arg0: i32) -> (i32, i32) {
    %c0_i32 = arith.constant 0 : i32
    %c0_i32_0 = arith.constant 0 : i32
    return %arg0, %c0_i32 : i32, i32
  }
  func.func @transform_2(%arg0: i32) -> (i32, i32) {
    %c0_i32 = arith.constant 0 : i32
    %c0_i32_0 = arith.constant 0 : i32
    %c0_i32_1 = arith.constant 0 : i32
    return %c0_i32, %c0_i32_0 : i32, i32
  }
  func.func @transform_3(%arg0: i32) -> (i32, i32) {
    %c0_i32 = arith.constant 0 : i32
    %c0_i32_0 = arith.constant 0 : i32
    %c0_i32_1 = arith.constant 0 : i32
    return %c0_i32, %c0_i32_0 : i32, i32
  }
  func.func @transform_4(%arg0: i32) -> (i32, i32) {
    %c0_i32 = arith.constant 0 : i32
    %c0_i32_0 = arith.constant 0 : i32
    return %arg0, %c0_i32 : i32, i32
  }
}

</mosaic_0001>

<bundles_post_ra>
// kernel: bottleneck_forward.4
= control target key start
LH: loop header
LB: loop body
LE: loop exit
PB: predicated region body
PF: predicated region fallthrough
CT: control target
= control target key end

     0   :  { %s1139_s12 = smov 0   ;;  %s1328_s0 = inlined_call_operand.vmem [shape: f32[512,128], index: 0, kind: input, shape index: {}]   ;;  %s1329_s1 = inlined_call_operand.vmem [shape: bf16[128,128], index: 1, kind: input, shape index: {}]   ;;  %s1330_s2 = inlined_call_operand.vmem [shape: bf16[512,128], index: 2, kind: output, shape index: {0}]   ;;  %s1331_s3 = inlined_call_operand.vmem [shape: f32[2,8,256], index: 3, kind: output, shape index: {1}]  }
   0x1 LB: > { %s1145_s13 = sadd.s32 4294967295, %s1117_s12   ;;  %p830_p0 = scmp.ge.s32.totalorder %s1117_s12, 1  ;;  %s1117_s12 = sphi %s1139_s12, %s14_s12  }
   0x2   : > { %p141_p1 = scmp.lt.s32.totalorder %s1117_s12, 3 }
   0x4   : > { %p142_p2 = pnand %p830_p0, %p141_p1 }
   0x5   : > { %v1103_v0 = vld [vmem:[%s1329_s1] sm:$0xff] (!%p142_p2)   ;;  %s831_s16 = sshll.u32 (!%p142_p2), %s1145_s13, 5  ;;  %v1104_v1 = vld [vmem:[%s1329_s1 + $0x8] sm:$0xff] (!%p142_p2)   ;;  %v1105_v2 = vld [vmem:[%s1329_s1 + $0x10] sm:$0xff] (!%p142_p2)   ;;  %p182_p4 = scmp.lt.s32.totalorder (!%p142_p2), %s1145_s13, 1 }
   0x6   : > { %145 = sbr.rel (%p142_p2) target bundleno = 332 (0x14c), region = 28  ;;  %p171_p3 = scmp.lt.s32.totalorder (!%p142_p2), %s831_s16, 63  ;;  %1031 = vmatprep.subr.bf16.mxu0 (!%p142_p2), %v1103_v0  ;;  %1079 = vmatprep.subr.bf16.mxu1 (!%p142_p2), %v1103_v0  ;;  %v1106_v3 = vld [vmem:[%s1329_s1 + $0x18] sm:$0xff] (!%p142_p2)   ;;  %v1107_v7 = vld [vmem:[%s1329_s1 + $0x20] sm:$0xff] (!%p142_p2)   ;;  %v1108_v11 = vld [vmem:[%s1329_s1 + $0x28] sm:$0xff] (!%p142_p2)  }
   0x7   : > { %1032 = vmatpush3.bf16.msra.mxu0 (!%p142_p2), %v1103_v0  ;;  %1087 = vmatpush3.bf16.msra.mxu1 (!%p142_p2), %v1103_v0  ;;  %v1109_v12 = vld [vmem:[%s1329_s1 + $0x30] sm:$0xff] (!%p142_p2)   ;;  %v1110_v13 = vld [vmem:[%s1329_s1 + $0x38] sm:$0xff] (!%p142_p2)  }
   0x8   : > { %1033 = vmatprep.subr.bf16.mxu0 (!%p142_p2), %v1104_v1  ;;  %1080 = vmatprep.subr.bf16.mxu1 (!%p142_p2), %v1104_v1 }
   0xb   : > { %1034 = vmatpush3.bf16.msra.mxu0 (!%p142_p2), %v1104_v1  ;;  %1088 = vmatpush3.bf16.msra.mxu1 (!%p142_p2), %v1104_v1 }
   0xc   : > { %1035 = vmatprep.subr.bf16.mxu0 (!%p142_p2), %v1105_v2  ;;  %1081 = vmatprep.subr.bf16.mxu1 (!%p142_p2), %v1105_v2 }
   0xd   : > { %s1333_s16 = smov (!%p171_p3, %s831_s16), 63  ;;  %s1335_s13 = smov (!%p182_p4, %s1145_s13), 1 }
   0xe   : > { %s832_s21 = sshll.u32 %s1333_s16, 3  ;;  %s834_s8 = sshll.u32 %s1333_s16, 2 }
   0xf   : > { %s1165_s24 = scalar_lea.vmem %s1328_s0, %s832_s21  ;;  %1036 = vmatpush3.bf16.msra.mxu0 %v1105_v2  ;;  %1089 = vmatpush3.bf16.msra.mxu1 %v1105_v2  ;;  %s1220_s11 = scalar_lea.vmem %s1330_s2, %s834_s8 }
  0x10   : > { %v188_v4 = vld [vmem:[%s1165_s24] sm:$0xff]  ;;  %v189_v5 = vld [vmem:[%s1165_s24 + $0x8] sm:$0xff]  ;;  %1037 = vmatprep.subr.bf16.mxu0 %v1106_v3  ;;  %1082 = vmatprep.subr.bf16.mxu1 %v1106_v3  ;;  %v190_v14 = vld [vmem:[%s1165_s24 + $0x10] sm:$0xff]  ;;  %s879_s14 = sshll.u32 %s1335_s13, 4 }
  0x11   : > { %v220_v6 = vpack.c.bf16 %v189_v5, %v188_v4  ;;  %v204_v8 = vld [vmem:[%s1165_s24 + $0x80] sm:$0xff]  ;;  %v205_v9 = vld [vmem:[%s1165_s24 + $0x88] sm:$0xff]  ;;  %v191_v15 = vld [vmem:[%s1165_s24 + $0x18] sm:$0xff]  ;;  %s186_s17 = scalar_lea.vmem %s1331_s3, %s879_s14 }
  0x12   : > { %v228_v10 = vpack.c.bf16 %v205_v9, %v204_v8  ;;  %v192_v16 = vld [vmem:[%s1165_s24 + $0x20] sm:$0xff]  ;;  %v193_v17 = vld [vmem:[%s1165_s24 + $0x28] sm:$0xff]  ;;  %v206_v18 = vld [vmem:[%s1165_s24 + $0x90] sm:$0xff]  ;;  %v221_v22 = vpack.c.bf16 %v191_v15, %v190_v14 }
  0x13   : > { %1047 = vmatprep.mubr.bf16.mxu0 %v220_v6  ;;  %1038 = vmatpush3.bf16.msra.mxu0 %v1106_v3  ;;  %v207_v19 = vld [vmem:[%s1165_s24 + $0x98] sm:$0xff]  ;;  %v208_v20 = vld [vmem:[%s1165_s24 + $0xa0] sm:$0xff]  ;;  %v209_v21 = vld [vmem:[%s1165_s24 + $0xa8] sm:$0xff]  ;;  %v222_v23 = vpack.c.bf16 %v193_v17, %v192_v16 }
  0x14   : > { %1039 = vmatprep.subr.bf16.mxu0 %v1107_v7  ;;  %1090 = vmatpush3.bf16.msra.mxu1 %v1106_v3  ;;  %v229_v24 = vpack.c.bf16 %v207_v19, %v206_v18  ;;  %v230_v25 = vpack.c.bf16 %v209_v21, %v208_v20  ;;  %v194_v26 = vld [vmem:[%s1165_s24 + $0x30] sm:$0xff]  ;;  %v195_v27 = vld [vmem:[%s1165_s24 + $0x38] sm:$0xff]  ;;  %v196_v28 = vld [vmem:[%s1165_s24 + $0x40] sm:$0xff] }
  0x15   : > { %1083 = vmatprep.subr.bf16.mxu1 %v1107_v7  ;;  %1063 = vmatprep.mubr.bf16.mxu1 %v228_v10  ;;  %v197_v29 = vld [vmem:[%s1165_s24 + $0x48] sm:$0xff]  ;;  %v210_v30 = vld [vmem:[%s1165_s24 + $0xb0] sm:$0xff]  ;;  %v211_v31 = vld [vmem:[%s1165_s24 + $0xb8] sm:$0xff]  ;;  %v223_v34 = vpack.c.bf16 %v195_v27, %v194_v26 }
  0x16   : > { %v212_v32 = vld [vmem:[%s1165_s24 + $0xc0] sm:$0xff]  ;;  %v213_v33 = vld [vmem:[%s1165_s24 + $0xc8] sm:$0xff]  ;;  %v224_v35 = vpack.c.bf16 %v197_v29, %v196_v28  ;;  %v231_v36 = vpack.c.bf16 %v211_v31, %v210_v30  ;;  %v198_v38 = vld [vmem:[%s1165_s24 + $0x50] sm:$0xff] }
  0x17   : > { %1040 = vmatpush3.bf16.msra.mxu0 %v1107_v7  ;;  %v232_v37 = vpack.c.bf16 %v213_v33, %v212_v32  ;;  %v199_v39 = vld [vmem:[%s1165_s24 + $0x58] sm:$0xff]  ;;  %v200_v40 = vld [vmem:[%s1165_s24 + $0x60] sm:$0xff]  ;;  %v201_v41 = vld [vmem:[%s1165_s24 + $0x68] sm:$0xff] }
  0x18   : > { %1041 = vmatprep.subr.bf16.mxu0 %v1108_v11  ;;  %1091 = vmatpush3.bf16.msra.mxu1 %v1107_v7  ;;  %v214_v42 = vld [vmem:[%s1165_s24 + $0xd0] sm:$0xff]  ;;  %v215_v43 = vld [vmem:[%s1165_s24 + $0xd8] sm:$0xff]  ;;  %v216_v44 = vld [vmem:[%s1165_s24 + $0xe0] sm:$0xff]  ;;  %v225_v46 = vpack.c.bf16 %v199_v39, %v198_v38  ;;  %v226_v47 = vpack.c.bf16 %v201_v41, %v200_v40 }
  0x19   : > { %1084 = vmatprep.subr.bf16.mxu1 %v1108_v11  ;;  %v217_v45 = vld [vmem:[%s1165_s24 + $0xe8] sm:$0xff]  ;;  %v233_v48 = vpack.c.bf16 %v215_v43, %v214_v42  ;;  %v202_v50 = vld [vmem:[%s1165_s24 + $0x70] sm:$0xff]  ;;  %v203_v51 = vld [vmem:[%s1165_s24 + $0x78] sm:$0xff] }
  0x1a   : > { %v234_v49 = vpack.c.bf16 %v217_v45, %v216_v44  ;;  %v218_v52 = vld [vmem:[%s1165_s24 + $0xf0] sm:$0xff]  ;;  %v219_v53 = vld [vmem:[%s1165_s24 + $0xf8] sm:$0xff]  ;;  %v227_v54 = vpack.c.bf16 %v203_v51, %v202_v50 }
  0x1b   : > { %1042 = vmatpush3.bf16.msra.mxu0 %v1108_v11  ;;  %v235_v55 = vpack.c.bf16 %v219_v53, %v218_v52 }
  0x1c   : > { %1043 = vmatprep.subr.bf16.mxu0 %v1109_v12  ;;  %1092 = vmatpush3.bf16.msra.mxu1 %v1108_v11 }
  0x1d   : > { %1085 = vmatprep.subr.bf16.mxu1 %v1109_v12 }
  0x1f   : > { %1044 = vmatpush3.bf16.msra.mxu0 %v1109_v12 }
  0x20   : > { %1045 = vmatprep.subr.bf16.mxu0 %v1110_v13  ;;  %1093 = vmatpush3.bf16.msra.mxu1 %v1109_v12 }
  0x21   : > { %1086 = vmatprep.subr.bf16.mxu1 %v1110_v13 }
  0x23   : > { %1046 = vmatpush3.bf16.msra.mxu0 %v1110_v13 }
  0x24   : > { %1094 = vmatpush3.bf16.msra.mxu1 %v1110_v13 }
  0x26   : > { %1048 = vmatmul.mubr.bf16.vlgmr.msra.gmra.mrb[0].mxu0 %v221_v22 }
  0x27   : > { %1051 = vmatprep.mubr.bf16.mxu0 %v222_v23  ;;  %1064 = vmatmul.mubr.bf16.vlgmr.msra.gmra.mrb[0].mxu1 %v229_v24 }
  0x28   : > { %1067 = vmatprep.mubr.bf16.mxu1 %v230_v25 }
  0x2e   : > { %1052 = vmatmul.mubr.bf16.gmra.mrb[4].mxu0 %v223_v34 }
  0x2f   : > { %1055 = vmatprep.mubr.bf16.mxu0 %v224_v35  ;;  %1068 = vmatmul.mubr.bf16.gmra.mrb[4].mxu1 %v231_v36 }
  0x30   : > { %1071 = vmatprep.mubr.bf16.mxu1 %v232_v37 }
  0x36   : > { %1056 = vmatmul.mubr.bf16.gmra.mrb[8].mxu0 %v225_v46 }
  0x37   : > { %1059 = vmatprep.mubr.bf16.mxu0 %v226_v47  ;;  %1072 = vmatmul.mubr.bf16.gmra.mrb[8].mxu1 %v233_v48 }
  0x38   : > { %1075 = vmatprep.mubr.bf16.mxu1 %v234_v49 }
  0x3e   : > { %1060 = vmatmul.mubr.bf16.gmra.mrb[12].mxu0 %v227_v54 }
  0x3f   : > { %1076 = vmatmul.mubr.bf16.gmra.mrb[12].mxu1 %v235_v55 }
  0xf9   : > { %v1049_v56 = vpop.f32.mrb[0].mxu0 }
  0xfa   : > { %v334_v57 = vpop.f32.mrb[1].mxu0  ;;  %v1215_v58 = vpop.f32.mrb[0].mxu1  ;;  %v660_v7 = vmul.f32 %v1049_v56, %v1049_v56 }
  0xfb   : > { %v1050_v59 = vpop.f32.mrb[2].mxu0  ;;  %v1222_v60 = vpop.f32.mrb[1].mxu1  ;;  %v658_v61 = vmul.f32 %v334_v57, %v334_v57 }
  0xfc   : > { %v920_v62 = vpack.c.bf16 %v1050_v59, %v1049_v56  ;;  %v337_v63 = vpop.f32.mrb[3].mxu0  ;;  %v1224_v0 = vpop.f32.mrb[2].mxu1  ;;  %v661_v10 = vmul.f32 %v1050_v59, %v1050_v59 }
  0xfd   : > { %v915_v1 = vpack.c.bf16 %v337_v63, %v334_v57  ;;  %v621_v2 = vadd.f32 %v337_v63, %v334_v57  ;;  %v659_v3 = vmul.f32 %v337_v63, %v337_v63  ;;  %v960_v4 = vpack.c.bf16 %v1224_v0, %v1215_v58  ;;  %v1228_v5 = vpop.f32.mrb[3].mxu1 }
  0xfe   : > { %992 = vst [vmem:[%s1220_s11 + $0x8] sm:$0xff] %v920_v62   ;;  %v955_v6 = vpack.c.bf16 %v1228_v5, %v1222_v60 }
  0xff   : > { %916 = vst [vmem:[%s1220_s11] sm:$0xff] %v915_v1   ;;  %v622_v8 = vadd.f32 %v1049_v56, %v621_v2  ;;  %v690_v9 = vadd.f32 %v659_v3, %v658_v61  ;;  %1000 = vst [vmem:[%s1220_s11 + $0x48] sm:$0xff] %v960_v4  }
 0x100   : > { %999 = vst [vmem:[%s1220_s11 + $0x40] sm:$0xff] %v955_v6  }
 0x101   : > { %v691_v11 = vadd.f32 %v690_v9, %v660_v7  ;;  %v1053_v12 = vpop.f32.mrb[4].mxu0  ;;  %v623_v13 = vadd.f32 %v1050_v59, %v622_v8 }
 0x102   : > { %v350_v14 = vpop.f32.mrb[5].mxu0  ;;  %v1236_v15 = vpop.f32.mrb[4].mxu1  ;;  %v664_v31 = vmul.f32 %v1053_v12, %v1053_v12 }
 0x103   : > { %v624_v16 = vadd.f32 %v623_v13, %v350_v14  ;;  %v662_v17 = vmul.f32 %v350_v14, %v350_v14  ;;  %v692_v18 = vadd.f32 %v691_v11, %v661_v10  ;;  %v1054_v19 = vpop.f32.mrb[6].mxu0  ;;  %v1238_v20 = vpop.f32.mrb[5].mxu1 }
 0x104   : > { %v930_v21 = vpack.c.bf16 %v1054_v19, %v1053_v12  ;;  %v353_v22 = vpop.f32.mrb[7].mxu0  ;;  %v1240_v23 = vpop.f32.mrb[6].mxu1  ;;  %v665_v34 = vmul.f32 %v1054_v19, %v1054_v19 }
 0x105   : > { %v693_v24 = vadd.f32 %v692_v18, %v662_v17  ;;  %v925_v25 = vpack.c.bf16 %v353_v22, %v350_v14  ;;  %v625_v26 = vadd.f32 %v624_v16, %v353_v22  ;;  %v663_v27 = vmul.f32 %v353_v22, %v353_v22  ;;  %v1242_v28 = vpop.f32.mrb[7].mxu1 }
 0x106   : > { %994 = vst [vmem:[%s1220_s11 + $0x18] sm:$0xff] %v930_v21   ;;  %v970_v29 = vpack.c.bf16 %v1240_v23, %v1236_v15  ;;  %v965_v30 = vpack.c.bf16 %v1242_v28, %v1238_v20 }
 0x107   : > { %993 = vst [vmem:[%s1220_s11 + $0x10] sm:$0xff] %v925_v25   ;;  %v626_v32 = vadd.f32 %v1053_v12, %v625_v26  ;;  %v694_v33 = vadd.f32 %v693_v24, %v663_v27 }
 0x108   : > { %1002 = vst [vmem:[%s1220_s11 + $0x58] sm:$0xff] %v970_v29   ;;  %1001 = vst [vmem:[%s1220_s11 + $0x50] sm:$0xff] %v965_v30   ;;  %v674_v29 = vmul.f32 %v1222_v60, %v1222_v60 }
 0x109   : > { %v695_v35 = vadd.f32 %v694_v33, %v664_v31  ;;  %v1057_v36 = vpop.f32.mrb[8].mxu0  ;;  %v627_v37 = vadd.f32 %v1054_v19, %v626_v32 }
 0x10a   : > { %v366_v38 = vpop.f32.mrb[9].mxu0  ;;  %v1252_v39 = vpop.f32.mrb[8].mxu1  ;;  %v668_v55 = vmul.f32 %v1057_v36, %v1057_v36 }
 0x10b   : > { %v628_v40 = vadd.f32 %v627_v37, %v366_v38  ;;  %v666_v41 = vmul.f32 %v366_v38, %v366_v38  ;;  %v696_v42 = vadd.f32 %v695_v35, %v665_v34  ;;  %v1058_v43 = vpop.f32.mrb[10].mxu0  ;;  %v1254_v44 = vpop.f32.mrb[9].mxu1  ;;  %v675_v34 = vmul.f32 %v1228_v5, %v1228_v5 }
 0x10c   : > { %v940_v45 = vpack.c.bf16 %v1058_v43, %v1057_v36  ;;  %v369_v46 = vpop.f32.mrb[11].mxu0  ;;  %v1256_v47 = vpop.f32.mrb[10].mxu1  ;;  %v669_v59 = vmul.f32 %v1058_v43, %v1058_v43  ;;  %v676_v35 = vmul.f32 %v1215_v58, %v1215_v58 }
 0x10d   : > { %v697_v48 = vadd.f32 %v696_v42, %v666_v41  ;;  %v935_v49 = vpack.c.bf16 %v369_v46, %v366_v38  ;;  %v629_v50 = vadd.f32 %v628_v40, %v369_v46  ;;  %v667_v51 = vmul.f32 %v369_v46, %v369_v46  ;;  %v1258_v52 = vpop.f32.mrb[11].mxu1 }
 0x10e   : > { %996 = vst [vmem:[%s1220_s11 + $0x28] sm:$0xff] %v940_v45   ;;  %v980_v53 = vpack.c.bf16 %v1256_v47, %v1252_v39  ;;  %v975_v54 = vpack.c.bf16 %v1258_v52, %v1254_v44  ;;  %v677_v38 = vmul.f32 %v1224_v0, %v1224_v0  ;;  %v679_v46 = vmul.f32 %v1242_v28, %v1242_v28 }
 0x10f   : > { %995 = vst [vmem:[%s1220_s11 + $0x20] sm:$0xff] %v935_v49   ;;  %v630_v56 = vadd.f32 %v1057_v36, %v629_v50  ;;  %v698_v57 = vadd.f32 %v697_v48, %v667_v51 }
 0x110   : > { %1004 = vst [vmem:[%s1220_s11 + $0x68] sm:$0xff] %v980_v53   ;;  %1003 = vst [vmem:[%s1220_s11 + $0x60] sm:$0xff] %v975_v54  }
 0x111   : > { %v699_v61 = vadd.f32 %v698_v57, %v668_v55  ;;  %v1061_v62 = vpop.f32.mrb[12].mxu0  ;;  %v631_v63 = vadd.f32 %v1058_v43, %v630_v56  ;;  %v683_v56 = vmul.f32 %v1258_v52, %v1258_v52 }
 0x112   : > { %v382_v1 = vpop.f32.mrb[13].mxu0  ;;  %v1268_v2 = vpop.f32.mrb[12].mxu1  ;;  %v672_v21 = vmul.f32 %v1061_v62, %v1061_v62 }
 0x113   : > { %v632_v3 = vadd.f32 %v631_v63, %v382_v1  ;;  %v670_v4 = vmul.f32 %v382_v1, %v382_v1  ;;  %v700_v6 = vadd.f32 %v699_v61, %v669_v59  ;;  %v1062_v7 = vpop.f32.mrb[14].mxu0  ;;  %v446_v8 = vpop.f32.mrb[13].mxu1 }
 0x114   : > { %v950_v9 = vpack.c.bf16 %v1062_v7, %v1061_v62  ;;  %v385_v10 = vpop.f32.mrb[15].mxu0  ;;  %v1270_v11 = vpop.f32.mrb[14].mxu1  ;;  %v673_v25 = vmul.f32 %v1062_v7, %v1062_v7 }
 0x115   : > { %v701_v12 = vadd.f32 %v700_v6, %v670_v4  ;;  %v945_v13 = vpack.c.bf16 %v385_v10, %v382_v1  ;;  %v633_v14 = vadd.f32 %v632_v3, %v385_v10  ;;  %v671_v16 = vmul.f32 %v385_v10, %v385_v10  ;;  %v449_v17 = vpop.f32.mrb[15].mxu1 }
 0x116   : > { %998 = vst [vmem:[%s1220_s11 + $0x38] sm:$0xff] %v950_v9   ;;  %v990_v18 = vpack.c.bf16 %v1270_v11, %v1268_v2  ;;  %v985_v19 = vpack.c.bf16 %v449_v17, %v446_v8  ;;  %v688_v6 = vmul.f32 %v1268_v2, %v1268_v2  ;;  %v689_v9 = vmul.f32 %v1270_v11, %v1270_v11 }
 0x117   : > { %997 = vst [vmem:[%s1220_s11 + $0x30] sm:$0xff] %v945_v13   ;;  %v634_v22 = vadd.f32 %v1061_v62, %v633_v14  ;;  %v702_v24 = vadd.f32 %v701_v12, %v671_v16  ;;  %v686_v62 = vmul.f32 %v446_v8, %v446_v8  ;;  %v727_v13 = vlaneseq }
 0x118   : > { %1006 = vst [vmem:[%s1220_s11 + $0x78] sm:$0xff] %v990_v18   ;;  %1005 = vst [vmem:[%s1220_s11 + $0x70] sm:$0xff] %v985_v19  }
 0x119   : > { %v703_v26 = vadd.f32 %v702_v24, %v672_v21  ;;  %v635_v27 = vadd.f32 %v1062_v7, %v634_v22  ;;  %v728_v19 = vshrl.u32 %v727_v13, 7 }
 0x11b   : > { %v636_v30 = vadd.f32 %v635_v27, %v1222_v60  ;;  %v704_v31 = vadd.f32 %v703_v26, %v673_v25  ;;  %v678_v60 = vmul.f32 %v1238_v20, %v1238_v20  ;;  %v729_v25 = vsub.s32 0, %v728_v19 }
 0x11d   : > { %v705_v32 = vadd.f32 %v704_v31, %v674_v29  ;;  %v637_v33 = vadd.f32 %v636_v30, %v1228_v5 }
 0x11f   : > { %v638_v36 = vadd.f32 %v1215_v58, %v637_v33  ;;  %v706_v37 = vadd.f32 %v705_v32, %v675_v34  ;;  %v680_v58 = vmul.f32 %v1236_v15, %v1236_v15 }
 0x121   : > { %v707_v40 = vadd.f32 %v706_v37, %v676_v35  ;;  %v639_v41 = vadd.f32 %v1224_v0, %v638_v36  ;;  %v681_v0 = vmul.f32 %v1240_v23, %v1240_v23 }
 0x123   : > { %v640_v42 = vadd.f32 %v639_v41, %v1238_v20  ;;  %v708_v43 = vadd.f32 %v707_v40, %v677_v38  ;;  %v682_v20 = vmul.f32 %v1254_v44, %v1254_v44 }
 0x125   : > { %v709_v45 = vadd.f32 %v708_v43, %v678_v60  ;;  %v641_v5 = vadd.f32 %v640_v42, %v1242_v28 }
 0x127   : > { %v642_v48 = vadd.f32 %v1236_v15, %v641_v5  ;;  %v710_v49 = vadd.f32 %v709_v45, %v679_v46  ;;  %v684_v15 = vmul.f32 %v1252_v39, %v1252_v39 }
 0x129   : > { %v711_v50 = vadd.f32 %v710_v49, %v680_v58  ;;  %v643_v51 = vadd.f32 %v1240_v23, %v642_v48  ;;  %v685_v23 = vmul.f32 %v1256_v47, %v1256_v47 }
 0x12b   : > { %v644_v53 = vadd.f32 %v643_v51, %v1254_v44  ;;  %v712_v54 = vadd.f32 %v711_v50, %v681_v0 }
 0x12d   : > { %v713_v55 = vadd.f32 %v712_v54, %v682_v20  ;;  %v645_v28 = vadd.f32 %v644_v53, %v1258_v52  ;;  %v687_v52 = vmul.f32 %v449_v17, %v449_v17 }
 0x12f   : > { %v646_v57 = vadd.f32 %v1252_v39, %v645_v28  ;;  %v714_v59 = vadd.f32 %v713_v55, %v683_v56 }
 0x131   : > { %v715_v61 = vadd.f32 %v714_v59, %v684_v15  ;;  %v647_v44 = vadd.f32 %v1256_v47, %v646_v57 }
 0x133   : > { %v648_v63 = vadd.f32 %v647_v44, %v446_v8  ;;  %v716_v1 = vadd.f32 %v715_v61, %v685_v23 }
 0x135   : > { %v717_v3 = vadd.f32 %v716_v1, %v686_v62  ;;  %v649_v4 = vadd.f32 %v648_v63, %v449_v17 }
 0x137   : > { %v650_v39 = vadd.f32 %v1268_v2, %v649_v4  ;;  %v718_v7 = vadd.f32 %v717_v3, %v687_v52 }
 0x139   : > { %v651_v10 = vadd.f32 %v1270_v11, %v650_v39  ;;  %v719_v12 = vadd.f32 %v718_v7, %v688_v6 }
 0x13b   : > { %v652_v47 = vrot.slane %v651_v10, 4  ;;  %v720_v8 = vadd.f32 %v719_v12, %v689_v9 }
 0x13d   : > { %v653_v14 = vadd.f32 %v652_v47, %v651_v10  ;;  %v721_v16 = vrot.slane %v720_v8, 4 }
 0x13f   : > { %v654_v17 = vrot.slane %v653_v14, 2  ;;  %v722_v18 = vadd.f32 %v721_v16, %v720_v8 }
 0x141   : > { %v655_v21 = vadd.f32 %v654_v17, %v653_v14  ;;  %v723_v22 = vrot.slane %v722_v18, 2 }
 0x143   : > { %v656_v2 = vrot.slane %v655_v21, 1  ;;  %v724_v24 = vadd.f32 %v723_v22, %v722_v18 }
 0x145   : > { %v657_v26 = vadd.f32 %v656_v2, %v655_v21  ;;  %v725_v27 = vrot.slane %v724_v24, 1 }
 0x147   : > { %v726_v11 = vadd.f32 %v725_v27, %v724_v24  ;;  %v730_v29 = vrot.slane %v657_v26, %v729_v25 }
 0x149   : > { %v734_v30 = vrot.slane %v726_v11, %v729_v25  ;;  %735 = vst [vmem:[%s186_s17] sm:$0xff] %v730_v29 }
 0x14b   : > { %736 = vst [vmem:[%s186_s17 + $0x8] sm:$0xff] %v734_v30 }
 0x14c PF: > { %s14_s12 = sadd.s32 1, %s1117_s12  }
 0x14d   : > { %p11_p5 = scmp.ge.s32.totalorder %s14_s12, 4  }
 0x14f   :  { %13 = sbr.rel (!%p11_p5) target bundleno = 1 (0x1), region = 70 }

// kernel: bottleneck_forward.6
= control target key start
LH: loop header
LB: loop body
LE: loop exit
PB: predicated region body
PF: predicated region fallthrough
CT: control target
= control target key end

     0   :  { %s1139_s18 = smov 0   ;;  %s1414_s0 = inlined_call_operand.vmem [shape: bf16[512,128], index: 0, kind: input, shape index: {}]   ;;  %s1415_s1 = inlined_call_operand.vmem [shape: f32[1,128], index: 1, kind: input, shape index: {}]   ;;  %s1416_s2 = inlined_call_operand.vmem [shape: f32[1,128], index: 2, kind: input, shape index: {}]   ;;  %s1417_s3 = inlined_call_operand.vmem [shape: bf16[128,128], index: 3, kind: input, shape index: {}]   ;;  %s1418_s4 = inlined_call_operand.vmem [shape: f32[512,128], index: 4, kind: output, shape index: {0}]   ;;  %s1419_s5 = inlined_call_operand.vmem [shape: f32[2,8,256], index: 5, kind: output, shape index: {1}]  }
   0x1 LB: > { %s1145_s19 = sadd.s32 4294967295, %s1107_s18   ;;  %p898_p0 = scmp.ge.s32.totalorder %s1107_s18, 1  ;;  %s1107_s18 = sphi %s1139_s18, %s16_s18  }
   0x2   : > { %p191_p1 = scmp.lt.s32.totalorder %s1107_s18, 3 }
   0x4   : > { %p192_p2 = pnand %p898_p0, %p191_p1 }
   0x5   : > { %v1093_v0 = vld [vmem:[%s1417_s3] sm:$0xff] (!%p192_p2)   ;;  %s899_s22 = sshll.u32 (!%p192_p2), %s1145_s19, 5  ;;  %v1094_v1 = vld [vmem:[%s1417_s3 + $0x8] sm:$0xff] (!%p192_p2)   ;;  %v1095_v2 = vld [vmem:[%s1417_s3 + $0x10] sm:$0xff] (!%p192_p2)   ;;  %p236_p4 = scmp.lt.s32.totalorder (!%p192_p2), %s1145_s19, 1 }
   0x6   : > { %195 = sbr.rel (%p192_p2) target bundleno = 332 (0x14c), region = 36  ;;  %p225_p3 = scmp.lt.s32.totalorder (!%p192_p2), %s899_s22, 63  ;;  %1021 = vmatprep.subr.bf16.mxu0 (!%p192_p2), %v1093_v0  ;;  %1069 = vmatprep.subr.bf16.mxu1 (!%p192_p2), %v1093_v0  ;;  %v1096_v3 = vld [vmem:[%s1417_s3 + $0x18] sm:$0xff] (!%p192_p2)   ;;  %v1174_v5 = vld [vmem:[%s1415_s1] ss:$0 sm:$0xff] (!%p192_p2)  ;;  %v1098_v34 = vld [vmem:[%s1417_s3 + $0x28] sm:$0xff] (!%p192_p2)  }
   0x7   : > { %1022 = vmatpush3.bf16.msra.mxu0 (!%p192_p2), %v1093_v0  ;;  %1077 = vmatpush3.bf16.msra.mxu1 (!%p192_p2), %v1093_v0  ;;  %v1182_v11 = vld [vmem:[%s1416_s2] ss:$0 sm:$0xff] (!%p192_p2)  ;;  %v1099_v49 = vld [vmem:[%s1417_s3 + $0x30] sm:$0xff] (!%p192_p2)   ;;  %v1100_v63 = vld [vmem:[%s1417_s3 + $0x38] sm:$0xff] (!%p192_p2)  }
   0x8   : > { %1023 = vmatprep.subr.bf16.mxu0 (!%p192_p2), %v1094_v1  ;;  %1070 = vmatprep.subr.bf16.mxu1 (!%p192_p2), %v1094_v1  ;;  %v1097_v20 = vld [vmem:[%s1417_s3 + $0x20] sm:$0xff] (!%p192_p2)  }
   0xb   : > { %1024 = vmatpush3.bf16.msra.mxu0 (!%p192_p2), %v1094_v1  ;;  %1078 = vmatpush3.bf16.msra.mxu1 (!%p192_p2), %v1094_v1 }
   0xc   : > { %1025 = vmatprep.subr.bf16.mxu0 (!%p192_p2), %v1095_v2  ;;  %1071 = vmatprep.subr.bf16.mxu1 (!%p192_p2), %v1095_v2 }
   0xd   : > { %s1421_s22 = smov (!%p225_p3, %s899_s22), 63  ;;  %s1423_s19 = smov (!%p236_p4, %s1145_s19), 1 }
   0xe   : > { %s900_s27 = sshll.u32 %s1421_s22, 2  ;;  %s902_s23 = sshll.u32 %s1421_s22, 3 }
   0xf   : > { %s1165_s30 = scalar_lea.vmem %s1414_s0, %s900_s27  ;;  %1026 = vmatpush3.bf16.msra.mxu0 %v1095_v2  ;;  %1079 = vmatpush3.bf16.msra.mxu1 %v1095_v2  ;;  %s1306_s26 = scalar_lea.vmem %s1418_s4, %s902_s23 }
  0x10   : > { %v919_v4 = vld [vmem:[%s1165_s30] sm:$0xff]   ;;  %v982_v8 = vld [vmem:[%s1165_s30 + $0x8] sm:$0xff]   ;;  %v983_v9 = vld [vmem:[%s1165_s30 + $0x10] sm:$0xff]   ;;  %1027 = vmatprep.subr.bf16.mxu0 %v1096_v3  ;;  %1072 = vmatprep.subr.bf16.mxu1 %v1096_v3  ;;  %s917_s22 = sshll.u32 %s1423_s19, 4 }
  0x11   : > { %v920_v6 = vunpack.c.l.bf16 %v919_v4  ;;  %v921_v7 = vunpack.c.h.bf16 %v919_v4  ;;  %v984_v10 = vld [vmem:[%s1165_s30 + $0x18] sm:$0xff]   ;;  %v924_v12 = vunpack.c.l.bf16 %v982_v8  ;;  %v925_v13 = vunpack.c.h.bf16 %v982_v8  ;;  %v985_v29 = vld [vmem:[%s1165_s30 + $0x20] sm:$0xff]   ;;  %v986_v33 = vld [vmem:[%s1165_s30 + $0x28] sm:$0xff]   ;;  %s240_s29 = scalar_lea.vmem %s1419_s5, %s917_s22 }
  0x12   : > { %v928_v14 = vunpack.c.l.bf16 %v983_v9  ;;  %v929_v15 = vunpack.c.h.bf16 %v983_v9  ;;  %v932_v18 = vunpack.c.l.bf16 %v984_v10  ;;  %v933_v19 = vunpack.c.h.bf16 %v984_v10  ;;  %v987_v42 = vld [vmem:[%s1165_s30 + $0x30] sm:$0xff]   ;;  %v1211_v48 = vld [vmem:[%s1165_s30 + $0x38] sm:$0xff]   ;;  %v989_v60 = vld [vmem:[%s1165_s30 + $0x40] sm:$0xff]  }
  0x13   : > { %v313_v16 = vmul.f32 %v920_v6, %v1174_v5  ;;  %v314_v17 = vmul.f32 %v921_v7, %v1174_v5  ;;  %v315_v21 = vmul.f32 %v924_v12, %v1174_v5  ;;  %v316_v22 = vmul.f32 %v925_v13, %v1174_v5  ;;  %1028 = vmatpush3.bf16.msra.mxu0 %v1096_v3  ;;  %v991_v9 = vld [vmem:[%s1165_s30 + $0x50] sm:$0xff]  }
  0x14   : > { %v317_v23 = vmul.f32 %v928_v14, %v1174_v5  ;;  %v318_v24 = vmul.f32 %v929_v15, %v1174_v5  ;;  %v319_v27 = vmul.f32 %v932_v18, %v1174_v5  ;;  %v320_v28 = vmul.f32 %v933_v19, %v1174_v5  ;;  %1080 = vmatpush3.bf16.msra.mxu1 %v1096_v3  ;;  %v990_v3 = vld [vmem:[%s1165_s30 + $0x48] sm:$0xff]   ;;  %v992_v19 = vld [vmem:[%s1165_s30 + $0x58] sm:$0xff]  }
  0x15   : > { %v352_v25 = vadd.f32 %v1182_v11, %v313_v16  ;;  %v353_v26 = vadd.f32 %v1182_v11, %v314_v17  ;;  %v354_v32 = vadd.f32 %v1182_v11, %v315_v21  ;;  %1029 = vmatprep.subr.bf16.mxu0 %v1097_v20  ;;  %v355_v35 = vadd.f32 %v1182_v11, %v316_v22 }
  0x16   : > { %v356_v36 = vadd.f32 %v1182_v11, %v317_v23  ;;  %v357_v37 = vadd.f32 %v1182_v11, %v318_v24  ;;  %1073 = vmatprep.subr.bf16.mxu1 %v1097_v20  ;;  %v358_v39 = vadd.f32 %v1182_v11, %v319_v27  ;;  %v359_v40 = vadd.f32 %v1182_v11, %v320_v28 }
  0x17   : > { %v384_v30 = vmax.f32 %v352_v25, 0.0  ;;  %v385_v31 = vmax.f32 %v353_v26, 0.0  ;;  %v936_v41 = vunpack.c.l.bf16 %v985_v29  ;;  %v937_v43 = vunpack.c.h.bf16 %v985_v29  ;;  %1030 = vmatpush3.bf16.msra.mxu0 %v1097_v20 }
  0x18   : > { %v940_v44 = vunpack.c.l.bf16 %v986_v33  ;;  %v386_v45 = vmax.f32 %v354_v32, 0.0  ;;  %v941_v47 = vunpack.c.h.bf16 %v986_v33  ;;  %1031 = vmatprep.subr.bf16.mxu0 %v1098_v34  ;;  %v387_v50 = vmax.f32 %v355_v35, 0.0  ;;  %1081 = vmatpush3.bf16.msra.mxu1 %v1097_v20  ;;  %v993_v32 = vld [vmem:[%s1165_s30 + $0x60] sm:$0xff]  }
  0x19   : > { %v416_v38 = vpack.c.bf16 %v385_v31, %v384_v30  ;;  %v321_v46 = vmul.f32 %v936_v41, %v1174_v5  ;;  %v388_v51 = vmax.f32 %v356_v36, 0.0  ;;  %v389_v52 = vmax.f32 %v357_v37, 0.0  ;;  %1074 = vmatprep.subr.bf16.mxu1 %v1098_v34 }
  0x1a   : > { %v944_v53 = vunpack.c.l.bf16 %v987_v42  ;;  %v390_v54 = vmax.f32 %v358_v39, 0.0  ;;  %v391_v55 = vmax.f32 %v359_v40, 0.0  ;;  %v322_v56 = vmul.f32 %v937_v43, %v1174_v5 }
  0x1b   : > { %1037 = vmatprep.mubr.bf16.mxu0 %v416_v38  ;;  %v323_v57 = vmul.f32 %v940_v44, %v1174_v5  ;;  %v945_v58 = vunpack.c.h.bf16 %v987_v42  ;;  %v948_v59 = vunpack.c.l.bf16 %v1211_v48  ;;  %1032 = vmatpush3.bf16.msra.mxu0 %v1098_v34  ;;  %v1221_v61 = vadd.f32 %v1182_v11, %v321_v46 }
  0x1c   : > { %v324_v62 = vmul.f32 %v941_v47, %v1174_v5  ;;  %1033 = vmatprep.subr.bf16.mxu0 %v1099_v49  ;;  %v417_v0 = vpack.c.bf16 %v387_v50, %v386_v45  ;;  %v418_v1 = vpack.c.bf16 %v389_v52, %v388_v51  ;;  %1082 = vmatpush3.bf16.msra.mxu1 %v1098_v34  ;;  %v949_v7 = vunpack.c.h.bf16 %v1211_v48  ;;  %v994_v45 = vld [vmem:[%s1165_s30 + $0x68] sm:$0xff]  }
  0x1d   : > { %v325_v2 = vmul.f32 %v944_v53, %v1174_v5  ;;  %v1229_v4 = vpack.c.bf16 %v391_v55, %v390_v54  ;;  %v1232_v6 = vadd.f32 %v1182_v11, %v322_v56  ;;  %1075 = vmatprep.subr.bf16.mxu1 %v1099_v49  ;;  %v952_v8 = vunpack.c.l.bf16 %v989_v60  ;;  %v995_v55 = vld [vmem:[%s1165_s30 + $0x70] sm:$0xff]  }
  0x1e   : > { %v1237_v10 = vadd.f32 %v1182_v11, %v323_v57  ;;  %v1240_v12 = vmul.f32 %v945_v58, %v1174_v5  ;;  %v1243_v13 = vmul.f32 %v948_v59, %v1174_v5  ;;  %v953_v14 = vunpack.c.h.bf16 %v989_v60 }
  0x1f   : > { %1034 = vmatpush3.bf16.msra.mxu0 %v1099_v49  ;;  %v392_v15 = vmax.f32 %v1221_v61, 0.0  ;;  %v1247_v16 = vadd.f32 %v1182_v11, %v324_v62  ;;  %v329_v17 = vmul.f32 %v952_v8, %v1174_v5  ;;  %v956_v18 = vunpack.c.l.bf16 %v990_v3 }
  0x20   : > { %1035 = vmatprep.subr.bf16.mxu0 %v1100_v63  ;;  %1083 = vmatpush3.bf16.msra.mxu1 %v1099_v49  ;;  %v1252_v20 = vadd.f32 %v1182_v11, %v325_v2  ;;  %v330_v21 = vmul.f32 %v953_v14, %v1174_v5  ;;  %v957_v22 = vunpack.c.h.bf16 %v990_v3  ;;  %v960_v23 = vunpack.c.l.bf16 %v991_v9 }
  0x21   : > { %v393_v24 = vmax.f32 %v1232_v6, 0.0  ;;  %1076 = vmatprep.subr.bf16.mxu1 %v1100_v63  ;;  %v368_v25 = vadd.f32 %v1182_v11, %v329_v17  ;;  %v331_v26 = vmul.f32 %v956_v18, %v1174_v5  ;;  %v961_v27 = vunpack.c.h.bf16 %v991_v9  ;;  %v996_v17 = vld [vmem:[%s1165_s30 + $0x78] sm:$0xff]  }
  0x22   : > { %v369_v28 = vadd.f32 %v1182_v11, %v330_v21  ;;  %v332_v29 = vmul.f32 %v957_v22, %v1174_v5  ;;  %v333_v30 = vmul.f32 %v960_v23, %v1174_v5  ;;  %v964_v31 = vunpack.c.l.bf16 %v992_v19 }
  0x23   : > { %1036 = vmatpush3.bf16.msra.mxu0 %v1100_v63  ;;  %v400_v33 = vmax.f32 %v368_v25, 0.0  ;;  %v370_v34 = vadd.f32 %v1182_v11, %v331_v26  ;;  %v334_v35 = vmul.f32 %v961_v27, %v1174_v5  ;;  %v965_v36 = vunpack.c.h.bf16 %v992_v19 }
  0x24   : > { %1084 = vmatpush3.bf16.msra.mxu1 %v1100_v63  ;;  %v401_v37 = vmax.f32 %v369_v28, 0.0  ;;  %v371_v38 = vadd.f32 %v1182_v11, %v332_v29  ;;  %v372_v39 = vadd.f32 %v1182_v11, %v333_v30  ;;  %v335_v40 = vmul.f32 %v964_v31, %v1174_v5 }
  0x25   : > { %v402_v41 = vmax.f32 %v370_v34, 0.0  ;;  %v373_v42 = vadd.f32 %v1182_v11, %v334_v35  ;;  %v336_v43 = vmul.f32 %v965_v36, %v1174_v5  ;;  %v968_v44 = vunpack.c.l.bf16 %v993_v32 }
  0x26   : > { %1038 = vmatmul.mubr.bf16.vlgmr.msra.gmra.mrb[0].mxu0 %v417_v0  ;;  %v424_v46 = vpack.c.bf16 %v401_v37, %v400_v33  ;;  %v403_v47 = vmax.f32 %v371_v38, 0.0  ;;  %v404_v49 = vmax.f32 %v372_v39, 0.0  ;;  %v374_v50 = vadd.f32 %v1182_v11, %v335_v40 }
  0x27   : > { %1041 = vmatprep.mubr.bf16.mxu0 %v418_v1  ;;  %v405_v51 = vmax.f32 %v373_v42, 0.0  ;;  %v375_v52 = vadd.f32 %v1182_v11, %v336_v43  ;;  %v969_v53 = vunpack.c.h.bf16 %v993_v32  ;;  %v337_v54 = vmul.f32 %v968_v44, %v1174_v5 }
  0x28   : > { %1053 = vmatprep.mubr.bf16.mxu1 %v424_v46  ;;  %v425_v56 = vpack.c.bf16 %v403_v47, %v402_v41  ;;  %v406_v57 = vmax.f32 %v374_v50, 0.0  ;;  %v972_v58 = vunpack.c.l.bf16 %v994_v45  ;;  %v973_v59 = vunpack.c.h.bf16 %v994_v45 }
  0x29   : > { %v426_v60 = vpack.c.bf16 %v405_v51, %v404_v49  ;;  %v407_v61 = vmax.f32 %v375_v52, 0.0  ;;  %v338_v62 = vmul.f32 %v969_v53, %v1174_v5  ;;  %v376_v63 = vadd.f32 %v1182_v11, %v337_v54 }
  0x2a   : > { %1054 = vmatmul.mubr.bf16.vlgmr.msra.gmra.mrb[0].mxu1 %v425_v56  ;;  %v339_v0 = vmul.f32 %v972_v58, %v1174_v5  ;;  %v340_v1 = vmul.f32 %v973_v59, %v1174_v5  ;;  %v976_v2 = vunpack.c.l.bf16 %v995_v55  ;;  %v977_v3 = vunpack.c.h.bf16 %v995_v55 }
  0x2b   : > { %v420_v6 = vpack.c.bf16 %v393_v24, %v392_v15  ;;  %v365_v8 = vadd.f32 %v1182_v11, %v1240_v12  ;;  %1057 = vmatprep.mubr.bf16.mxu1 %v426_v60  ;;  %v377_v9 = vadd.f32 %v1182_v11, %v338_v62  ;;  %v408_v14 = vmax.f32 %v376_v63, 0.0 }
  0x2c   : > { %v394_v18 = vmax.f32 %v1237_v10, 0.0  ;;  %v328_v19 = vmul.f32 %v949_v7, %v1174_v5  ;;  %v341_v21 = vmul.f32 %v976_v2, %v1174_v5  ;;  %v342_v22 = vmul.f32 %v977_v3, %v1174_v5 }
  0x2d   : > { %v395_v15 = vmax.f32 %v1247_v16, 0.0  ;;  %v396_v23 = vmax.f32 %v1252_v20, 0.0  ;;  %v427_v12 = vpack.c.bf16 %v407_v61, %v406_v57  ;;  %v409_v24 = vmax.f32 %v377_v9, 0.0 }
  0x2e   : > { %1042 = vmatmul.mubr.bf16.gmra.mrb[4].mxu0 %v1229_v4  ;;  %v378_v25 = vadd.f32 %v1182_v11, %v339_v0  ;;  %v379_v10 = vadd.f32 %v1182_v11, %v340_v1  ;;  %v980_v26 = vunpack.c.l.bf16 %v996_v17  ;;  %v981_v27 = vunpack.c.h.bf16 %v996_v17 }
  0x2f   : > { %1045 = vmatprep.mubr.bf16.mxu0 %v420_v6  ;;  %v397_v48 = vmax.f32 %v365_v8, 0.0  ;;  %v428_v7 = vpack.c.bf16 %v409_v24, %v408_v14  ;;  %v380_v28 = vadd.f32 %v1182_v11, %v341_v21  ;;  %v381_v29 = vadd.f32 %v1182_v11, %v342_v22 }
  0x30   : > { %v421_v16 = vpack.c.bf16 %v395_v15, %v394_v18  ;;  %v366_v20 = vadd.f32 %v1182_v11, %v1243_v13  ;;  %v367_v30 = vadd.f32 %v1182_v11, %v328_v19  ;;  %v410_v4 = vmax.f32 %v378_v25, 0.0 }
  0x31   : > { %v411_v31 = vmax.f32 %v379_v10, 0.0  ;;  %v343_v32 = vmul.f32 %v980_v26, %v1174_v5  ;;  %v344_v33 = vmul.f32 %v981_v27, %v1174_v5  ;;  %v422_v34 = vpack.c.bf16 %v397_v48, %v396_v23 }
  0x32   : > { %1058 = vmatmul.mubr.bf16.gmra.mrb[4].mxu1 %v427_v12  ;;  %v412_v35 = vmax.f32 %v380_v28, 0.0  ;;  %v413_v36 = vmax.f32 %v381_v29, 0.0  ;;  %v398_v37 = vmax.f32 %v366_v20, 0.0  ;;  %v399_v38 = vmax.f32 %v367_v30, 0.0 }
  0x33   : > { %1061 = vmatprep.mubr.bf16.mxu1 %v428_v7  ;;  %v429_v39 = vpack.c.bf16 %v411_v31, %v410_v4  ;;  %v382_v13 = vadd.f32 %v1182_v11, %v343_v32  ;;  %v383_v40 = vadd.f32 %v1182_v11, %v344_v33 }
  0x34   : > { %v430_v41 = vpack.c.bf16 %v413_v36, %v412_v35  ;;  %v423_v42 = vpack.c.bf16 %v399_v38, %v398_v37 }
  0x35   : > { %v414_v43 = vmax.f32 %v382_v13, 0.0  ;;  %v415_v44 = vmax.f32 %v383_v40, 0.0 }
  0x36   : > { %1046 = vmatmul.mubr.bf16.gmra.mrb[8].mxu0 %v421_v16 }
  0x37   : > { %1049 = vmatprep.mubr.bf16.mxu0 %v422_v34  ;;  %v431_v5 = vpack.c.bf16 %v415_v44, %v414_v43 }
  0x3a   : > { %1062 = vmatmul.mubr.bf16.gmra.mrb[8].mxu1 %v429_v39 }
  0x3b   : > { %1065 = vmatprep.mubr.bf16.mxu1 %v430_v41 }
  0x3e   : > { %1050 = vmatmul.mubr.bf16.gmra.mrb[12].mxu0 %v423_v42 }
  0x42   : > { %1066 = vmatmul.mubr.bf16.gmra.mrb[12].mxu1 %v431_v5 }
  0xf9   : > { %v1039_v11 = vpop.f32.mrb[0].mxu0 }
  0xfa   : > { %659 = vst [vmem:[%s1306_s26 + $0x10] sm:$0xff] %v1039_v11  ;;  %v530_v45 = vpop.f32.mrb[1].mxu0  ;;  %v728_v54 = vmul.f32 %v1039_v11, %v1039_v11 }
  0xfb   : > { %657 = vst [vmem:[%s1306_s26] sm:$0xff] %v530_v45  ;;  %v1040_v46 = vpop.f32.mrb[2].mxu0  ;;  %v726_v49 = vmul.f32 %v530_v45, %v530_v45 }
  0xfc   : > { %660 = vst [vmem:[%s1306_s26 + $0x18] sm:$0xff] %v1040_v46  ;;  %v533_v47 = vpop.f32.mrb[3].mxu0  ;;  %v729_v59 = vmul.f32 %v1040_v46, %v1040_v46 }
  0xfd   : > { %658 = vst [vmem:[%s1306_s26 + $0x8] sm:$0xff] %v533_v47  ;;  %v689_v50 = vadd.f32 %v533_v47, %v530_v45  ;;  %v727_v51 = vmul.f32 %v533_v47, %v533_v47  ;;  %v1312_v52 = vpop.f32.mrb[0].mxu1 }
  0xfe   : > { %675 = vst [vmem:[%s1306_s26 + $0x90] sm:$0xff] %v1312_v52  ;;  %v1316_v53 = vpop.f32.mrb[1].mxu1 }
  0xff   : > { %v690_v55 = vadd.f32 %v1039_v11, %v689_v50  ;;  %v758_v56 = vadd.f32 %v727_v51, %v726_v49  ;;  %673 = vst [vmem:[%s1306_s26 + $0x80] sm:$0xff] %v1316_v53  ;;  %v1320_v57 = vpop.f32.mrb[2].mxu1 }
 0x100   : > { %676 = vst [vmem:[%s1306_s26 + $0x98] sm:$0xff] %v1320_v57  ;;  %v1324_v58 = vpop.f32.mrb[3].mxu1 }
 0x101   : > { %v759_v60 = vadd.f32 %v758_v56, %v728_v54  ;;  %v1043_v61 = vpop.f32.mrb[4].mxu0  ;;  %v691_v62 = vadd.f32 %v1040_v46, %v690_v55  ;;  %674 = vst [vmem:[%s1306_s26 + $0x88] sm:$0xff] %v1324_v58 }
 0x102   : > { %663 = vst [vmem:[%s1306_s26 + $0x30] sm:$0xff] %v1043_v61  ;;  %v546_v63 = vpop.f32.mrb[5].mxu0  ;;  %v732_v19 = vmul.f32 %v1043_v61, %v1043_v61 }
 0x103   : > { %661 = vst [vmem:[%s1306_s26 + $0x20] sm:$0xff] %v546_v63  ;;  %v692_v0 = vadd.f32 %v691_v62, %v546_v63  ;;  %v730_v1 = vmul.f32 %v546_v63, %v546_v63  ;;  %v760_v2 = vadd.f32 %v759_v60, %v729_v59  ;;  %v1044_v3 = vpop.f32.mrb[6].mxu0  ;;  %v742_v62 = vmul.f32 %v1316_v53, %v1316_v53 }
 0x104   : > { %664 = vst [vmem:[%s1306_s26 + $0x38] sm:$0xff] %v1044_v3  ;;  %v549_v6 = vpop.f32.mrb[7].mxu0  ;;  %v733_v12 = vmul.f32 %v1044_v3, %v1044_v3 }
 0x105   : > { %v761_v8 = vadd.f32 %v760_v2, %v730_v1  ;;  %662 = vst [vmem:[%s1306_s26 + $0x28] sm:$0xff] %v549_v6  ;;  %v693_v9 = vadd.f32 %v692_v0, %v549_v6  ;;  %v731_v14 = vmul.f32 %v549_v6, %v549_v6  ;;  %v1332_v17 = vpop.f32.mrb[4].mxu1  ;;  %v744_v6 = vmul.f32 %v1312_v52, %v1312_v52 }
 0x106   : > { %679 = vst [vmem:[%s1306_s26 + $0xb0] sm:$0xff] %v1332_v17  ;;  %v1336_v18 = vpop.f32.mrb[5].mxu1 }
 0x107   : > { %v694_v21 = vadd.f32 %v1043_v61, %v693_v9  ;;  %v762_v22 = vadd.f32 %v761_v8, %v731_v14  ;;  %677 = vst [vmem:[%s1306_s26 + $0xa0] sm:$0xff] %v1336_v18  ;;  %v1340_v15 = vpop.f32.mrb[6].mxu1  ;;  %v745_v14 = vmul.f32 %v1320_v57, %v1320_v57 }
 0x108   : > { %680 = vst [vmem:[%s1306_s26 + $0xb8] sm:$0xff] %v1340_v15  ;;  %v1344_v23 = vpop.f32.mrb[7].mxu1 }
 0x109   : > { %v763_v24 = vadd.f32 %v762_v22, %v732_v19  ;;  %v1047_v25 = vpop.f32.mrb[8].mxu0  ;;  %v695_v10 = vadd.f32 %v1044_v3, %v694_v21  ;;  %678 = vst [vmem:[%s1306_s26 + $0xa8] sm:$0xff] %v1344_v23  ;;  %v743_v3 = vmul.f32 %v1324_v58, %v1324_v58 }
 0x10a   : > { %667 = vst [vmem:[%s1306_s26 + $0x50] sm:$0xff] %v1047_v25  ;;  %v562_v26 = vpop.f32.mrb[9].mxu0  ;;  %v736_v32 = vmul.f32 %v1047_v25, %v1047_v25 }
 0x10b   : > { %665 = vst [vmem:[%s1306_s26 + $0x40] sm:$0xff] %v562_v26  ;;  %v696_v27 = vadd.f32 %v695_v10, %v562_v26  ;;  %v734_v48 = vmul.f32 %v562_v26, %v562_v26  ;;  %v764_v7 = vadd.f32 %v763_v24, %v733_v12  ;;  %v1048_v28 = vpop.f32.mrb[10].mxu0 }
 0x10c   : > { %668 = vst [vmem:[%s1306_s26 + $0x58] sm:$0xff] %v1048_v28  ;;  %v565_v29 = vpop.f32.mrb[11].mxu0  ;;  %v737_v37 = vmul.f32 %v1048_v28, %v1048_v28 }
 0x10d   : > { %v765_v16 = vadd.f32 %v764_v7, %v734_v48  ;;  %666 = vst [vmem:[%s1306_s26 + $0x48] sm:$0xff] %v565_v29  ;;  %v697_v20 = vadd.f32 %v696_v27, %v565_v29  ;;  %v735_v30 = vmul.f32 %v565_v29, %v565_v29  ;;  %v1352_v4 = vpop.f32.mrb[8].mxu1 }
 0x10e   : > { %683 = vst [vmem:[%s1306_s26 + $0xd0] sm:$0xff] %v1352_v4  ;;  %v1356_v31 = vpop.f32.mrb[9].mxu1 }
 0x10f   : > { %v698_v33 = vadd.f32 %v1047_v25, %v697_v20  ;;  %v766_v34 = vadd.f32 %v765_v16, %v735_v30  ;;  %681 = vst [vmem:[%s1306_s26 + $0xc0] sm:$0xff] %v1356_v31  ;;  %v1360_v35 = vpop.f32.mrb[10].mxu1  ;;  %v747_v25 = vmul.f32 %v1344_v23, %v1344_v23  ;;  %v752_v20 = vmul.f32 %v1352_v4, %v1352_v4 }
 0x110   : > { %684 = vst [vmem:[%s1306_s26 + $0xd8] sm:$0xff] %v1360_v35  ;;  %v629_v36 = vpop.f32.mrb[11].mxu1 }
 0x111   : > { %v767_v38 = vadd.f32 %v766_v34, %v736_v32  ;;  %v1051_v39 = vpop.f32.mrb[12].mxu0  ;;  %v699_v13 = vadd.f32 %v1048_v28, %v698_v33  ;;  %682 = vst [vmem:[%s1306_s26 + $0xc8] sm:$0xff] %v629_v36  ;;  %v751_v16 = vmul.f32 %v629_v36, %v629_v36  ;;  %v753_v32 = vmul.f32 %v1360_v35, %v1360_v35 }
 0x112   : > { %671 = vst [vmem:[%s1306_s26 + $0x70] sm:$0xff] %v1051_v39  ;;  %v578_v40 = vpop.f32.mrb[13].mxu0  ;;  %v740_v50 = vmul.f32 %v1051_v39, %v1051_v39 }
 0x113   : > { %669 = vst [vmem:[%s1306_s26 + $0x60] sm:$0xff] %v578_v40  ;;  %v700_v41 = vadd.f32 %v699_v13, %v578_v40  ;;  %v738_v42 = vmul.f32 %v578_v40, %v578_v40  ;;  %v768_v43 = vadd.f32 %v767_v38, %v737_v37  ;;  %v1052_v44 = vpop.f32.mrb[14].mxu0 }
 0x114   : > { %672 = vst [vmem:[%s1306_s26 + $0x78] sm:$0xff] %v1052_v44  ;;  %v581_v5 = vpop.f32.mrb[15].mxu0  ;;  %v741_v59 = vmul.f32 %v1052_v44, %v1052_v44 }
 0x115   : > { %v769_v11 = vadd.f32 %v768_v43, %v738_v42  ;;  %670 = vst [vmem:[%s1306_s26 + $0x68] sm:$0xff] %v581_v5  ;;  %v701_v45 = vadd.f32 %v700_v41, %v581_v5  ;;  %v739_v46 = vmul.f32 %v581_v5, %v581_v5  ;;  %v1067_v47 = vpop.f32.mrb[12].mxu1 }
 0x116   : > { %687 = vst [vmem:[%s1306_s26 + $0xf0] sm:$0xff] %v1067_v47  ;;  %v642_v49 = vpop.f32.mrb[13].mxu1  ;;  %v756_v13 = vmul.f32 %v1067_v47, %v1067_v47 }
 0x117   : > { %v702_v51 = vadd.f32 %v1051_v39, %v701_v45  ;;  %v770_v54 = vadd.f32 %v769_v11, %v739_v46  ;;  %685 = vst [vmem:[%s1306_s26 + $0xe0] sm:$0xff] %v642_v49  ;;  %v1068_v55 = vpop.f32.mrb[14].mxu1  ;;  %v754_v34 = vmul.f32 %v642_v49, %v642_v49  ;;  %v795_v11 = vlaneseq }
 0x118   : > { %688 = vst [vmem:[%s1306_s26 + $0xf8] sm:$0xff] %v1068_v55  ;;  %v645_v56 = vpop.f32.mrb[15].mxu1  ;;  %v757_v42 = vmul.f32 %v1068_v55, %v1068_v55 }
 0x119   : > { %v771_v60 = vadd.f32 %v770_v54, %v740_v50  ;;  %v703_v61 = vadd.f32 %v1052_v44, %v702_v51  ;;  %686 = vst [vmem:[%s1306_s26 + $0xe8] sm:$0xff] %v645_v56  ;;  %v796_v50 = vshrl.u32 %v795_v11, 7 }
 0x11b   : > { %v704_v63 = vadd.f32 %v703_v61, %v1316_v53  ;;  %v772_v0 = vadd.f32 %v771_v60, %v741_v59  ;;  %v746_v53 = vmul.f32 %v1336_v18, %v1336_v18 }
 0x11d   : > { %v773_v1 = vadd.f32 %v772_v0, %v742_v62  ;;  %v705_v2 = vadd.f32 %v704_v63, %v1324_v58 }
 0x11f   : > { %v706_v8 = vadd.f32 %v1312_v52, %v705_v2  ;;  %v774_v9 = vadd.f32 %v773_v1, %v743_v3  ;;  %v748_v52 = vmul.f32 %v1332_v17, %v1332_v17 }
 0x121   : > { %v775_v19 = vadd.f32 %v774_v9, %v744_v6  ;;  %v707_v21 = vadd.f32 %v1320_v57, %v706_v8  ;;  %v749_v57 = vmul.f32 %v1340_v15, %v1340_v15 }
 0x123   : > { %v708_v22 = vadd.f32 %v707_v21, %v1336_v18  ;;  %v776_v12 = vadd.f32 %v775_v19, %v745_v14  ;;  %v750_v18 = vmul.f32 %v1356_v31, %v1356_v31 }
 0x125   : > { %v777_v24 = vadd.f32 %v776_v12, %v746_v53  ;;  %v709_v58 = vadd.f32 %v708_v22, %v1344_v23 }
 0x127   : > { %v710_v10 = vadd.f32 %v1332_v17, %v709_v58  ;;  %v778_v26 = vadd.f32 %v777_v24, %v747_v25 }
 0x129   : > { %v779_v27 = vadd.f32 %v778_v26, %v748_v52  ;;  %v711_v48 = vadd.f32 %v1340_v15, %v710_v10 }
 0x12b   : > { %v712_v7 = vadd.f32 %v711_v48, %v1356_v31  ;;  %v780_v28 = vadd.f32 %v779_v27, %v749_v57 }
 0x12d   : > { %v781_v29 = vadd.f32 %v780_v28, %v750_v18  ;;  %v713_v23 = vadd.f32 %v712_v7, %v629_v36  ;;  %v755_v36 = vmul.f32 %v645_v56, %v645_v56 }
 0x12f   : > { %v714_v17 = vadd.f32 %v1352_v4, %v713_v23  ;;  %v782_v30 = vadd.f32 %v781_v29, %v751_v16 }
 0x131   : > { %v783_v15 = vadd.f32 %v782_v30, %v752_v20  ;;  %v715_v33 = vadd.f32 %v1360_v35, %v714_v17 }
 0x133   : > { %v716_v37 = vadd.f32 %v715_v33, %v642_v49  ;;  %v784_v31 = vadd.f32 %v783_v15, %v753_v32 }
 0x135   : > { %v785_v38 = vadd.f32 %v784_v31, %v754_v34  ;;  %v717_v39 = vadd.f32 %v716_v37, %v645_v56 }
 0x137   : > { %v718_v40 = vadd.f32 %v1067_v47, %v717_v39  ;;  %v786_v41 = vadd.f32 %v785_v38, %v755_v36  ;;  %v797_v47 = vsub.s32 0, %v796_v50 }
 0x139   : > { %v719_v4 = vadd.f32 %v1068_v55, %v718_v40  ;;  %v787_v43 = vadd.f32 %v786_v41, %v756_v13 }
 0x13b   : > { %v720_v44 = vrot.slane %v719_v4, 4  ;;  %v788_v5 = vadd.f32 %v787_v43, %v757_v42 }
 0x13d   : > { %v721_v45 = vadd.f32 %v720_v44, %v719_v4  ;;  %v789_v46 = vrot.slane %v788_v5, 4 }
 0x13f   : > { %v722_v35 = vrot.slane %v721_v45, 2  ;;  %v790_v49 = vadd.f32 %v789_v46, %v788_v5 }
 0x141   : > { %v723_v51 = vadd.f32 %v722_v35, %v721_v45  ;;  %v791_v54 = vrot.slane %v790_v49, 2 }
 0x143   : > { %v724_v56 = vrot.slane %v723_v51, 1  ;;  %v792_v59 = vadd.f32 %v791_v54, %v790_v49 }
 0x145   : > { %v725_v60 = vadd.f32 %v724_v56, %v723_v51  ;;  %v793_v61 = vrot.slane %v792_v59, 1 }
 0x147   : > { %v794_v55 = vadd.f32 %v793_v61, %v792_v59  ;;  %v798_v62 = vrot.slane %v725_v60, %v797_v47 }
 0x149   : > { %v802_v63 = vrot.slane %v794_v55, %v797_v47  ;;  %803 = vst [vmem:[%s240_s29] sm:$0xff] %v798_v62 }
 0x14b   : > { %804 = vst [vmem:[%s240_s29 + $0x8] sm:$0xff] %v802_v63 }
 0x14c PF: > { %s16_s18 = sadd.s32 1, %s1107_s18  }
 0x14d   : > { %p13_p5 = scmp.ge.s32.totalorder %s16_s18, 4  }
 0x14f   :  { %15 = sbr.rel (!%p13_p5) target bundleno = 1 (0x1), region = 78 }

// kernel: bottleneck_forward.7
= control target key start
LH: loop header
LB: loop body
LE: loop exit
PB: predicated region body
PF: predicated region fallthrough
CT: control target
= control target key end

     0   :  { %s585_s15 = smov 0   ;;  %s786_s0 = inlined_call_operand.vmem [shape: f32[512,128], index: 0, kind: input, shape index: {}]   ;;  %s787_s1 = inlined_call_operand.vmem [shape: f32[512,128], index: 1, kind: input, shape index: {}]   ;;  %s788_s2 = inlined_call_operand.vmem [shape: f32[1,128], index: 2, kind: input, shape index: {}]   ;;  %s789_s3 = inlined_call_operand.vmem [shape: f32[1,128], index: 3, kind: input, shape index: {}]   ;;  %s790_s4 = inlined_call_operand.vmem [shape: f32[512,128], index: 4, kind: output, shape index: {}]  }
   0x1 LB: > { %s529_s16 = sadd.s32 4294967295, %s558_s15   ;;  %p533_p0 = scmp.ge.s32.totalorder %s558_s15, 1  ;;  %s558_s15 = sphi %s585_s15, %s14_s15  }
   0x2   : > { %p174_p1 = scmp.lt.s32.totalorder %s558_s15, 3 }
   0x4   : > { %p175_p2 = pnand %p533_p0, %p174_p1 }
   0x5   : > { %s534_s17 = sshll.u32 (!%p175_p2), %s529_s16, 5  ;;  %v598_v0 = vld [vmem:[%s788_s2] ss:$0 sm:$0xff] (!%p175_p2) }
   0x6   : > { %178 = sbr.rel (%p175_p2) target bundleno = 55 (0x37), region = 36  ;;  %p206_p3 = scmp.lt.s32.totalorder (!%p175_p2), %s534_s17, 63  ;;  %v616_v2 = vld [vmem:[%s789_s3] ss:$0 sm:$0xff] (!%p175_p2) }
   0xd   : > { %s792_s17 = smov (!%p206_p3, %s534_s17), 63 }
   0xe   : > { %s593_s18 = sshll.u32 %s792_s17, 3 }
   0xf   : > { %s604_s23 = scalar_lea.vmem %s786_s0, %s593_s18  ;;  %s610_s26 = scalar_lea.vmem %s787_s1, %s593_s18 }
  0x10   : > { %v223_v1 = vld [vmem:[%s604_s23] sm:$0xff]  ;;  %v224_v3 = vld [vmem:[%s604_s23 + $0x8] sm:$0xff]  ;;  %v225_v7 = vld [vmem:[%s604_s23 + $0x10] sm:$0xff]  ;;  %s646_s5 = scalar_lea.vmem %s790_s4, %s593_s18 }
  0x11   : > { %v262_v4 = vmul.f32 %v598_v0, %v223_v1  ;;  %v333_v5 = vld [vmem:[%s610_s26] sm:$0xff]  ;;  %v263_v6 = vmul.f32 %v598_v0, %v224_v3  ;;  %v334_v8 = vld [vmem:[%s610_s26 + $0x8] sm:$0xff]  ;;  %v264_v9 = vmul.f32 %v598_v0, %v225_v7  ;;  %v226_v10 = vld [vmem:[%s604_s23 + $0x18] sm:$0xff] }
  0x12   : > { %v227_v11 = vld [vmem:[%s604_s23 + $0x20] sm:$0xff]  ;;  %v335_v14 = vld [vmem:[%s610_s26 + $0x10] sm:$0xff]  ;;  %v265_v15 = vmul.f32 %v598_v0, %v226_v10  ;;  %v336_v16 = vld [vmem:[%s610_s26 + $0x18] sm:$0xff] }
  0x13   : > { %v301_v12 = vadd.f32 %v616_v2, %v262_v4  ;;  %v302_v13 = vadd.f32 %v616_v2, %v263_v6  ;;  %v266_v17 = vmul.f32 %v598_v0, %v227_v11  ;;  %v228_v18 = vld [vmem:[%s604_s23 + $0x28] sm:$0xff]  ;;  %v303_v19 = vadd.f32 %v616_v2, %v264_v9  ;;  %v337_v20 = vld [vmem:[%s610_s26 + $0x20] sm:$0xff]  ;;  %v229_v22 = vld [vmem:[%s604_s23 + $0x30] sm:$0xff] }
  0x14   : > { %v267_v21 = vmul.f32 %v598_v0, %v228_v18  ;;  %v230_v23 = vld [vmem:[%s604_s23 + $0x38] sm:$0xff]  ;;  %v304_v26 = vadd.f32 %v616_v2, %v265_v15  ;;  %v338_v28 = vld [vmem:[%s610_s26 + $0x28] sm:$0xff]  ;;  %v268_v31 = vmul.f32 %v598_v0, %v229_v22  ;;  %v231_v33 = vld [vmem:[%s604_s23 + $0x40] sm:$0xff] }
  0x15   : > { %v365_v24 = vadd.f32 %v333_v5, %v301_v12  ;;  %v366_v25 = vadd.f32 %v334_v8, %v302_v13  ;;  %v305_v27 = vadd.f32 %v616_v2, %v266_v17  ;;  %v367_v29 = vadd.f32 %v335_v14, %v303_v19  ;;  %v232_v34 = vld [vmem:[%s604_s23 + $0x48] sm:$0xff]  ;;  %v339_v39 = vld [vmem:[%s610_s26 + $0x30] sm:$0xff]  ;;  %v340_v40 = vld [vmem:[%s610_s26 + $0x38] sm:$0xff] }
  0x16   : > { %v306_v30 = vadd.f32 %v616_v2, %v267_v21  ;;  %v269_v32 = vmul.f32 %v598_v0, %v230_v23  ;;  %v368_v37 = vadd.f32 %v336_v16, %v304_v26  ;;  %v233_v41 = vld [vmem:[%s604_s23 + $0x50] sm:$0xff]  ;;  %v307_v44 = vadd.f32 %v616_v2, %v268_v31  ;;  %v234_v46 = vld [vmem:[%s604_s23 + $0x58] sm:$0xff]  ;;  %v235_v47 = vld [vmem:[%s604_s23 + $0x60] sm:$0xff] }
  0x17   : > { %v397_v35 = vmax.f32 %v365_v24, 0.0  ;;  %v398_v36 = vmax.f32 %v366_v25, 0.0  ;;  %v369_v38 = vadd.f32 %v337_v20, %v305_v27  ;;  %v399_v42 = vmax.f32 %v367_v29, 0.0  ;;  %v236_v52 = vld [vmem:[%s604_s23 + $0x68] sm:$0xff]  ;;  %v341_v56 = vld [vmem:[%s610_s26 + $0x40] sm:$0xff]  ;;  %v343_v61 = vld [vmem:[%s610_s26 + $0x50] sm:$0xff] }
  0x18   : > { %v370_v43 = vadd.f32 %v338_v28, %v306_v30  ;;  %v308_v45 = vadd.f32 %v616_v2, %v269_v32  ;;  %v400_v48 = vmax.f32 %v368_v37, 0.0  ;;  %v270_v50 = vmul.f32 %v598_v0, %v231_v33  ;;  %v342_v57 = vld [vmem:[%s610_s26 + $0x48] sm:$0xff]  ;;  %v237_v1 = vld [vmem:[%s604_s23 + $0x70] sm:$0xff]  ;;  %v238_v3 = vld [vmem:[%s604_s23 + $0x78] sm:$0xff] }
  0x19   : > { %429 = vst [vmem:[%s646_s5] sm:$0xff] %v397_v35  ;;  %430 = vst [vmem:[%s646_s5 + $0x8] sm:$0xff] %v398_v36  ;;  %v401_v49 = vmax.f32 %v369_v38, 0.0  ;;  %v271_v51 = vmul.f32 %v598_v0, %v232_v34  ;;  %v371_v54 = vadd.f32 %v339_v39, %v307_v44  ;;  %v272_v58 = vmul.f32 %v598_v0, %v233_v41  ;;  %v344_v7 = vld [vmem:[%s610_s26 + $0x58] sm:$0xff]  ;;  %v345_v8 = vld [vmem:[%s610_s26 + $0x60] sm:$0xff] }
  0x1a   : > { %431 = vst [vmem:[%s646_s5 + $0x10] sm:$0xff] %v399_v42  ;;  %v402_v53 = vmax.f32 %v370_v43, 0.0  ;;  %v372_v55 = vadd.f32 %v340_v40, %v308_v45  ;;  %432 = vst [vmem:[%s646_s5 + $0x18] sm:$0xff] %v400_v48  ;;  %v309_v59 = vadd.f32 %v616_v2, %v270_v50  ;;  %v273_v62 = vmul.f32 %v598_v0, %v234_v46  ;;  %v346_v14 = vld [vmem:[%s610_s26 + $0x68] sm:$0xff]  ;;  %v239_v19 = vld [vmem:[%s604_s23 + $0x80] sm:$0xff] }
  0x1b   : > { %433 = vst [vmem:[%s646_s5 + $0x20] sm:$0xff] %v401_v49  ;;  %v310_v60 = vadd.f32 %v616_v2, %v271_v51  ;;  %v274_v63 = vmul.f32 %v598_v0, %v235_v47  ;;  %v403_v4 = vmax.f32 %v371_v54, 0.0  ;;  %v311_v6 = vadd.f32 %v616_v2, %v272_v58  ;;  %v240_v20 = vld [vmem:[%s604_s23 + $0x88] sm:$0xff]  ;;  %v347_v25 = vld [vmem:[%s610_s26 + $0x70] sm:$0xff]  ;;  %v348_v26 = vld [vmem:[%s610_s26 + $0x78] sm:$0xff] }
  0x1c   : > { %434 = vst [vmem:[%s646_s5 + $0x28] sm:$0xff] %v402_v53  ;;  %v404_v5 = vmax.f32 %v372_v55, 0.0  ;;  %v275_v9 = vmul.f32 %v598_v0, %v236_v52  ;;  %v373_v10 = vadd.f32 %v341_v56, %v309_v59  ;;  %v312_v12 = vadd.f32 %v616_v2, %v273_v62  ;;  %v241_v27 = vld [vmem:[%s604_s23 + $0x90] sm:$0xff]  ;;  %v242_v32 = vld [vmem:[%s604_s23 + $0x98] sm:$0xff]  ;;  %v243_v33 = vld [vmem:[%s604_s23 + $0xa0] sm:$0xff] }
  0x1d   : > { %v374_v11 = vadd.f32 %v342_v57, %v310_v60  ;;  %v313_v13 = vadd.f32 %v616_v2, %v274_v63  ;;  %435 = vst [vmem:[%s646_s5 + $0x30] sm:$0xff] %v403_v4  ;;  %v375_v15 = vadd.f32 %v343_v61, %v311_v6  ;;  %v276_v17 = vmul.f32 %v598_v0, %v237_v1  ;;  %v244_v38 = vld [vmem:[%s604_s23 + $0xa8] sm:$0xff]  ;;  %v349_v42 = vld [vmem:[%s610_s26 + $0x80] sm:$0xff]  ;;  %v351_v47 = vld [vmem:[%s610_s26 + $0x90] sm:$0xff] }
  0x1e   : > { %436 = vst [vmem:[%s646_s5 + $0x38] sm:$0xff] %v404_v5  ;;  %v314_v16 = vadd.f32 %v616_v2, %v275_v9  ;;  %v277_v18 = vmul.f32 %v598_v0, %v238_v3  ;;  %v405_v21 = vmax.f32 %v373_v10, 0.0  ;;  %v376_v23 = vadd.f32 %v344_v7, %v312_v12  ;;  %v350_v43 = vld [vmem:[%s610_s26 + $0x88] sm:$0xff]  ;;  %v245_v50 = vld [vmem:[%s604_s23 + $0xb0] sm:$0xff]  ;;  %v246_v51 = vld [vmem:[%s604_s23 + $0xb8] sm:$0xff] }
  0x1f   : > { %v406_v22 = vmax.f32 %v374_v11, 0.0  ;;  %v377_v24 = vadd.f32 %v345_v8, %v313_v13  ;;  %v407_v28 = vmax.f32 %v375_v15, 0.0  ;;  %v315_v30 = vadd.f32 %v616_v2, %v276_v17  ;;  %v352_v55 = vld [vmem:[%s610_s26 + $0x98] sm:$0xff]  ;;  %v353_v56 = vld [vmem:[%s610_s26 + $0xa0] sm:$0xff]  ;;  %v354_v62 = vld [vmem:[%s610_s26 + $0xa8] sm:$0xff] }
  0x20   : > { %v378_v29 = vadd.f32 %v346_v14, %v314_v16  ;;  %v316_v31 = vadd.f32 %v616_v2, %v277_v18  ;;  %437 = vst [vmem:[%s646_s5 + $0x40] sm:$0xff] %v405_v21  ;;  %v408_v34 = vmax.f32 %v376_v23, 0.0  ;;  %v278_v36 = vmul.f32 %v598_v0, %v239_v19  ;;  %v247_v5 = vld [vmem:[%s604_s23 + $0xc0] sm:$0xff]  ;;  %v248_v6 = vld [vmem:[%s604_s23 + $0xc8] sm:$0xff]  ;;  %v355_v11 = vld [vmem:[%s610_s26 + $0xb0] sm:$0xff] }
  0x21   : > { %438 = vst [vmem:[%s646_s5 + $0x48] sm:$0xff] %v406_v22  ;;  %v409_v35 = vmax.f32 %v377_v24, 0.0  ;;  %v279_v37 = vmul.f32 %v598_v0, %v240_v20  ;;  %439 = vst [vmem:[%s646_s5 + $0x50] sm:$0xff] %v407_v28  ;;  %v379_v40 = vadd.f32 %v347_v25, %v315_v30  ;;  %v280_v44 = vmul.f32 %v598_v0, %v241_v27  ;;  %v356_v12 = vld [vmem:[%s610_s26 + $0xb8] sm:$0xff]  ;;  %v249_v13 = vld [vmem:[%s604_s23 + $0xd0] sm:$0xff] }
  0x22   : > { %v410_v39 = vmax.f32 %v378_v29, 0.0  ;;  %v380_v41 = vadd.f32 %v348_v26, %v316_v31  ;;  %440 = vst [vmem:[%s646_s5 + $0x58] sm:$0xff] %v408_v34  ;;  %v317_v45 = vadd.f32 %v616_v2, %v278_v36  ;;  %v281_v48 = vmul.f32 %v598_v0, %v242_v32  ;;  %v250_v18 = vld [vmem:[%s604_s23 + $0xd8] sm:$0xff]  ;;  %v251_v19 = vld [vmem:[%s604_s23 + $0xe0] sm:$0xff]  ;;  %v252_v24 = vld [vmem:[%s604_s23 + $0xe8] sm:$0xff] }
  0x23   : > { %441 = vst [vmem:[%s646_s5 + $0x60] sm:$0xff] %v409_v35  ;;  %v318_v46 = vadd.f32 %v616_v2, %v279_v37  ;;  %v282_v49 = vmul.f32 %v598_v0, %v243_v33  ;;  %v411_v52 = vmax.f32 %v379_v40, 0.0  ;;  %v319_v54 = vadd.f32 %v616_v2, %v280_v44  ;;  %v357_v28 = vld [vmem:[%s610_s26 + $0xc0] sm:$0xff]  ;;  %v358_v29 = vld [vmem:[%s610_s26 + $0xc8] sm:$0xff]  ;;  %v359_v33 = vld [vmem:[%s610_s26 + $0xd0] sm:$0xff] }
  0x24   : > { %442 = vst [vmem:[%s646_s5 + $0x68] sm:$0xff] %v410_v39  ;;  %v412_v53 = vmax.f32 %v380_v41, 0.0  ;;  %v283_v57 = vmul.f32 %v598_v0, %v244_v38  ;;  %v381_v58 = vadd.f32 %v349_v42, %v317_v45  ;;  %v320_v60 = vadd.f32 %v616_v2, %v281_v48  ;;  %v253_v36 = vld [vmem:[%s604_s23 + $0xf0] sm:$0xff]  ;;  %v254_v37 = vld [vmem:[%s604_s23 + $0xf8] sm:$0xff]  ;;  %v361_v42 = vld [vmem:[%s610_s26 + $0xe0] sm:$0xff] }
  0x25   : > { %v382_v59 = vadd.f32 %v350_v43, %v318_v46  ;;  %v321_v61 = vadd.f32 %v616_v2, %v282_v49  ;;  %443 = vst [vmem:[%s646_s5 + $0x70] sm:$0xff] %v411_v52  ;;  %v383_v63 = vadd.f32 %v351_v47, %v319_v54  ;;  %v284_v3 = vmul.f32 %v598_v0, %v245_v50  ;;  %v360_v41 = vld [vmem:[%s610_s26 + $0xd8] sm:$0xff]  ;;  %v362_v48 = vld [vmem:[%s610_s26 + $0xe8] sm:$0xff] }
  0x26   : > { %444 = vst [vmem:[%s646_s5 + $0x78] sm:$0xff] %v412_v53  ;;  %v322_v1 = vadd.f32 %v616_v2, %v283_v57  ;;  %v285_v4 = vmul.f32 %v598_v0, %v246_v51  ;;  %v413_v7 = vmax.f32 %v381_v58, 0.0  ;;  %v384_v9 = vadd.f32 %v352_v55, %v320_v60  ;;  %v363_v57 = vld [vmem:[%s610_s26 + $0xf0] sm:$0xff]  ;;  %v364_v58 = vld [vmem:[%s610_s26 + $0xf8] sm:$0xff] }
  0x27   : > { %v414_v8 = vmax.f32 %v382_v59, 0.0  ;;  %v385_v10 = vadd.f32 %v353_v56, %v321_v61  ;;  %v415_v14 = vmax.f32 %v383_v63, 0.0  ;;  %v323_v16 = vadd.f32 %v616_v2, %v284_v3 }
  0x28   : > { %v386_v15 = vadd.f32 %v354_v62, %v322_v1  ;;  %v324_v17 = vadd.f32 %v616_v2, %v285_v4  ;;  %445 = vst [vmem:[%s646_s5 + $0x80] sm:$0xff] %v413_v7  ;;  %v416_v20 = vmax.f32 %v384_v9, 0.0  ;;  %v286_v22 = vmul.f32 %v598_v0, %v247_v5 }
  0x29   : > { %446 = vst [vmem:[%s646_s5 + $0x88] sm:$0xff] %v414_v8  ;;  %v417_v21 = vmax.f32 %v385_v10, 0.0  ;;  %v287_v23 = vmul.f32 %v598_v0, %v248_v6  ;;  %447 = vst [vmem:[%s646_s5 + $0x90] sm:$0xff] %v415_v14  ;;  %v387_v26 = vadd.f32 %v355_v11, %v323_v16  ;;  %v288_v30 = vmul.f32 %v598_v0, %v249_v13 }
  0x2a   : > { %v418_v25 = vmax.f32 %v386_v15, 0.0  ;;  %v388_v27 = vadd.f32 %v356_v12, %v324_v17  ;;  %448 = vst [vmem:[%s646_s5 + $0x98] sm:$0xff] %v416_v20  ;;  %v325_v31 = vadd.f32 %v616_v2, %v286_v22  ;;  %v289_v34 = vmul.f32 %v598_v0, %v250_v18 }
  0x2b   : > { %449 = vst [vmem:[%s646_s5 + $0xa0] sm:$0xff] %v417_v21  ;;  %v326_v32 = vadd.f32 %v616_v2, %v287_v23  ;;  %v290_v35 = vmul.f32 %v598_v0, %v251_v19  ;;  %v419_v38 = vmax.f32 %v387_v26, 0.0  ;;  %v327_v40 = vadd.f32 %v616_v2, %v288_v30 }
  0x2c   : > { %450 = vst [vmem:[%s646_s5 + $0xa8] sm:$0xff] %v418_v25  ;;  %v420_v39 = vmax.f32 %v388_v27, 0.0  ;;  %v291_v43 = vmul.f32 %v598_v0, %v252_v24  ;;  %v389_v44 = vadd.f32 %v357_v28, %v325_v31  ;;  %v328_v46 = vadd.f32 %v616_v2, %v289_v34 }
  0x2d   : > { %v390_v45 = vadd.f32 %v358_v29, %v326_v32  ;;  %v329_v47 = vadd.f32 %v616_v2, %v290_v35  ;;  %451 = vst [vmem:[%s646_s5 + $0xb0] sm:$0xff] %v419_v38  ;;  %v391_v49 = vadd.f32 %v359_v33, %v327_v40  ;;  %v292_v51 = vmul.f32 %v598_v0, %v253_v36 }
  0x2e   : > { %452 = vst [vmem:[%s646_s5 + $0xb8] sm:$0xff] %v420_v39  ;;  %v330_v50 = vadd.f32 %v616_v2, %v291_v43  ;;  %v293_v52 = vmul.f32 %v598_v0, %v254_v37  ;;  %v421_v53 = vmax.f32 %v389_v44, 0.0  ;;  %v392_v55 = vadd.f32 %v360_v41, %v328_v46 }
  0x2f   : > { %v422_v54 = vmax.f32 %v390_v45, 0.0  ;;  %v393_v56 = vadd.f32 %v361_v42, %v329_v47  ;;  %v423_v59 = vmax.f32 %v391_v49, 0.0  ;;  %v331_v61 = vadd.f32 %v616_v2, %v292_v51 }
  0x30   : > { %v394_v60 = vadd.f32 %v362_v48, %v330_v50  ;;  %v332_v62 = vadd.f32 %v616_v2, %v293_v52  ;;  %453 = vst [vmem:[%s646_s5 + $0xc0] sm:$0xff] %v421_v53  ;;  %v424_v0 = vmax.f32 %v392_v55, 0.0 }
  0x31   : > { %454 = vst [vmem:[%s646_s5 + $0xc8] sm:$0xff] %v422_v54  ;;  %v425_v63 = vmax.f32 %v393_v56, 0.0  ;;  %455 = vst [vmem:[%s646_s5 + $0xd0] sm:$0xff] %v423_v59  ;;  %v395_v3 = vadd.f32 %v363_v57, %v331_v61 }
  0x32   : > { %v426_v1 = vmax.f32 %v394_v60, 0.0  ;;  %v396_v4 = vadd.f32 %v364_v58, %v332_v62  ;;  %456 = vst [vmem:[%s646_s5 + $0xd8] sm:$0xff] %v424_v0 }
  0x33   : > { %457 = vst [vmem:[%s646_s5 + $0xe0] sm:$0xff] %v425_v63  ;;  %v427_v5 = vmax.f32 %v395_v3, 0.0 }
  0x34   : > { %458 = vst [vmem:[%s646_s5 + $0xe8] sm:$0xff] %v426_v1  ;;  %v428_v6 = vmax.f32 %v396_v4, 0.0 }
  0x35   : > { %459 = vst [vmem:[%s646_s5 + $0xf0] sm:$0xff] %v427_v5 }
  0x36   : > { %460 = vst [vmem:[%s646_s5 + $0xf8] sm:$0xff] %v428_v6 }
  0x37 PF: > { %s14_s15 = sadd.s32 1, %s558_s15  }
  0x38   : > { %p11_p4 = scmp.ge.s32.totalorder %s14_s15, 4  }
  0x3a   :  { %13 = sbr.rel (!%p11_p4) target bundleno = 1 (0x1), region = 69 }

// kernel: bottleneck_forward.5
= control target key start
LH: loop header
LB: loop body
LE: loop exit
PB: predicated region body
PF: predicated region fallthrough
CT: control target
= control target key end

     0   :  { %s4222_s18 = smov 0   ;;  %s4224_s19 = smov 0   ;;  %s4985_s0 = inlined_call_operand.vmem [shape: bf16[512,128], index: 0, kind: input, shape index: {}]   ;;  %s4986_s1 = inlined_call_operand.vmem [shape: f32[1,128], index: 1, kind: input, shape index: {}]   ;;  %s4987_s2 = inlined_call_operand.vmem [shape: f32[1,128], index: 2, kind: input, shape index: {}]   ;;  %s4988_s3 = inlined_call_operand.vmem [shape: bf16[9,128,128], index: 3, kind: input, shape index: {}]   ;;  %s4989_s4 = inlined_call_operand.vmem [shape: bf16[512,128], index: 4, kind: output, shape index: {0}]   ;;  %s4990_s5 = inlined_call_operand.vmem [shape: f32[4,8,256], index: 5, kind: output, shape index: {1}]  }
   0x1   :  { %s4226_s20 = smov 0   ;;  %s4228_s21 = smov 0  }
   0x2   :  { %s4230_s22 = smov 0  }
   0x3 LB: > { %s25_s23 = sadd.s32 1, %s4181_s20  ;;  %s28_s24 = sadd.s32 1, %s4185_s21  ;;  %s4189_s22 = sphi %s4230_s22, %s16_s22   ;;  %s4185_s21 = sphi %s4228_s21, %s4994_s21   ;;  %s4181_s20 = sphi %s4226_s20, %s4993_s20   ;;  %s4177_s19 = sphi %s4224_s19, %s4992_s19   ;;  %s4173_s18 = sphi %s4222_s18, %s4991_s18  }
   0x4   : > { %p26_p0 = scmp.ge.s32.totalorder %s25_s23, 2  ;;  %p3016_p1 = scmp.ge.s32.totalorder %s4189_s22, 1 }
   0x5   : > { %p211_p2 = scmp.lt.s32.totalorder %s4189_s22, 5 }
   0x6   : > { %s4996_s23 = smov (%p26_p0, %s25_s23), 0  ;;  %s4998_s24 = smov (!%p26_p0, %s28_s24), %s4185_s21 }
   0x7   : > { %p212_p3 = pnand %p3016_p1, %p211_p2  ;;  %p30_p4 = scmp.ge.s32.totalorder %s4998_s24, 2 }
   0x8   : > { %s3017_s25 = sshll.u32 (!%p212_p3), %s4177_s19, 5  ;;  %s3019_s26 = sshll.u32 (!%p212_p3), %s4177_s19, 1 }
   0x9   : > { %s5000_s24 = smov (%p30_p4, %s4998_s24), 0  ;;  %215 = sbr.rel (%p212_p3) target bundleno = 482 (0x1e2), region = 36 }
   0xa   : > { %p249_p5 = scmp.lt.s32.totalorder (!%p212_p3), %s3017_s25, 63  ;;  %s255_s27 = sadd.s32 (!%p212_p3), %s4173_s18, %s3019_s26 }
   0xb   : > { %s3020_s28 = sshll.u32 (!%p212_p3), %s255_s27, 4  ;;  %p266_p7 = scmp.lt.s32.totalorder (!%p212_p3), %s255_s27, 3 }
   0xc   : > { %p257_p6 = scmp.lt.s32.totalorder (!%p212_p3), %s3020_s28, 63  ;;  %p3025_p8 = scmp.ne.s32.totalorder (!%p212_p3), %s4173_s18, 0 }
  0x10   : > { %s5002_s25 = smov (!%p249_p5, %s3017_s25), 63  ;;  %s5004_s28 = smov (!%p257_p6, %s3020_s28), 63 }
  0x11   : > { %s3018_s29 = sshll.u32 %s5002_s25, 2  ;;  %s5006_s27 = smov (!%p266_p7, %s255_s27), 3  ;;  %v4275_v1 = vld [vmem:[%s4986_s1] ss:$0 sm:$0xff] (!%p3025_p8)  ;;  %v4191_v2 = vmov (!%p3025_p8), 0.0  }
  0x12   : > { %s4258_s7 = scalar_lea.vmem %s4985_s0, %s3018_s29  ;;  %s3021_s8 = sshll.u32 %s5004_s28, 2  ;;  %278 = vst [vmem:[#allocation2] sm:$0xff] (!%p3025_p8), %v4191_v2  ;;  %279 = vst [vmem:[#allocation2 + $0x8] sm:$0xff] (!%p3025_p8), %v4191_v2  ;;  %v4283_v8 = vld [vmem:[%s4987_s2] ss:$0 sm:$0xff] (!%p3025_p8) }
  0x13   : > { %s4263_s11 = scalar_lea.vmem %s4989_s4, %s3021_s8  ;;  %s3316_s12 = sshll.u32 %s5006_s27, 4  ;;  %v3337_v0 = vld [vmem:[%s4258_s7] sm:$0xff] (!%p3025_p8)   ;;  %280 = vst [vmem:[#allocation2 + $0x10] sm:$0xff] (!%p3025_p8), %v4191_v2  ;;  %281 = vst [vmem:[#allocation2 + $0x18] sm:$0xff] (!%p3025_p8), %v4191_v2  ;;  %v3440_v5 = vld [vmem:[%s4258_s7 + $0x8] sm:$0xff] (!%p3025_p8)  }
  0x14   : > { %s4268_s15 = scalar_lea.vmem %s4990_s5, %s3316_s12  ;;  %277 = sbr.rel (%p3025_p8) target bundleno = 56 (0x38), region = 40  ;;  %282 = vst [vmem:[#allocation2 + $0x20] sm:$0xff] (!%p3025_p8), %v4191_v2  ;;  %285 = vst [vmem:[#allocation2 + $0x38] sm:$0xff] (!%p3025_p8), %v4191_v2  ;;  %v3338_v3 = vunpack.c.l.bf16 (!%p3025_p8), %v3337_v0  ;;  %v3339_v4 = vunpack.c.h.bf16 (!%p3025_p8), %v3337_v0  ;;  %v3441_v6 = vld [vmem:[%s4258_s7 + $0x10] sm:$0xff] (!%p3025_p8)   ;;  %v3442_v7 = vld [vmem:[%s4258_s7 + $0x18] sm:$0xff] (!%p3025_p8)   ;;  %v3342_v9 = vunpack.c.l.bf16 (!%p3025_p8), %v3440_v5  ;;  %v3343_v10 = vunpack.c.h.bf16 (!%p3025_p8), %v3440_v5 }
  0x15   : > { %286 = vst [vmem:[#allocation2 + $0x40] sm:$0xff] (!%p3025_p8), %v4191_v2  ;;  %289 = vst [vmem:[#allocation2 + $0x58] sm:$0xff] (!%p3025_p8), %v4191_v2  ;;  %v3346_v11 = vunpack.c.l.bf16 (!%p3025_p8), %v3441_v6  ;;  %v3347_v12 = vunpack.c.h.bf16 (!%p3025_p8), %v3441_v6  ;;  %v3350_v15 = vunpack.c.l.bf16 (!%p3025_p8), %v3442_v7  ;;  %v3351_v16 = vunpack.c.h.bf16 (!%p3025_p8), %v3442_v7  ;;  %v3443_v29 = vld [vmem:[%s4258_s7 + $0x20] sm:$0xff] (!%p3025_p8)   ;;  %v3444_v34 = vld [vmem:[%s4258_s7 + $0x28] sm:$0xff] (!%p3025_p8)  }
  0x16   : > { %290 = vst [vmem:[#allocation2 + $0x60] sm:$0xff] (!%p3025_p8), %v4191_v2  ;;  %293 = vst [vmem:[#allocation2 + $0x78] sm:$0xff] (!%p3025_p8), %v4191_v2  ;;  %v421_v13 = vmul.f32 (!%p3025_p8), %v3338_v3, %v4275_v1  ;;  %v422_v14 = vmul.f32 (!%p3025_p8), %v3339_v4, %v4275_v1  ;;  %v423_v17 = vmul.f32 (!%p3025_p8), %v3342_v9, %v4275_v1  ;;  %v3445_v35 = vld [vmem:[%s4258_s7 + $0x30] sm:$0xff] (!%p3025_p8)   ;;  %v3446_v40 = vld [vmem:[%s4258_s7 + $0x38] sm:$0xff] (!%p3025_p8)   ;;  %v3354_v43 = vunpack.c.l.bf16 (!%p3025_p8), %v3443_v29 }
  0x17   : > { %294 = vst [vmem:[#allocation2 + $0x80] sm:$0xff] (!%p3025_p8), %v4191_v2  ;;  %297 = vst [vmem:[#allocation2 + $0x98] sm:$0xff] (!%p3025_p8), %v4191_v2  ;;  %v424_v18 = vmul.f32 (!%p3025_p8), %v3343_v10, %v4275_v1  ;;  %v425_v19 = vmul.f32 (!%p3025_p8), %v3346_v11, %v4275_v1  ;;  %v426_v20 = vmul.f32 (!%p3025_p8), %v3347_v12, %v4275_v1  ;;  %v3355_v44 = vunpack.c.h.bf16 (!%p3025_p8), %v3443_v29  ;;  %v3448_v7 = vld [vmem:[%s4258_s7 + $0x48] sm:$0xff] (!%p3025_p8)   ;;  %v3449_v9 = vld [vmem:[%s4258_s7 + $0x50] sm:$0xff] (!%p3025_p8)  }
  0x18   : > { %298 = vst [vmem:[#allocation2 + $0xa0] sm:$0xff] (!%p3025_p8), %v4191_v2  ;;  %301 = vst [vmem:[#allocation2 + $0xb8] sm:$0xff] (!%p3025_p8), %v4191_v2  ;;  %v460_v21 = vadd.f32 (!%p3025_p8), %v4283_v8, %v421_v13  ;;  %v461_v22 = vadd.f32 (!%p3025_p8), %v4283_v8, %v422_v14  ;;  %v427_v23 = vmul.f32 (!%p3025_p8), %v3350_v15, %v4275_v1  ;;  %v3358_v45 = vunpack.c.l.bf16 (!%p3025_p8), %v3444_v34  ;;  %v3450_v14 = vld [vmem:[%s4258_s7 + $0x58] sm:$0xff] (!%p3025_p8)  }
  0x19   : > { %302 = vst [vmem:[#allocation2 + $0xc0] sm:$0xff] (!%p3025_p8), %v4191_v2  ;;  %305 = vst [vmem:[#allocation2 + $0xd8] sm:$0xff] (!%p3025_p8), %v4191_v2  ;;  %v428_v24 = vmul.f32 (!%p3025_p8), %v3351_v16, %v4275_v1  ;;  %v462_v25 = vadd.f32 (!%p3025_p8), %v4283_v8, %v423_v17  ;;  %v463_v26 = vadd.f32 (!%p3025_p8), %v4283_v8, %v424_v18  ;;  %v3359_v46 = vunpack.c.h.bf16 (!%p3025_p8), %v3444_v34 }
  0x1a   : > { %306 = vst [vmem:[#allocation2 + $0xe0] sm:$0xff] (!%p3025_p8), %v4191_v2  ;;  %309 = vst [vmem:[#allocation2 + $0xf8] sm:$0xff] (!%p3025_p8), %v4191_v2  ;;  %v464_v27 = vadd.f32 (!%p3025_p8), %v4283_v8, %v425_v19  ;;  %v465_v28 = vadd.f32 (!%p3025_p8), %v4283_v8, %v426_v20  ;;  %v492_v30 = vmax.f32 (!%p3025_p8), %v460_v21, 0.0  ;;  %v493_v31 = vmax.f32 (!%p3025_p8), %v461_v22, 0.0 }
  0x1b   : > { %310 = vst [vmem:[#allocation2 + $0x100] sm:$0xff] %v4191_v2  ;;  %313 = vst [vmem:[#allocation2 + $0x118] sm:$0xff] %v4191_v2  ;;  %v466_v32 = vadd.f32 %v4283_v8, %v427_v23  ;;  %v467_v33 = vadd.f32 %v4283_v8, %v428_v24  ;;  %v494_v36 = vmax.f32 %v462_v25, 0.0  ;;  %v495_v37 = vmax.f32 %v463_v26, 0.0 }
  0x1c   : > { %314 = vst [vmem:[#allocation2 + $0x120] sm:$0xff] %v4191_v2  ;;  %317 = vst [vmem:[#allocation2 + $0x138] sm:$0xff] %v4191_v2  ;;  %v496_v38 = vmax.f32 %v464_v27, 0.0  ;;  %v497_v39 = vmax.f32 %v465_v28, 0.0  ;;  %v3362_v47 = vunpack.c.l.bf16 %v3445_v35  ;;  %v3363_v48 = vunpack.c.h.bf16 %v3445_v35 }
  0x1d   : > { %318 = vst [vmem:[#allocation2 + $0x140] sm:$0xff] %v4191_v2  ;;  %321 = vst [vmem:[#allocation2 + $0x158] sm:$0xff] %v4191_v2  ;;  %v498_v41 = vmax.f32 %v466_v32, 0.0  ;;  %v499_v42 = vmax.f32 %v467_v33, 0.0  ;;  %v429_v49 = vmul.f32 %v3354_v43, %v4275_v1  ;;  %v430_v50 = vmul.f32 %v3355_v44, %v4275_v1  ;;  %v3452_v44 = vld [vmem:[%s4258_s7 + $0x68] sm:$0xff]  }
  0x1e   : > { %322 = vst [vmem:[#allocation2 + $0x160] sm:$0xff] %v4191_v2  ;;  %325 = vst [vmem:[#allocation2 + $0x178] sm:$0xff] %v4191_v2  ;;  %v3366_v51 = vunpack.c.l.bf16 %v3446_v40  ;;  %v3367_v52 = vunpack.c.h.bf16 %v3446_v40  ;;  %v431_v53 = vmul.f32 %v3358_v45, %v4275_v1  ;;  %v432_v54 = vmul.f32 %v3359_v46, %v4275_v1  ;;  %v3453_v45 = vld [vmem:[%s4258_s7 + $0x70] sm:$0xff]  }
  0x1f   : > { %326 = vst [vmem:[#allocation2 + $0x180] sm:$0xff] %v4191_v2  ;;  %329 = vst [vmem:[#allocation2 + $0x198] sm:$0xff] %v4191_v2  ;;  %v433_v55 = vmul.f32 %v3362_v47, %v4275_v1  ;;  %v434_v56 = vmul.f32 %v3363_v48, %v4275_v1  ;;  %v468_v57 = vadd.f32 %v4283_v8, %v429_v49  ;;  %v3374_v19 = vunpack.c.l.bf16 %v3448_v7 }
  0x20   : > { %330 = vst [vmem:[#allocation2 + $0x1a0] sm:$0xff] %v4191_v2  ;;  %333 = vst [vmem:[#allocation2 + $0x1b8] sm:$0xff] %v4191_v2  ;;  %v469_v58 = vadd.f32 %v4283_v8, %v430_v50  ;;  %v435_v59 = vmul.f32 %v3366_v51, %v4275_v1  ;;  %v436_v60 = vmul.f32 %v3367_v52, %v4275_v1  ;;  %v3375_v20 = vunpack.c.h.bf16 %v3448_v7  ;;  %v3454_v50 = vld [vmem:[%s4258_s7 + $0x78] sm:$0xff]  }
  0x21   : > { %334 = vst [vmem:[#allocation2 + $0x1c0] sm:$0xff] %v4191_v2  ;;  %337 = vst [vmem:[#allocation2 + $0x1d8] sm:$0xff] %v4191_v2  ;;  %v470_v61 = vadd.f32 %v4283_v8, %v431_v53  ;;  %v471_v62 = vadd.f32 %v4283_v8, %v432_v54  ;;  %v472_v63 = vadd.f32 %v4283_v8, %v433_v55  ;;  %v500_v3 = vmax.f32 %v468_v57, 0.0 }
  0x22   : > { %338 = vst [vmem:[#allocation2 + $0x1e0] sm:$0xff] %v4191_v2  ;;  %341 = vst [vmem:[#allocation2 + $0x1f8] sm:$0xff] %v4191_v2  ;;  %v473_v0 = vadd.f32 %v4283_v8, %v434_v56  ;;  %v501_v4 = vmax.f32 %v469_v58, 0.0  ;;  %v474_v5 = vadd.f32 %v4283_v8, %v435_v59  ;;  %v475_v6 = vadd.f32 %v4283_v8, %v436_v60 }
  0x23   : > { %342 = vst [vmem:[#allocation2 + $0x200] sm:$0xff] %v4191_v2  ;;  %345 = vst [vmem:[#allocation2 + $0x218] sm:$0xff] %v4191_v2  ;;  %v502_v10 = vmax.f32 %v470_v61, 0.0  ;;  %v503_v11 = vmax.f32 %v471_v62, 0.0  ;;  %v504_v12 = vmax.f32 %v472_v63, 0.0  ;;  %v3378_v21 = vunpack.c.l.bf16 %v3449_v9 }
  0x24   : > { %346 = vst [vmem:[#allocation2 + $0x220] sm:$0xff] %v4191_v2  ;;  %347 = vst [vmem:[#allocation2 + $0x228] sm:$0xff] %v4191_v2  ;;  %v505_v13 = vmax.f32 %v473_v0, 0.0  ;;  %v506_v15 = vmax.f32 %v474_v5, 0.0  ;;  %v507_v16 = vmax.f32 %v475_v6, 0.0  ;;  %v3379_v22 = vunpack.c.h.bf16 %v3449_v9 }
  0x25   : > { %348 = vst [vmem:[#allocation2 + $0x230] sm:$0xff] %v4191_v2  ;;  %349 = vst [vmem:[#allocation2 + $0x238] sm:$0xff] %v4191_v2  ;;  %v3447_v2 = vld [vmem:[%s4258_s7 + $0x40] sm:$0xff]   ;;  %v3382_v25 = vunpack.c.l.bf16 %v3450_v14  ;;  %v3383_v26 = vunpack.c.h.bf16 %v3450_v14  ;;  %v439_v27 = vmul.f32 %v3374_v19, %v4275_v1  ;;  %v440_v28 = vmul.f32 %v3375_v20, %v4275_v1 }
  0x26   : > { %525 = vst [vmem:[#allocation2 + $0x28] sm:$0xff] %v492_v30  ;;  %526 = vst [vmem:[#allocation2 + $0x30] sm:$0xff] %v493_v31  ;;  %v3370_v17 = vunpack.c.l.bf16 %v3447_v2  ;;  %v3371_v18 = vunpack.c.h.bf16 %v3447_v2  ;;  %v441_v29 = vmul.f32 %v3378_v21, %v4275_v1  ;;  %v442_v30 = vmul.f32 %v3379_v22, %v4275_v1 }
  0x27   : > { %527 = vst [vmem:[#allocation2 + $0x48] sm:$0xff] %v494_v36  ;;  %528 = vst [vmem:[#allocation2 + $0x50] sm:$0xff] %v495_v37  ;;  %v443_v33 = vmul.f32 %v3382_v25, %v4275_v1  ;;  %v444_v34 = vmul.f32 %v3383_v26, %v4275_v1  ;;  %v478_v35 = vadd.f32 %v4283_v8, %v439_v27  ;;  %v3390_v55 = vunpack.c.l.bf16 %v3452_v44 }
  0x28   : > { %529 = vst [vmem:[#allocation2 + $0x68] sm:$0xff] %v496_v38  ;;  %530 = vst [vmem:[#allocation2 + $0x70] sm:$0xff] %v497_v39  ;;  %v437_v23 = vmul.f32 %v3370_v17, %v4275_v1  ;;  %v438_v24 = vmul.f32 %v3371_v18, %v4275_v1  ;;  %v479_v36 = vadd.f32 %v4283_v8, %v440_v28  ;;  %v3451_v39 = vld [vmem:[%s4258_s7 + $0x60] sm:$0xff]   ;;  %v3391_v56 = vunpack.c.h.bf16 %v3452_v44 }
  0x29   : > { %531 = vst [vmem:[#allocation2 + $0x88] sm:$0xff] %v498_v41  ;;  %532 = vst [vmem:[#allocation2 + $0x90] sm:$0xff] %v499_v42  ;;  %v480_v37 = vadd.f32 %v4283_v8, %v441_v29  ;;  %v481_v38 = vadd.f32 %v4283_v8, %v442_v30  ;;  %v482_v42 = vadd.f32 %v4283_v8, %v443_v33  ;;  %v510_v46 = vmax.f32 %v478_v35, 0.0 }
  0x2a   : > { %533 = vst [vmem:[#allocation2 + $0xa8] sm:$0xff] %v500_v3  ;;  %534 = vst [vmem:[#allocation2 + $0xb0] sm:$0xff] %v501_v4  ;;  %v476_v31 = vadd.f32 %v4283_v8, %v437_v23  ;;  %v477_v32 = vadd.f32 %v4283_v8, %v438_v24  ;;  %v483_v43 = vadd.f32 %v4283_v8, %v444_v34  ;;  %v511_v47 = vmax.f32 %v479_v36, 0.0 }
  0x2b   : > { %535 = vst [vmem:[#allocation2 + $0xc8] sm:$0xff] %v502_v10  ;;  %536 = vst [vmem:[#allocation2 + $0xd0] sm:$0xff] %v503_v11  ;;  %v512_v48 = vmax.f32 %v480_v37, 0.0  ;;  %v513_v49 = vmax.f32 %v481_v38, 0.0  ;;  %v514_v51 = vmax.f32 %v482_v42, 0.0  ;;  %v3386_v53 = vunpack.c.l.bf16 %v3451_v39 }
  0x2c   : > { %537 = vst [vmem:[#allocation2 + $0xe8] sm:$0xff] %v504_v12  ;;  %538 = vst [vmem:[#allocation2 + $0xf0] sm:$0xff] %v505_v13  ;;  %v508_v40 = vmax.f32 %v476_v31, 0.0  ;;  %v509_v41 = vmax.f32 %v477_v32, 0.0  ;;  %v515_v52 = vmax.f32 %v483_v43, 0.0  ;;  %v3387_v54 = vunpack.c.h.bf16 %v3451_v39 }
  0x2d   : > { %539 = vst [vmem:[#allocation2 + $0x108] sm:$0xff] %v506_v15  ;;  %540 = vst [vmem:[#allocation2 + $0x110] sm:$0xff] %v507_v16  ;;  %v3394_v57 = vunpack.c.l.bf16 %v3453_v45  ;;  %v3395_v58 = vunpack.c.h.bf16 %v3453_v45  ;;  %v445_v59 = vmul.f32 %v3386_v53, %v4275_v1  ;;  %v3398_v61 = vunpack.c.l.bf16 %v3454_v50 }
  0x2e   : > { %541 = vst [vmem:[#allocation2 + $0x128] sm:$0xff] %v508_v40  ;;  %542 = vst [vmem:[#allocation2 + $0x130] sm:$0xff] %v509_v41  ;;  %v446_v60 = vmul.f32 %v3387_v54, %v4275_v1  ;;  %v3399_v62 = vunpack.c.h.bf16 %v3454_v50  ;;  %v447_v63 = vmul.f32 %v3390_v55, %v4275_v1  ;;  %v448_v0 = vmul.f32 %v3391_v56, %v4275_v1 }
  0x2f   : > { %543 = vst [vmem:[#allocation2 + $0x148] sm:$0xff] %v510_v46  ;;  %544 = vst [vmem:[#allocation2 + $0x150] sm:$0xff] %v511_v47  ;;  %v449_v2 = vmul.f32 %v3394_v57, %v4275_v1  ;;  %v450_v3 = vmul.f32 %v3395_v58, %v4275_v1  ;;  %v484_v4 = vadd.f32 %v4283_v8, %v445_v59 }
  0x30   : > { %545 = vst [vmem:[#allocation2 + $0x168] sm:$0xff] %v512_v48  ;;  %546 = vst [vmem:[#allocation2 + $0x170] sm:$0xff] %v513_v49  ;;  %v485_v5 = vadd.f32 %v4283_v8, %v446_v60  ;;  %v451_v6 = vmul.f32 %v3398_v61, %v4275_v1  ;;  %v452_v7 = vmul.f32 %v3399_v62, %v4275_v1 }
  0x31   : > { %547 = vst [vmem:[#allocation2 + $0x188] sm:$0xff] %v514_v51  ;;  %548 = vst [vmem:[#allocation2 + $0x190] sm:$0xff] %v515_v52  ;;  %v486_v9 = vadd.f32 %v4283_v8, %v447_v63  ;;  %v487_v10 = vadd.f32 %v4283_v8, %v448_v0  ;;  %v488_v11 = vadd.f32 %v4283_v8, %v449_v2  ;;  %v516_v13 = vmax.f32 %v484_v4, 0.0 }
  0x32   : > { %v489_v12 = vadd.f32 %v4283_v8, %v450_v3  ;;  %v517_v14 = vmax.f32 %v485_v5, 0.0  ;;  %v490_v15 = vadd.f32 %v4283_v8, %v451_v6  ;;  %v491_v16 = vadd.f32 %v4283_v8, %v452_v7 }
  0x33   : > { %v518_v17 = vmax.f32 %v486_v9, 0.0  ;;  %v519_v18 = vmax.f32 %v487_v10, 0.0  ;;  %v520_v19 = vmax.f32 %v488_v11, 0.0  ;;  %549 = vst [vmem:[#allocation2 + $0x1a8] sm:$0xff] %v516_v13 }
  0x34   : > { %v521_v20 = vmax.f32 %v489_v12, 0.0  ;;  %550 = vst [vmem:[#allocation2 + $0x1b0] sm:$0xff] %v517_v14  ;;  %v522_v1 = vmax.f32 %v490_v15, 0.0  ;;  %v523_v21 = vmax.f32 %v491_v16, 0.0 }
  0x35   : > { %551 = vst [vmem:[#allocation2 + $0x1c8] sm:$0xff] %v518_v17  ;;  %552 = vst [vmem:[#allocation2 + $0x1d0] sm:$0xff] %v519_v18 }
  0x36   : > { %553 = vst [vmem:[#allocation2 + $0x1e8] sm:$0xff] %v520_v19  ;;  %554 = vst [vmem:[#allocation2 + $0x1f0] sm:$0xff] %v521_v20 }
  0x37   : > { %555 = vst [vmem:[#allocation2 + $0x208] sm:$0xff] %v522_v1  ;;  %556 = vst [vmem:[#allocation2 + $0x210] sm:$0xff] %v523_v21 }
  0x38 PF: > { %v4079_v22 = vld [vmem:[%s4988_s3 + $0x40] sm:$0xff]   ;;  %v4081_v23 = vld [vmem:[%s4988_s3 + $0x48] sm:$0xff]   ;;  %v4083_v25 = vld [vmem:[%s4988_s3 + $0x50] sm:$0xff]   ;;  %s3317_s25 = sshll.u32 %s4173_s18, 8  ;;  %vm1020_vm0 = vcmask 1046528   ;;  %vm616_vm1 = vcmask 1040384  }
  0x39   : > { %v4080_v8 = vld [vmem:[%s4988_s3 + $0x100] sm:$0xff]   ;;  %3606 = vmatprep.subr.bf16.mxu1 %v4079_v22  ;;  %v4082_v24 = vld [vmem:[%s4988_s3 + $0x108] sm:$0xff]   ;;  %v4084_v26 = vld [vmem:[%s4988_s3 + $0x110] sm:$0xff]   ;;  %s4395_s18 = scalar_lea.vmem [#allocation2], %s3317_s25 }
  0x3a   : > { %3734 = vmatprep.subr.bf16.mxu0 %v4080_v8  ;;  %3607 = vmatpush3.bf16.msra.mxu1 %v4079_v22  ;;  %v4085_v27 = vld [vmem:[%s4988_s3 + $0x58] sm:$0xff]   ;;  %v4087_v29 = vld [vmem:[%s4988_s3 + $0x60] sm:$0xff]   ;;  %v4089_v31 = vld [vmem:[%s4988_s3 + $0x68] sm:$0xff]  }
  0x3b   : > { %3735 = vmatpush3.bf16.msra.mxu0 %v4080_v8  ;;  %3608 = vmatprep.subr.bf16.mxu1 %v4081_v23  ;;  %v4086_v28 = vld [vmem:[%s4988_s3 + $0x118] sm:$0xff]   ;;  %v4088_v30 = vld [vmem:[%s4988_s3 + $0x120] sm:$0xff]   ;;  %v4090_v35 = vld [vmem:[%s4988_s3 + $0x128] sm:$0xff]  }
  0x3c   : > { %3736 = vmatprep.subr.bf16.mxu0 %v4082_v24  ;;  %v4091_v41 = vld [vmem:[%s4988_s3 + $0x70] sm:$0xff]   ;;  %v4093_v47 = vld [vmem:[%s4988_s3 + $0x78] sm:$0xff]   ;;  %v4095_v52 = vld [vmem:[%s4988_s3] sm:$0xff]  }
  0x3d   : > { %v4092_v42 = vld [vmem:[%s4988_s3 + $0x130] sm:$0xff]   ;;  %v4094_v50 = vld [vmem:[%s4988_s3 + $0x138] sm:$0xff]   ;;  %v4096_v55 = vld [vmem:[%s4988_s3 + $0x140] sm:$0xff]  }
  0x3e   : > { %3609 = vmatpush3.bf16.msra.mxu1 %v4081_v23  ;;  %v4398_v32 = vld [vmem:[%s4395_s18 + $0x8] sm:$0xff]  ;;  %v4401_v33 = vld [vmem:[%s4395_s18 + $0x10] sm:$0xff]  ;;  %v4101_v10 = vld [vmem:[%s4988_s3 + $0x18] sm:$0xff]  }
  0x3f   : > { %3737 = vmatpush3.bf16.msra.mxu0 %v4082_v24  ;;  %3610 = vmatprep.subr.bf16.mxu1 %v4083_v25  ;;  %v4404_v34 = vld [vmem:[%s4395_s18 + $0x28] sm:$0xff]  ;;  %v697_v36 = vpack.c.bf16 %v4401_v33, %v4398_v32  ;;  %v1021_v37 = vrot.slane %v4398_v32, 1  ;;  %v4413_v38 = vld [vmem:[%s4395_s18 + $0x30] sm:$0xff]  ;;  %v1022_v39 = vrot.slane %v4401_v33, 1  ;;  %v4102_v12 = vld [vmem:[%s4988_s3 + $0x158] sm:$0xff]   ;;  %v618_v15 = vrot.slane %v4398_v32, 7 }
  0x40   : > { %3738 = vmatprep.subr.bf16.mxu0 %v4084_v26  ;;  %v1564_v40 = vpack.c.bf16 %v4413_v38, %v4404_v34  ;;  %v4425_v43 = vld [vmem:[%s4395_s18 + $0x48] sm:$0xff]  ;;  %v4428_v44 = vld [vmem:[%s4395_s18 + $0x50] sm:$0xff]  ;;  %v620_v16 = vrot.slane %v4401_v33, 7  ;;  %v4103_v17 = vld [vmem:[%s4988_s3 + $0x20] sm:$0xff]   ;;  %v1323_v24 = vrot.slane %v4404_v34, 7 }
  0x41   : > { %3622 = vmatprep.mubr.bf16.mxu1 %v697_v36  ;;  %v4433_v45 = vsel %vm1020_vm0, %v1021_v37, %v1022_v39  ;;  %v4437_v46 = vpack.c.bf16 %v4428_v44, %v4425_v43  ;;  %v4443_v48 = vld [vmem:[%s4395_s18 + $0x68] sm:$0xff]  ;;  %v4446_v49 = vld [vmem:[%s4395_s18 + $0x70] sm:$0xff]  ;;  %v2495_v61 = vrot.slane %v4425_v43, 1  ;;  %v2496_v62 = vrot.slane %v4428_v44, 1  ;;  %v3095_v19 = vld [vmem:[%s4395_s18 + $0x58] sm:$0xff] }
  0x42   : > { %3611 = vmatpush3.bf16.msra.mxu1 %v4083_v25  ;;  %3750 = vmatprep.mubr.bf16.mxu0 %v1564_v40  ;;  %v4453_v51 = vpack.c.bf16 %v4446_v49, %v4443_v48  ;;  %v4459_v53 = vld [vmem:[%s4395_s18 + $0x88] sm:$0xff]  ;;  %v4462_v54 = vld [vmem:[%s4395_s18 + $0x90] sm:$0xff]  ;;  %v2500_v11 = vrot.slane %v4443_v48, 1  ;;  %v2501_v14 = vrot.slane %v4446_v49, 1  ;;  %v1766_v22 = vrot.slane %v3095_v19, 1  ;;  %v4104_v8 = vld [vmem:[%s4988_s3 + $0x160] sm:$0xff]  }
  0x43   : > { %3739 = vmatpush3.bf16.msra.mxu0 %v4084_v26  ;;  %3612 = vmatprep.subr.bf16.mxu1 %v4085_v27  ;;  %v4469_v56 = vpack.c.bf16 %v4462_v54, %v4459_v53  ;;  %v4472_v57 = vld [vmem:[%s4395_s18 + $0xa8] sm:$0xff]  ;;  %v4475_v58 = vld [vmem:[%s4395_s18 + $0xb0] sm:$0xff]  ;;  %v2497_v4 = vsel %vm1020_vm0, %v2495_v61, %v2496_v62  ;;  %v2505_v18 = vrot.slane %v4459_v53, 1  ;;  %v2506_v1 = vrot.slane %v4462_v54, 1  ;;  %v560_v37 = vld [vmem:[%s4395_s18] sm:$0xff] }
  0x44   : > { %3740 = vmatprep.subr.bf16.mxu0 %v4086_v28  ;;  %v4097_v59 = vld [vmem:[%s4988_s3 + $0x8] sm:$0xff]   ;;  %v4482_v60 = vpack.c.bf16 %v4475_v58, %v4472_v57  ;;  %v4493_v2 = vld [vmem:[%s4395_s18 + $0xd0] sm:$0xff]  ;;  %v4536_v20 = vsel %vm1020_vm0, %v2500_v11, %v2501_v14  ;;  %v1325_v25 = vrot.slane %v4413_v38, 7  ;;  %v2511_v11 = vrot.slane %v4475_v58, 1 }
  0x45   : > { %v4098_v63 = vld [vmem:[%s4988_s3 + $0x148] sm:$0xff]   ;;  %v4099_v5 = vld [vmem:[%s4988_s3 + $0x10] sm:$0xff]   ;;  %v2516_v9 = vrot.slane %v4493_v2, 1  ;;  %v621_v19 = vsel %vm616_vm1, %v618_v15, %v620_v16 }
  0x46   : > { %3613 = vmatpush3.bf16.msra.mxu1 %v4085_v27  ;;  %v4490_v0 = vld [vmem:[%s4395_s18 + $0xc8] sm:$0xff]  ;;  %v4100_v6 = vld [vmem:[%s4988_s3 + $0x150] sm:$0xff]  }
  0x47   : > { %3741 = vmatpush3.bf16.msra.mxu0 %v4086_v28  ;;  %3614 = vmatprep.subr.bf16.mxu1 %v4087_v29  ;;  %v4497_v3 = vpack.c.bf16 %v4493_v2, %v4490_v0  ;;  %v2515_v7 = vrot.slane %v4490_v0, 1  ;;  %v4540_v21 = vld [vmem:[%s4395_s18 + $0x108] sm:$0xff]  ;;  %v4557_v28 = vld [vmem:[%s4395_s18 + $0x110] sm:$0xff] }
  0x48   : > { %3742 = vmatprep.subr.bf16.mxu0 %v4088_v30  ;;  %v2525_v23 = vrot.slane %v4540_v21, 1  ;;  %v4105_v26 = vld [vmem:[%s4988_s3 + $0x28] sm:$0xff]   ;;  %v4568_v36 = vld [vmem:[%s4395_s18 + $0xf0] sm:$0xff]  ;;  %v4621_v16 = vpack.c.bf16 %v4557_v28, %v4540_v21 }
  0x49   : > { %v4521_v13 = vsel %vm1020_vm0, %v2515_v7, %v2516_v9  ;;  %v4554_v27 = vld [vmem:[%s4395_s18 + $0xe8] sm:$0xff]  ;;  %v4115_v33 = vld [vmem:[%s4988_s3 + $0x90] sm:$0xff]  }
  0x4a   : > { %3615 = vmatpush3.bf16.msra.mxu1 %v4087_v29  ;;  %v2499_v29 = vsel %vm1020_vm0, %v2496_v62, %v1766_v22  ;;  %v617_v62 = vrot.slane %v560_v37, 7  ;;  %v568_v22 = vld [vmem:[%s4395_s18 + $0x40] sm:$0xff] }
  0x4b   : > { %3743 = vmatpush3.bf16.msra.mxu0 %v4088_v30  ;;  %3616 = vmatprep.subr.bf16.mxu1 %v4089_v31  ;;  %v4561_v30 = vsel %vm1020_vm0, %v2505_v18, %v2506_v1  ;;  %v4108_v18 = vld [vmem:[%s4988_s3 + $0x170] sm:$0xff]  }
  0x4c   : > { %3744 = vmatprep.subr.bf16.mxu0 %v4090_v35 }
  0x4e   : > { %3617 = vmatpush3.bf16.msra.mxu1 %v4089_v31  ;;  %v1758_v31 = vrot.slane %v4404_v34, 1 }
  0x4f   : > { %3745 = vmatpush3.bf16.msra.mxu0 %v4090_v35  ;;  %3618 = vmatprep.subr.bf16.mxu1 %v4091_v41  ;;  %v4106_v35 = vld [vmem:[%s4988_s3 + $0x168] sm:$0xff]  }
  0x50   : > { %3746 = vmatprep.subr.bf16.mxu0 %v4092_v42 }
  0x52   : > { %3619 = vmatpush3.bf16.msra.mxu1 %v4091_v41  ;;  %v2526_v41 = vrot.slane %v4557_v28, 1 }
  0x53   : > { %3747 = vmatpush3.bf16.msra.mxu0 %v4092_v42  ;;  %3620 = vmatprep.subr.bf16.mxu1 %v4093_v47  ;;  %v1759_v42 = vrot.slane %v4413_v38, 1  ;;  %v4588_v38 = vpack.c.bf16 %v4568_v36, %v4554_v27 }
  0x54   : > { %3748 = vmatprep.subr.bf16.mxu0 %v4094_v50  ;;  %v4583_v61 = vsel %vm1020_vm0, %v2525_v23, %v2526_v41  ;;  %v3111_v23 = vld [vmem:[%s4395_s18 + $0xd8] sm:$0xff] }
  0x56   : > { %3621 = vmatpush3.bf16.msra.mxu1 %v4093_v47  ;;  %v1328_v47 = vrot.slane %v4425_v43, 7  ;;  %v1343_v43 = vrot.slane %v4472_v57, 7 }
  0x57   : > { %3749 = vmatpush3.bf16.msra.mxu0 %v4094_v50  ;;  %3638 = vmatprep.subr.bf16.mxu1 %v4095_v52  ;;  %v3091_v50 = vld [vmem:[%s4395_s18 + $0x38] sm:$0xff] }
  0x58   : > { %3766 = vmatprep.subr.bf16.mxu0 %v4096_v55 }
  0x59   : > { %3623 = vmatmul.mubr.bf16.vlgmr.msra.gmra.mrb[0].mxu1 %v1564_v40  ;;  %v4571_v40 = vpack.c.bf16 %v2499_v29, %v2497_v4  ;;  %v2510_v4 = vrot.slane %v4472_v57, 1 }
  0x5a   : > { %3751 = vmatmul.mubr.bf16.vlgmr.msra.gmra.mrb[0].mxu0 %v4437_v46  ;;  %3639 = vmatpush3.bf16.msra.mxu1 %v4095_v52  ;;  %v3099_v52 = vld [vmem:[%s4395_s18 + $0x78] sm:$0xff] }
  0x5b   : > { %3767 = vmatpush3.bf16.msra.mxu0 %v4096_v55  ;;  %3640 = vmatprep.subr.bf16.mxu1 %v4097_v59  ;;  %v1330_v55 = vrot.slane %v4428_v44, 7  ;;  %v1771_v7 = vrot.slane %v3099_v52, 1  ;;  %v1760_v52 = vsel %vm1020_vm0, %v1758_v31, %v1759_v42  ;;  %v4110_v31 = vld [vmem:[%s4988_s3 + $0x178] sm:$0xff]  }
  0x5c   : > { %3768 = vmatprep.subr.bf16.mxu0 %v4098_v63  ;;  %3626 = vmatprep.mubr.bf16.mxu1 %v4437_v46 }
  0x5d   : > { %3754 = vmatprep.mubr.bf16.mxu0 %v4453_v51  ;;  %v2504_v29 = vsel %vm1020_vm0, %v2501_v14, %v1771_v7  ;;  %v4109_v14 = vld [vmem:[%s4988_s3 + $0x38] sm:$0xff]  }
  0x5e   : > { %3641 = vmatpush3.bf16.msra.mxu1 %v4097_v59  ;;  %v3103_v59 = vld [vmem:[%s4395_s18 + $0x98] sm:$0xff] }
  0x5f   : > { %3769 = vmatpush3.bf16.msra.mxu0 %v4098_v63  ;;  %3642 = vmatprep.subr.bf16.mxu1 %v4099_v5  ;;  %v1761_v63 = vrot.slane %v3091_v50, 1  ;;  %v2512_v50 = vsel %vm1020_vm0, %v2510_v4, %v2511_v11 }
  0x60   : > { %3770 = vmatprep.subr.bf16.mxu0 %v4100_v6 }
  0x61   : > { %3627 = vmatmul.mubr.bf16.gmra.mrb[4].mxu1 %v4453_v51  ;;  %v1762_v32 = vsel %vm1020_vm0, %v1759_v42, %v1761_v63  ;;  %v627_v63 = vrot.slane %v568_v22, 7 }
  0x62   : > { %3755 = vmatmul.mubr.bf16.gmra.mrb[4].mxu0 %v4469_v56  ;;  %3643 = vmatpush3.bf16.msra.mxu1 %v4099_v5  ;;  %v4107_v5 = vld [vmem:[%s4988_s3 + $0x30] sm:$0xff]  }
  0x63   : > { %3771 = vmatpush3.bf16.msra.mxu0 %v4100_v6  ;;  %3644 = vmatprep.subr.bf16.mxu1 %v4101_v10  ;;  %v564_v6 = vld [vmem:[%s4395_s18 + $0x20] sm:$0xff] }
  0x64   : > { %3772 = vmatprep.subr.bf16.mxu0 %v4102_v12  ;;  %3630 = vmatprep.mubr.bf16.mxu1 %v4469_v56 }
  0x65   : > { %3758 = vmatprep.mubr.bf16.mxu0 %v4482_v60 }
  0x66   : > { %3645 = vmatpush3.bf16.msra.mxu1 %v4101_v10  ;;  %v1776_v10 = vrot.slane %v3103_v59, 1  ;;  %v622_v59 = vrot.slane %v564_v6, 7  ;;  %v1340_v6 = vrot.slane %v4462_v54, 7  ;;  %v572_v54 = vld [vmem:[%s4395_s18 + $0x60] sm:$0xff] }
  0x67   : > { %3773 = vmatpush3.bf16.msra.mxu0 %v4102_v12  ;;  %3646 = vmatprep.subr.bf16.mxu1 %v4103_v17  ;;  %v1333_v12 = vrot.slane %v4443_v48, 7  ;;  %v4116_v48 = vld [vmem:[%s4988_s3 + $0x190] sm:$0xff]  }
  0x68   : > { %3774 = vmatprep.subr.bf16.mxu0 %v4104_v8  ;;  %v2509_v37 = vsel %vm1020_vm0, %v2506_v1, %v1776_v10  ;;  %v626_v1 = vsel %vm616_vm1, %v1323_v24, %v1325_v25  ;;  %v624_v7 = vsel %vm616_vm1, %v622_v59, %v1323_v24  ;;  %v4111_v10 = vld [vmem:[%s4988_s3 + $0x80] sm:$0xff]  }
  0x69   : > { %3631 = vmatmul.mubr.bf16.gmra.mrb[8].mxu1 %v4482_v60  ;;  %v4659_v34 = vpack.c.bf16 %v2509_v37, %v4561_v30  ;;  %v631_v30 = vsel %vm616_vm1, %v1328_v47, %v1330_v55 }
  0x6a   : > { %3759 = vmatmul.mubr.bf16.gmra.mrb[8].mxu0 %v4497_v3  ;;  %3647 = vmatpush3.bf16.msra.mxu1 %v4103_v17  ;;  %v1335_v17 = vrot.slane %v4446_v49, 7  ;;  %v1348_v49 = vrot.slane %v4490_v0, 7 }
  0x6b   : > { %3775 = vmatpush3.bf16.msra.mxu0 %v4104_v8  ;;  %3648 = vmatprep.subr.bf16.mxu1 %v4105_v26  ;;  %v619_v8 = vsel %vm616_vm1, %v617_v62, %v618_v15  ;;  %v3107_v15 = vld [vmem:[%s4395_s18 + $0xb8] sm:$0xff]  ;;  %v1338_v62 = vrot.slane %v4459_v53, 7 }
  0x6c   : > { %3776 = vmatprep.subr.bf16.mxu0 %v4106_v35  ;;  %3634 = vmatprep.mubr.bf16.mxu1 %v4497_v3  ;;  %v673_v42 = vpack.c.bf16 %v621_v19, %v619_v8  ;;  %v1781_v4 = vrot.slane %v3107_v15, 1  ;;  %v3119_v19 = vld [vmem:[%s4395_s18 + $0x118] sm:$0xff]  ;;  %v632_v8 = vrot.slane %v572_v54, 7  ;;  %v580_v15 = vld [vmem:[%s4395_s18 + $0xa0] sm:$0xff]  ;;  %v1355_v54 = vrot.slane %v4568_v36, 7 }
  0x6d   : > { %3762 = vmatprep.mubr.bf16.mxu0 %v4588_v38  ;;  %v641_v0 = vsel %vm616_vm1, %v1338_v62, %v1340_v6 }
  0x6e   : > { %3649 = vmatpush3.bf16.msra.mxu1 %v4105_v26  ;;  %v1786_v26 = vrot.slane %v3111_v23, 1  ;;  %v2514_v24 = vsel %vm1020_vm0, %v2511_v11, %v1781_v4  ;;  %v576_v11 = vld [vmem:[%s4395_s18 + $0x80] sm:$0xff]  ;;  %v563_v23 = vld [vmem:[%s4395_s18 + $0x18] sm:$0xff]  ;;  %v634_v57 = vsel %vm616_vm1, %v632_v8, %v1333_v12  ;;  %v1788_v4 = vrot.slane %v4554_v27, 1  ;;  %v4122_v8 = vld [vmem:[%s4988_s3 + $0x1a8] sm:$0xff]  }
  0x6f   : > { %3777 = vmatpush3.bf16.msra.mxu0 %v4106_v35  ;;  %3650 = vmatprep.subr.bf16.mxu1 %v4107_v5  ;;  %v4637_v35 = vpack.c.bf16 %v1762_v32, %v1760_v52  ;;  %v1024_v37 = vrot.slane %v563_v23, 1  ;;  %v4684_v52 = vpack.c.bf16 %v2514_v24, %v2512_v50  ;;  %v637_v59 = vrot.slane %v576_v11, 7  ;;  %v4120_v24 = vld [vmem:[%s4988_s3 + $0x1a0] sm:$0xff]  }
  0x70   : > { %3778 = vmatprep.subr.bf16.mxu0 %v4108_v18  ;;  %v2519_v25 = vsel %vm1020_vm0, %v2516_v9, %v1786_v26  ;;  %v4655_v9 = vpack.c.bf16 %v2504_v29, %v4536_v20  ;;  %v629_v20 = vsel %vm616_vm1, %v627_v63, %v1328_v47  ;;  %v4113_v29 = vld [vmem:[%s4988_s3 + $0x88] sm:$0xff]   ;;  %v1345_v50 = vrot.slane %v4475_v58, 7  ;;  %v4117_v58 = vld [vmem:[%s4988_s3 + $0x98] sm:$0xff]  }
  0x71   : > { %3635 = vmatmul.mubr.bf16.gmra.mrb[12].mxu1 %v4588_v38  ;;  %v4652_v22 = vpack.c.bf16 %v2519_v25, %v4521_v13  ;;  %v4666_v13 = vpack.c.bf16 %v626_v1, %v624_v7  ;;  %v4114_v47 = vld [vmem:[%s4988_s3 + $0x188] sm:$0xff]   ;;  %v4690_v55 = vpack.c.bf16 %v631_v30, %v629_v20  ;;  %v584_v1 = vld [vmem:[%s4395_s18 + $0xc0] sm:$0xff]  ;;  %v3115_v26 = vld [vmem:[%s4395_s18 + $0xf8] sm:$0xff]  ;;  %v1789_v25 = vrot.slane %v4568_v36, 1 }
  0x72   : > { %3763 = vmatmul.mubr.bf16.gmra.mrb[12].mxu0 %v4621_v16  ;;  %3651 = vmatpush3.bf16.msra.mxu1 %v4107_v5  ;;  %v4112_v5 = vld [vmem:[%s4988_s3 + $0x180] sm:$0xff]   ;;  %v646_v53 = vsel %vm616_vm1, %v1343_v43, %v1345_v50  ;;  %v1791_v6 = vrot.slane %v3115_v26, 1  ;;  %v4843_v26 = vld [vmem:[%s4395_s18 + $0x128] sm:$0xff] }
  0x73   : > { %3779 = vmatpush3.bf16.msra.mxu0 %v4108_v18  ;;  %3652 = vmatprep.subr.bf16.mxu1 %v4109_v14  ;;  %v1796_v18 = vrot.slane %v3119_v19, 1  ;;  %v588_v7 = vld [vmem:[%s4395_s18 + $0xe0] sm:$0xff]  ;;  %v1353_v19 = vrot.slane %v4554_v27, 7  ;;  %v1790_v27 = vsel %vm1020_vm0, %v1788_v4, %v1789_v25  ;;  %v2095_v4 = vrot.slane %v4843_v26, 7 }
  0x74   : > { %3780 = vmatprep.subr.bf16.mxu0 %v4110_v31  ;;  %3654 = vmatprep.mubr.bf16.mxu1 %v673_v42  ;;  %v4118_v42 = vld [vmem:[%s4988_s3 + $0x198] sm:$0xff]   ;;  %v652_v11 = vrot.slane %v588_v7, 7  ;;  %v1792_v36 = vsel %vm1020_vm0, %v1789_v25, %v1791_v6  ;;  %v4128_v50 = vld [vmem:[%s4988_s3 + $0x1c0] sm:$0xff]   ;;  %v4139_v7 = vld [vmem:[%s4988_s3 + $0xf0] sm:$0xff]  }
  0x75   : > { %3782 = vmatprep.mubr.bf16.mxu0 %v4637_v35  ;;  %v2529_v44 = vsel %vm1020_vm0, %v2526_v41, %v1796_v18  ;;  %v4699_v41 = vsel %vm1020_vm0, %v1022_v39, %v1024_v37  ;;  %v4121_v18 = vld [vmem:[%s4988_s3 + $0xa8] sm:$0xff]  }
  0x76   : > { %3653 = vmatpush3.bf16.msra.mxu1 %v4109_v14  ;;  %v4693_v32 = vpack.c.bf16 %v2529_v44, %v4583_v61  ;;  %v636_v61 = vsel %vm616_vm1, %v1333_v12, %v1335_v17  ;;  %v1077_v39 = vpack.c.bf16 %v4699_v41, %v4433_v45  ;;  %v639_v17 = vsel %vm616_vm1, %v637_v59, %v1338_v62  ;;  %v4130_v45 = vld [vmem:[%s4988_s3 + $0x1c8] sm:$0xff]   ;;  %v4131_v41 = vld [vmem:[%s4988_s3 + $0xd0] sm:$0xff]  }
  0x77   : > { %3781 = vmatpush3.bf16.msra.mxu0 %v4110_v31  ;;  %3670 = vmatprep.subr.bf16.mxu1 %v4111_v10  ;;  %v4723_v12 = vpack.c.bf16 %v636_v61, %v634_v57  ;;  %v642_v14 = vrot.slane %v580_v15, 7  ;;  %v1350_v31 = vrot.slane %v4493_v2, 7  ;;  %v4740_v63 = vpack.c.bf16 %v641_v0, %v639_v17  ;;  %v4125_v57 = vld [vmem:[%s4988_s3 + $0xb8] sm:$0xff]   ;;  %v4129_v15 = vld [vmem:[%s4988_s3 + $0xc8] sm:$0xff]  }
  0x78   : > { %3798 = vmatprep.subr.bf16.mxu0 %v4112_v5  ;;  %v647_v62 = vrot.slane %v584_v1, 7  ;;  %v654_v37 = vsel %vm616_vm1, %v652_v11, %v1353_v19  ;;  %v656_v44 = vsel %vm616_vm1, %v1353_v19, %v1355_v54  ;;  %v4126_v61 = vld [vmem:[%s4988_s3 + $0x1b8] sm:$0xff]   ;;  %v1360_v17 = vrot.slane %v4557_v28, 7  ;;  %v4136_v1 = vld [vmem:[%s4988_s3 + $0x1e0] sm:$0xff]   ;;  %v4846_v28 = vld [vmem:[%s4395_s18 + $0x130] sm:$0xff] }
  0x79   : > { %3655 = vmatmul.mubr.bf16.vlgmr.msra.gmra.mrb[0].mxu1 %v4666_v13  ;;  %v644_v2 = vsel %vm616_vm1, %v642_v14, %v1343_v43  ;;  %v4123_v43 = vld [vmem:[%s4988_s3 + $0xb0] sm:$0xff]   ;;  %v4787_v59 = vpack.c.bf16 %v656_v44, %v654_v37  ;;  %v4135_v14 = vld [vmem:[%s4988_s3 + $0xe0] sm:$0xff]   ;;  %v2097_v25 = vrot.slane %v4846_v28, 7 }
  0x7a   : > { %3783 = vmatmul.mubr.bf16.vlgmr.msra.gmra.mrb[0].mxu0 %v4571_v40  ;;  %3671 = vmatpush3.bf16.msra.mxu1 %v4111_v10  ;;  %v4119_v10 = vld [vmem:[%s4988_s3 + $0xa0] sm:$0xff]   ;;  %v4760_v20 = vpack.c.bf16 %v646_v53, %v644_v2  ;;  %v649_v30 = vsel %vm616_vm1, %v647_v62, %v1348_v49  ;;  %v4137_v53 = vld [vmem:[%s4988_s3 + $0xe8] sm:$0xff]   ;;  %v4140_v54 = vld [vmem:[%s4988_s3 + $0x1f0] sm:$0xff]  }
  0x7b   : > { %3799 = vmatpush3.bf16.msra.mxu0 %v4112_v5  ;;  %3672 = vmatprep.subr.bf16.mxu1 %v4113_v29  ;;  %v651_v5 = vsel %vm616_vm1, %v1348_v49, %v1350_v31  ;;  %v3218_v49 = vld [vmem:[%s4395_s18 + $0x100] sm:$0xff]  ;;  %v4138_v2 = vld [vmem:[%s4988_s3 + $0x1e8] sm:$0xff]   ;;  %v2098_v19 = vsel %vm616_vm1, %v2095_v4, %v2097_v25 }
  0x7c   : > { %3800 = vmatprep.subr.bf16.mxu0 %v4114_v47  ;;  %3658 = vmatprep.mubr.bf16.mxu1 %v4690_v55  ;;  %v4771_v23 = vpack.c.bf16 %v651_v5, %v649_v30  ;;  %v2089_v0 = vrot.slane %v3218_v49, 7  ;;  %v4141_v5 = vld [vmem:[%s4988_s3 + $0xf8] sm:$0xff]   ;;  %v4143_v11 = vld [vmem:[%s4988_s3 + $0x200] sm:$0xff]  }
  0x7d   : > { %3786 = vmatprep.mubr.bf16.mxu0 %v4655_v9  ;;  %v4142_v30 = vld [vmem:[%s4988_s3 + $0x1f8] sm:$0xff]  }
  0x7e   : > { %3673 = vmatpush3.bf16.msra.mxu1 %v4113_v29  ;;  %v4774_v29 = vpack.c.bf16 %v1792_v36, %v1790_v27  ;;  %v4144_v27 = vld [vmem:[%s4988_s3 + $0x208] sm:$0xff]  }
  0x7f   : > { %3801 = vmatpush3.bf16.msra.mxu0 %v4114_v47  ;;  %3674 = vmatprep.subr.bf16.mxu1 %v4115_v33  ;;  %v4124_v47 = vld [vmem:[%s4988_s3 + $0x1b0] sm:$0xff]  }
  0x80   : > { %3802 = vmatprep.subr.bf16.mxu0 %v4116_v48 }
  0x81   : > { %3659 = vmatmul.mubr.bf16.gmra.mrb[4].mxu1 %v4723_v12 }
  0x82   : > { %3787 = vmatmul.mubr.bf16.gmra.mrb[4].mxu0 %v4659_v34  ;;  %3675 = vmatpush3.bf16.msra.mxu1 %v4115_v33  ;;  %v4127_v33 = vld [vmem:[%s4988_s3 + $0xc0] sm:$0xff]  }
  0x83   : > { %3803 = vmatpush3.bf16.msra.mxu0 %v4116_v48  ;;  %3676 = vmatprep.subr.bf16.mxu1 %v4117_v58  ;;  %v4134_v48 = vld [vmem:[%s4988_s3 + $0x1d8] sm:$0xff]  }
  0x84   : > { %3804 = vmatprep.subr.bf16.mxu0 %v4118_v42  ;;  %3662 = vmatprep.mubr.bf16.mxu1 %v4740_v63 }
  0x85   : > { %3790 = vmatprep.mubr.bf16.mxu0 %v4684_v52 }
  0x86   : > { %3677 = vmatpush3.bf16.msra.mxu1 %v4117_v58  ;;  %v1358_v58 = vrot.slane %v4540_v21, 7  ;;  %v3222_v21 = vld [vmem:[%s4395_s18 + $0x120] sm:$0xff] }
  0x87   : > { %3805 = vmatpush3.bf16.msra.mxu0 %v4118_v42  ;;  %3678 = vmatprep.subr.bf16.mxu1 %v4119_v10  ;;  %v2094_v62 = vrot.slane %v3222_v21, 7 }
  0x88   : > { %3806 = vmatprep.subr.bf16.mxu0 %v4120_v24  ;;  %v2091_v31 = vsel %vm616_vm1, %v2089_v0, %v1358_v58  ;;  %v2093_v42 = vsel %vm616_vm1, %v1358_v58, %v1360_v17 }
  0x89   : > { %3663 = vmatmul.mubr.bf16.gmra.mrb[8].mxu1 %v4760_v20  ;;  %v4860_v6 = vpack.c.bf16 %v2093_v42, %v2091_v31 }
  0x8a   : > { %3791 = vmatmul.mubr.bf16.gmra.mrb[8].mxu0 %v4652_v22  ;;  %3679 = vmatpush3.bf16.msra.mxu1 %v4119_v10  ;;  %v2096_v10 = vsel %vm616_vm1, %v2094_v62, %v2095_v4 }
  0x8b   : > { %3807 = vmatpush3.bf16.msra.mxu0 %v4120_v24  ;;  %3680 = vmatprep.subr.bf16.mxu1 %v4121_v18  ;;  %v2122_v24 = vpack.c.bf16 %v2098_v19, %v2096_v10 }
  0x8c   : > { %3808 = vmatprep.subr.bf16.mxu0 %v4122_v8  ;;  %3666 = vmatprep.mubr.bf16.mxu1 %v4771_v23 }
  0x8d   : > { %3794 = vmatprep.mubr.bf16.mxu0 %v4774_v29 }
  0x8e   : > { %3681 = vmatpush3.bf16.msra.mxu1 %v4121_v18 }
  0x8f   : > { %3809 = vmatpush3.bf16.msra.mxu0 %v4122_v8  ;;  %3682 = vmatprep.subr.bf16.mxu1 %v4123_v43 }
  0x90   : > { %3810 = vmatprep.subr.bf16.mxu0 %v4124_v47 }
  0x91   : > { %3667 = vmatmul.mubr.bf16.gmra.mrb[12].mxu1 %v4787_v59 }
  0x92   : > { %3795 = vmatmul.mubr.bf16.gmra.mrb[12].mxu0 %v4693_v32  ;;  %3683 = vmatpush3.bf16.msra.mxu1 %v4123_v43 }
  0x93   : > { %3811 = vmatpush3.bf16.msra.mxu0 %v4124_v47  ;;  %3684 = vmatprep.subr.bf16.mxu1 %v4125_v57 }
  0x94   : > { %3812 = vmatprep.subr.bf16.mxu0 %v4126_v61  ;;  %3686 = vmatprep.mubr.bf16.mxu1 %v1077_v39  ;;  %v4132_v39 = vld [vmem:[%s4988_s3 + $0x1d0] sm:$0xff]  }
  0x95   : > { %3814 = vmatprep.mubr.bf16.mxu0 %v4690_v55 }
  0x96   : > { %3685 = vmatpush3.bf16.msra.mxu1 %v4125_v57 }
  0x97   : > { %3813 = vmatpush3.bf16.msra.mxu0 %v4126_v61  ;;  %3702 = vmatprep.subr.bf16.mxu1 %v4127_v33 }
  0x98   : > { %3830 = vmatprep.subr.bf16.mxu0 %v4128_v50 }
  0x99   : > { %3687 = vmatmul.mubr.bf16.vlgmr.msra.gmra.mrb[0].mxu1 %v4637_v35  ;;  %v4133_v35 = vld [vmem:[%s4988_s3 + $0xd8] sm:$0xff]  }
  0x9a   : > { %3815 = vmatmul.mubr.bf16.vlgmr.msra.gmra.mrb[0].mxu0 %v4723_v12  ;;  %3703 = vmatpush3.bf16.msra.mxu1 %v4127_v33 }
  0x9b   : > { %3831 = vmatpush3.bf16.msra.mxu0 %v4128_v50  ;;  %3704 = vmatprep.subr.bf16.mxu1 %v4129_v15 }
  0x9c   : > { %3832 = vmatprep.subr.bf16.mxu0 %v4130_v45  ;;  %3690 = vmatprep.mubr.bf16.mxu1 %v4571_v40 }
  0x9d   : > { %3818 = vmatprep.mubr.bf16.mxu0 %v4740_v63 }
  0x9e   : > { %3705 = vmatpush3.bf16.msra.mxu1 %v4129_v15 }
  0x9f   : > { %3833 = vmatpush3.bf16.msra.mxu0 %v4130_v45  ;;  %3706 = vmatprep.subr.bf16.mxu1 %v4131_v41 }
  0xa0   : > { %3834 = vmatprep.subr.bf16.mxu0 %v4132_v39 }
  0xa1   : > { %3691 = vmatmul.mubr.bf16.gmra.mrb[4].mxu1 %v4655_v9 }
  0xa2   : > { %3819 = vmatmul.mubr.bf16.gmra.mrb[4].mxu0 %v4760_v20  ;;  %3707 = vmatpush3.bf16.msra.mxu1 %v4131_v41 }
  0xa3   : > { %3835 = vmatpush3.bf16.msra.mxu0 %v4132_v39  ;;  %3708 = vmatprep.subr.bf16.mxu1 %v4133_v35 }
  0xa4   : > { %3836 = vmatprep.subr.bf16.mxu0 %v4134_v48  ;;  %3694 = vmatprep.mubr.bf16.mxu1 %v4659_v34 }
  0xa5   : > { %3822 = vmatprep.mubr.bf16.mxu0 %v4771_v23 }
  0xa6   : > { %3709 = vmatpush3.bf16.msra.mxu1 %v4133_v35 }
  0xa7   : > { %3837 = vmatpush3.bf16.msra.mxu0 %v4134_v48  ;;  %3710 = vmatprep.subr.bf16.mxu1 %v4135_v14 }
  0xa8   : > { %3838 = vmatprep.subr.bf16.mxu0 %v4136_v1 }
  0xa9   : > { %3695 = vmatmul.mubr.bf16.gmra.mrb[8].mxu1 %v4684_v52 }
  0xaa   : > { %3823 = vmatmul.mubr.bf16.gmra.mrb[8].mxu0 %v4787_v59  ;;  %3711 = vmatpush3.bf16.msra.mxu1 %v4135_v14 }
  0xab   : > { %3839 = vmatpush3.bf16.msra.mxu0 %v4136_v1  ;;  %3712 = vmatprep.subr.bf16.mxu1 %v4137_v53 }
  0xac   : > { %3840 = vmatprep.subr.bf16.mxu0 %v4138_v2  ;;  %3698 = vmatprep.mubr.bf16.mxu1 %v4652_v22 }
  0xad   : > { %3826 = vmatprep.mubr.bf16.mxu0 %v4860_v6 }
  0xae   : > { %3713 = vmatpush3.bf16.msra.mxu1 %v4137_v53 }
  0xaf   : > { %3841 = vmatpush3.bf16.msra.mxu0 %v4138_v2  ;;  %3714 = vmatprep.subr.bf16.mxu1 %v4139_v7 }
  0xb0   : > { %3842 = vmatprep.subr.bf16.mxu0 %v4140_v54 }
  0xb1   : > { %3699 = vmatmul.mubr.bf16.gmra.mrb[12].mxu1 %v4774_v29 }
  0xb2   : > { %3827 = vmatmul.mubr.bf16.gmra.mrb[12].mxu0 %v2122_v24  ;;  %3715 = vmatpush3.bf16.msra.mxu1 %v4139_v7 }
  0xb3   : > { %3843 = vmatpush3.bf16.msra.mxu0 %v4140_v54  ;;  %3716 = vmatprep.subr.bf16.mxu1 %v4141_v5 }
  0xb4   : > { %3844 = vmatprep.subr.bf16.mxu0 %v4142_v30  ;;  %3718 = vmatprep.mubr.bf16.mxu1 %v4666_v13  ;;  %v4145_v13 = vld [vmem:[%s4988_s3 + $0x210] sm:$0xff]  }
  0xb5   : > { %3846 = vmatprep.mubr.bf16.mxu0 %v4437_v46  ;;  %v4146_v46 = vld [vmem:[%s4988_s3 + $0x218] sm:$0xff]  }
  0xb6   : > { %3717 = vmatpush3.bf16.msra.mxu1 %v4141_v5 }
  0xb7   : > { %3845 = vmatpush3.bf16.msra.mxu0 %v4142_v30  ;;  %3894 = vmatprep.subr.bf16.mxu1 %v4143_v11 }
  0xb8   : > { %3862 = vmatprep.subr.bf16.mxu0 %v4143_v11 }
  0xb9   : > { %3719 = vmatmul.mubr.bf16.vlgmr.msra.gmra.mrb[0].mxu1 %v4690_v55  ;;  %v3225_v55 = vld [vmem:[%s4395_s18 + $0x138] sm:$0xff] }
  0xba   : > { %3847 = vmatmul.mubr.bf16.vlgmr.msra.gmra.mrb[0].mxu0 %v4453_v51  ;;  %3902 = vmatpush3.bf16.msra.mxu1 %v4143_v11  ;;  %v4147_v51 = vld [vmem:[%s4988_s3 + $0x220] sm:$0xff]  }
  0xbb   : > { %3863 = vmatpush3.bf16.msra.mxu0 %v4143_v11  ;;  %3895 = vmatprep.subr.bf16.mxu1 %v4144_v27 }
  0xbc   : > { %3864 = vmatprep.subr.bf16.mxu0 %v4144_v27  ;;  %3722 = vmatprep.mubr.bf16.mxu1 %v4723_v12  ;;  %v2531_v12 = vrot.slane %v4846_v28, 1 }
  0xbd   : > { %3850 = vmatprep.mubr.bf16.mxu0 %v4469_v56  ;;  %v4148_v56 = vld [vmem:[%s4988_s3 + $0x228] sm:$0xff]  }
  0xbe   : > { %3903 = vmatpush3.bf16.msra.mxu1 %v4144_v27 }
  0xbf   : > { %3865 = vmatpush3.bf16.msra.mxu0 %v4144_v27  ;;  %3896 = vmatprep.subr.bf16.mxu1 %v4145_v13 }
  0xc0   : > { %3866 = vmatprep.subr.bf16.mxu0 %v4145_v13 }
  0xc1   : > { %3723 = vmatmul.mubr.bf16.gmra.mrb[4].mxu1 %v4740_v63  ;;  %v2533_v63 = vrot.slane %v3225_v55, 1 }
  0xc2   : > { %3851 = vmatmul.mubr.bf16.gmra.mrb[4].mxu0 %v4482_v60  ;;  %3904 = vmatpush3.bf16.msra.mxu1 %v4145_v13  ;;  %v4149_v60 = vld [vmem:[%s4988_s3 + $0x230] sm:$0xff]  }
  0xc3   : > { %3867 = vmatpush3.bf16.msra.mxu0 %v4145_v13  ;;  %3897 = vmatprep.subr.bf16.mxu1 %v4146_v46  ;;  %v2534_v36 = vsel %vm1020_vm0, %v2531_v12, %v2533_v63 }
  0xc4   : > { %3868 = vmatprep.subr.bf16.mxu0 %v4146_v46  ;;  %3726 = vmatprep.mubr.bf16.mxu1 %v4760_v20 }
  0xc5   : > { %3854 = vmatprep.mubr.bf16.mxu0 %v4497_v3  ;;  %v2308_v3 = vpack.c.bf16 %v4846_v28, %v4843_v26 }
  0xc6   : > { %3905 = vmatpush3.bf16.msra.mxu1 %v4146_v46 }
  0xc7   : > { %3869 = vmatpush3.bf16.msra.mxu0 %v4146_v46  ;;  %3898 = vmatprep.subr.bf16.mxu1 %v4147_v51 }
  0xc8   : > { %3870 = vmatprep.subr.bf16.mxu0 %v4147_v51 }
  0xc9   : > { %3727 = vmatmul.mubr.bf16.gmra.mrb[8].mxu1 %v4771_v23 }
  0xca   : > { %3855 = vmatmul.mubr.bf16.gmra.mrb[8].mxu0 %v4588_v38  ;;  %3906 = vmatpush3.bf16.msra.mxu1 %v4147_v51  ;;  %v4150_v38 = vld [vmem:[%s4988_s3 + $0x238] sm:$0xff]  }
  0xcb   : > { %3871 = vmatpush3.bf16.msra.mxu0 %v4147_v51  ;;  %3899 = vmatprep.subr.bf16.mxu1 %v4148_v56 }
  0xcc   : > { %3872 = vmatprep.subr.bf16.mxu0 %v4148_v56  ;;  %3730 = vmatprep.mubr.bf16.mxu1 %v4787_v59 }
  0xcd   : > { %3858 = vmatprep.mubr.bf16.mxu0 %v4621_v16  ;;  %v2530_v16 = vrot.slane %v4843_v26, 1 }
  0xce   : > { %3907 = vmatpush3.bf16.msra.mxu1 %v4148_v56 }
  0xcf   : > { %3873 = vmatpush3.bf16.msra.mxu0 %v4148_v56  ;;  %3900 = vmatprep.subr.bf16.mxu1 %v4149_v60  ;;  %v2532_v20 = vsel %vm1020_vm0, %v2530_v16, %v2531_v12 }
  0xd0   : > { %3874 = vmatprep.subr.bf16.mxu0 %v4149_v60 }
  0xd1   : > { %3731 = vmatmul.mubr.bf16.gmra.mrb[12].mxu1 %v4860_v6 }
  0xd2   : > { %3859 = vmatmul.mubr.bf16.gmra.mrb[12].mxu0 %v2308_v3  ;;  %3908 = vmatpush3.bf16.msra.mxu1 %v4149_v60 }
  0xd3   : > { %3875 = vmatpush3.bf16.msra.mxu0 %v4149_v60  ;;  %3901 = vmatprep.subr.bf16.mxu1 %v4150_v38 }
  0xd4   : > { %3876 = vmatprep.subr.bf16.mxu0 %v4150_v38  ;;  %3878 = vmatprep.mubr.bf16.mxu0 %v4571_v40  ;;  %v2558_v40 = vpack.c.bf16 %v2534_v36, %v2532_v20 }
  0xd5   : > { %3886 = vmatprep.mubr.bf16.mxu1 %v4652_v22 }
  0xd6   : > { %3909 = vmatpush3.bf16.msra.mxu1 %v4150_v38 }
  0xd7   : > { %3877 = vmatpush3.bf16.msra.mxu0 %v4150_v38 }
  0xd9   : > { %3887 = vmatmul.mubr.bf16.vlgmr.msra.gmra.mrb[16].mxu1 %v4774_v29 }
  0xda   : > { %3879 = vmatmul.mubr.bf16.vlgmr.msra.gmra.mrb[0].mxu0 %v4655_v9  ;;  %3890 = vmatprep.mubr.bf16.mxu1 %v4693_v32 }
  0xdb   : > { %3882 = vmatprep.mubr.bf16.mxu0 %v4659_v34 }
  0xe1   : > { %3891 = vmatmul.mubr.bf16.gmra.mrb[20].mxu1 %v2558_v40 }
  0xe2   : > { %3883 = vmatmul.mubr.bf16.gmra.mrb[4].mxu0 %v4684_v52 }
 0x18c   : > { %v3720_v22 = vpop.f32.mrb[0].mxu1 }
 0x18d   : > { %v1485_v18 = vpop.f32.mrb[1].mxu1 }
 0x18e   : > { %v3721_v8 = vpop.f32.mrb[2].mxu1 }
 0x18f   : > { %v1488_v23 = vpop.f32.mrb[3].mxu1 }
 0x194   : > { %v3724_v37 = vpop.f32.mrb[4].mxu1 }
 0x195   : > { %v4933_v29 = vpop.f32.mrb[5].mxu1 }
 0x196   : > { %v4935_v9 = vpop.f32.mrb[6].mxu1 }
 0x197   : > { %v4937_v32 = vpop.f32.mrb[7].mxu1 }
 0x19c   : > { %v3728_v44 = vpop.f32.mrb[8].mxu1 }
 0x19d   : > { %v3856_v43 = vpop.f32.mrb[8].mxu0  ;;  %v1517_v47 = vpop.f32.mrb[9].mxu1 }
 0x19e   : > { %v3918_v59 = vadd.f32 %v3856_v43, %v3728_v44  ;;  %v2440_v34 = vpop.f32.mrb[9].mxu0  ;;  %v3729_v57 = vpop.f32.mrb[10].mxu1 }
 0x19f   : > { %v3920_v61 = vadd.f32 %v2440_v34, %v1517_v47  ;;  %v3857_v33 = vpop.f32.mrb[10].mxu0  ;;  %v1520_v52 = vpop.f32.mrb[11].mxu1 }
 0x1a0   : > { %v3922_v50 = vadd.f32 %v3857_v33, %v3729_v57  ;;  %v2443_v15 = vpop.f32.mrb[11].mxu0 }
 0x1a1   : > { %v3924_v45 = vadd.f32 %v2443_v15, %v1520_v52 }
 0x1a4   : > { %v3732_v41 = vpop.f32.mrb[12].mxu1 }
 0x1a5   : > { %v3860_v39 = vpop.f32.mrb[12].mxu0  ;;  %v1533_v35 = vpop.f32.mrb[13].mxu1 }
 0x1a6   : > { %v3926_v49 = vadd.f32 %v3860_v39, %v3732_v41  ;;  %v2456_v48 = vpop.f32.mrb[13].mxu0  ;;  %v3733_v58 = vpop.f32.mrb[14].mxu1 }
 0x1a7   : > { %v3928_v17 = vadd.f32 %v2456_v48, %v1533_v35  ;;  %v3861_v0 = vpop.f32.mrb[14].mxu0  ;;  %v1536_v14 = vpop.f32.mrb[15].mxu1 }
 0x1a8   : > { %v3930_v1 = vadd.f32 %v3861_v0, %v3733_v58  ;;  %v2459_v21 = vpop.f32.mrb[15].mxu0 }
 0x1a9   : > { %v3932_v26 = vadd.f32 %v2459_v21, %v1536_v14 }
 0x1ac   : > { %v3888_v28 = vpop.f32.mrb[16].mxu1 }
 0x1ad   : > { %v3880_v31 = vpop.f32.mrb[0].mxu0  ;;  %v4939_v42 = vadd.f32 %v3918_v59, %v3888_v28  ;;  %v2690_v53 = vpop.f32.mrb[17].mxu1 }
 0x1ae   : > { %v3910_v62 = vadd.f32 %v3880_v31, %v3720_v22  ;;  %v2658_v4 = vpop.f32.mrb[1].mxu0  ;;  %v4941_v25 = vadd.f32 %v3920_v61, %v2690_v53  ;;  %v3889_v2 = vpop.f32.mrb[18].mxu1 }
 0x1af   : > { %v3911_v6 = vadd.f32 %v2658_v4, %v1485_v18  ;;  %v3881_v7 = vpop.f32.mrb[2].mxu0  ;;  %v4943_v10 = vadd.f32 %v3922_v50, %v3889_v2  ;;  %v2693_v19 = vpop.f32.mrb[19].mxu1 }
 0x1b0   : > { %v3912_v54 = vadd.f32 %v3881_v7, %v3721_v8  ;;  %v2661_v24 = vpop.f32.mrb[3].mxu0  ;;  %v3925_v5 = vadd.f32 %v3924_v45, %v2693_v19  ;;  %v2840_v38 = vmul.f32 %v3910_v62, %v3910_v62 }
 0x1b1   : > { %v3428_v30 = vpack.c.bf16 %v4943_v10, %v4939_v42  ;;  %v3913_v11 = vadd.f32 %v2661_v24, %v1488_v23  ;;  %v2838_v46 = vmul.f32 %v3911_v6, %v3911_v6 }
 0x1b2   : > { %v3408_v27 = vpack.c.bf16 %v3912_v54, %v3910_v62  ;;  %v3423_v13 = vpack.c.bf16 %v3925_v5, %v4941_v25  ;;  %v2841_v8 = vmul.f32 %v3912_v54, %v3912_v54  ;;  %v2847_v31 = vmul.f32 %v3925_v5, %v3925_v5 }
 0x1b3   : > { %3459 = vst [vmem:[%s4263_s11 + $0x28] sm:$0xff] %v3428_v30   ;;  %v3403_v51 = vpack.c.bf16 %v3913_v11, %v3911_v6  ;;  %v2817_v56 = vadd.f32 %v3913_v11, %v3911_v6  ;;  %v2839_v60 = vmul.f32 %v3913_v11, %v3913_v11  ;;  %v2849_v6 = vmul.f32 %v4943_v10, %v4943_v10 }
 0x1b4   : > { %3455 = vst [vmem:[%s4263_s11 + $0x8] sm:$0xff] %v3408_v27   ;;  %3458 = vst [vmem:[%s4263_s11 + $0x20] sm:$0xff] %v3423_v13   ;;  %v3892_v3 = vpop.f32.mrb[20].mxu1 }
 0x1b5   : > { %3404 = vst [vmem:[%s4263_s11] sm:$0xff] %v3403_v51   ;;  %v2818_v55 = vadd.f32 %v3910_v62, %v2817_v56  ;;  %v2854_v16 = vadd.f32 %v2839_v60, %v2838_v46  ;;  %v3884_v12 = vpop.f32.mrb[4].mxu0  ;;  %v3927_v63 = vadd.f32 %v3926_v49, %v3892_v3  ;;  %v2706_v20 = vpop.f32.mrb[21].mxu1 }
 0x1b6   : > { %v3914_v36 = vadd.f32 %v3884_v12, %v3724_v37  ;;  %v2674_v40 = vpop.f32.mrb[5].mxu0  ;;  %v3929_v22 = vadd.f32 %v3928_v17, %v2706_v20  ;;  %v3893_v18 = vpop.f32.mrb[22].mxu1 }
 0x1b7   : > { %v2855_v23 = vadd.f32 %v2854_v16, %v2840_v38  ;;  %v3915_v44 = vadd.f32 %v2674_v40, %v4933_v29  ;;  %v2819_v43 = vadd.f32 %v3912_v54, %v2818_v55  ;;  %v3885_v47 = vpop.f32.mrb[6].mxu0  ;;  %v2709_v59 = vpop.f32.mrb[23].mxu1  ;;  %v3931_v57 = vadd.f32 %v3930_v1, %v3893_v18 }
 0x1b8   : > { %v3916_v34 = vadd.f32 %v3885_v47, %v4935_v9  ;;  %v2677_v61 = vpop.f32.mrb[7].mxu0  ;;  %v3933_v49 = vadd.f32 %v3932_v26, %v2709_v59  ;;  %v2844_v48 = vmul.f32 %v3914_v36, %v3914_v36  ;;  %v2848_v26 = vmul.f32 %v4939_v42, %v4939_v42 }
 0x1b9   : > { %v2820_v33 = vadd.f32 %v3915_v44, %v2819_v43  ;;  %v2842_v52 = vmul.f32 %v3915_v44, %v3915_v44  ;;  %v2856_v37 = vadd.f32 %v2855_v23, %v2841_v8  ;;  %v3917_v50 = vadd.f32 %v2677_v61, %v4937_v32 }
 0x1ba   : > { %v3418_v15 = vpack.c.bf16 %v3916_v34, %v3914_v36  ;;  %v3438_v45 = vpack.c.bf16 %v3931_v57, %v3927_v63  ;;  %v3433_v17 = vpack.c.bf16 %v3933_v49, %v3929_v22  ;;  %v2845_v0 = vmul.f32 %v3916_v34, %v3916_v34 }
 0x1bb   : > { %v2857_v41 = vadd.f32 %v2856_v37, %v2842_v52  ;;  %v3413_v29 = vpack.c.bf16 %v3917_v50, %v3915_v44  ;;  %v2821_v39 = vadd.f32 %v3917_v50, %v2820_v33  ;;  %v2843_v35 = vmul.f32 %v3917_v50, %v3917_v50 }
 0x1bc   : > { %3457 = vst [vmem:[%s4263_s11 + $0x18] sm:$0xff] %v3418_v15   ;;  %3461 = vst [vmem:[%s4263_s11 + $0x38] sm:$0xff] %v3438_v45   ;;  %v2846_v32 = vmul.f32 %v4941_v25, %v4941_v25  ;;  %v2850_v54 = vmul.f32 %v3929_v22, %v3929_v22  ;;  %v2851_v11 = vmul.f32 %v3933_v49, %v3933_v49  ;;  %v2875_v38 = vlaneseq }
 0x1bd   : > { %3456 = vst [vmem:[%s4263_s11 + $0x10] sm:$0xff] %v3413_v29   ;;  %v2822_v9 = vadd.f32 %v3914_v36, %v2821_v39  ;;  %v2858_v58 = vadd.f32 %v2857_v41, %v2843_v35  ;;  %3460 = vst [vmem:[%s4263_s11 + $0x30] sm:$0xff] %v3433_v17   ;;  %v2852_v13 = vmul.f32 %v3927_v63, %v3927_v63 }
 0x1be   : > { %v2853_v51 = vmul.f32 %v3931_v57, %v3931_v57  ;;  %v2876_v20 = vshrl.u32 %v2875_v38, 7 }
 0x1bf   : > { %v2823_v14 = vadd.f32 %v3916_v34, %v2822_v9  ;;  %v2859_v1 = vadd.f32 %v2858_v58, %v2844_v48 }
 0x1c0   : > { %v2877_v8 = vsub.s32 0, %v2876_v20 }
 0x1c1   : > { %v2824_v21 = vadd.f32 %v4941_v25, %v2823_v14  ;;  %v2860_v28 = vadd.f32 %v2859_v1, %v2845_v0 }
 0x1c3   : > { %v2861_v53 = vadd.f32 %v2860_v28, %v2846_v32  ;;  %v2825_v62 = vadd.f32 %v3925_v5, %v2824_v21 }
 0x1c5   : > { %v2826_v4 = vadd.f32 %v4939_v42, %v2825_v62  ;;  %v2862_v2 = vadd.f32 %v2861_v53, %v2847_v31 }
 0x1c7   : > { %v2827_v7 = vadd.f32 %v4943_v10, %v2826_v4  ;;  %v2863_v19 = vadd.f32 %v2862_v2, %v2848_v26 }
 0x1c9   : > { %v2828_v24 = vadd.f32 %v3929_v22, %v2827_v7  ;;  %v2864_v30 = vadd.f32 %v2863_v19, %v2849_v6 }
 0x1cb   : > { %v2829_v25 = vadd.f32 %v3933_v49, %v2828_v24  ;;  %v2865_v27 = vadd.f32 %v2864_v30, %v2850_v54 }
 0x1cd   : > { %v2830_v5 = vadd.f32 %v3927_v63, %v2829_v25  ;;  %v2866_v46 = vadd.f32 %v2865_v27, %v2851_v11 }
 0x1cf   : > { %v2831_v56 = vadd.f32 %v3931_v57, %v2830_v5  ;;  %v2867_v60 = vadd.f32 %v2866_v46, %v2852_v13 }
 0x1d1   : > { %v2832_v42 = vrot.slane %v2831_v56, 4  ;;  %v2868_v3 = vadd.f32 %v2867_v60, %v2853_v51 }
 0x1d3   : > { %v2833_v55 = vadd.f32 %v2832_v42, %v2831_v56  ;;  %v2869_v10 = vrot.slane %v2868_v3, 4 }
 0x1d5   : > { %v2834_v16 = vrot.slane %v2833_v55, 2  ;;  %v2870_v12 = vadd.f32 %v2869_v10, %v2868_v3 }
 0x1d7   : > { %v2835_v36 = vadd.f32 %v2834_v16, %v2833_v55  ;;  %v2871_v40 = vrot.slane %v2870_v12, 2 }
 0x1d9   : > { %v2836_v22 = vrot.slane %v2835_v36, 1  ;;  %v2872_v18 = vadd.f32 %v2871_v40, %v2870_v12 }
 0x1db   : > { %v2837_v63 = vadd.f32 %v2836_v22, %v2835_v36  ;;  %v2873_v23 = vrot.slane %v2872_v18, 1 }
 0x1dd   : > { %v2874_v44 = vadd.f32 %v2873_v23, %v2872_v18  ;;  %v2878_v43 = vrot.slane %v2837_v63, %v2877_v8 }
 0x1df   : > { %v2882_v47 = vrot.slane %v2874_v44, %v2877_v8  ;;  %2883 = vst [vmem:[%s4268_s15] sm:$0xff] %v2878_v43 }
 0x1e1   : > { %2884 = vst [vmem:[%s4268_s15 + $0x8] sm:$0xff] %v2882_v47 }
 0x1e2 PF: > { %s16_s22 = sadd.s32 1, %s4189_s22   ;;  %s4991_s18 = smov %s4181_s20 }
 0x1e3   : > { %p13_p9 = scmp.ge.s32.totalorder %s16_s22, 6   ;;  %s4992_s19 = smov %s4185_s21 }
 0x1e4   : > { %s4993_s20 = smov %s4996_s23  ;;  %s4994_s21 = smov %s5000_s24 }
 0x1e5   :  { %15 = sbr.rel (!%p13_p9) target bundleno = 3 (0x3), region = 94 }

</bundles_post_ra>
